<compile_context>
chip_gen: v7x
topology: tpu7x:2x2x1
jax: 0.10.0
libtpu: 0.0.40
codegen_flags: <defaults>
</compile_context>

<pallas_src>
import math

import jax
import jax.numpy as jnp
from jax import lax
from jax.experimental import pallas as pl
from jax.experimental.pallas import tpu as pltpu

C = 128      # embedding width
CQ = C // 4  # q/k width
CIN = 9      # input point feature dim


# ------------------------------- kernel ------------------------------------ #

def _make_spct_kernel(n, tq):
    """Fused embedding + 4 offset-attention layers for one batch element."""
    nq = n // tq
    f32 = jnp.float32
    bf16 = jnp.bfloat16

    def kernel(x_ref, w1_ref, s1_ref, b1_ref, w2_ref, s2_ref, b2_ref,
               wq_ref, wv_ref, bv_ref, wt_ref, bt_ref, sa_ref, ba_ref, o_ref):
        # ---- Embedding: two 1x1 convs (per-point matmuls) + folded BN + ReLU.
        x = x_ref[0]                                               # [N, 9] f32
        h = jnp.dot(x, w1_ref[...], preferred_element_type=f32)    # tiny K=9, f32
        h = jnp.maximum(h * s1_ref[...] + b1_ref[...], 0.0)
        h = jnp.dot(h.astype(bf16), w2_ref[...], preferred_element_type=f32)
        h = jnp.maximum(h * s2_ref[...] + b2_ref[...], 0.0)        # [N, C]
        # Stage 0 written directly into the NCW output slab.
        o_ref[0, 0:C, :] = jnp.transpose(h, (1, 0))

        cur = h
        for l in range(4):                                         # 4 OA layers
            cur_bf = cur.astype(bf16)
            q = jnp.dot(cur_bf, wq_ref[l], preferred_element_type=f32)   # [N,CQ]
            v = jnp.dot(cur_bf, wv_ref[l], preferred_element_type=f32) + bv_ref[l]
            qb = q.astype(bf16)

            # Query-tiled offset attention; k == q (shared conv weight).
            #   p    = exp(energy - rowmax)            (softmax numerator)
            #   rinv = 1 / rowsum(p)                   (softmax denominator)
            # Column (L1-over-queries) renormalization folded into one divide:
            #   num[j,:] += p[i,j] * rinv[i] * v[i,:]
            #   den[j]   += p[i,j] * rinv[i]
            #   x_r       = num / (1e-9 + den)
            num = jnp.zeros((n, C), f32)
            den = jnp.zeros((n, 1), f32)
            for ti in range(nq):
                rows = slice(ti * tq, (ti + 1) * tq)
                e = lax.dot_general(qb[rows], qb, (((1,), (1,)), ((), ())),
                                    preferred_element_type=f32)      # [tq, N]
                p = jnp.exp(e - jnp.max(e, axis=-1, keepdims=True))
                rinv = pl.reciprocal(jnp.sum(p, axis=-1, keepdims=True),
                                     approx=True)                    # [tq, 1]
                pb = p.astype(bf16)
                vs = (v[rows] * rinv).astype(bf16)                   # [tq, C]
                rb = rinv.astype(bf16)                               # [tq, 1]
                num = num + lax.dot_general(
                    pb, vs, (((0,), (0,)), ((), ())), preferred_element_type=f32)
                den = den + lax.dot_general(
                    pb, rb, (((0,), (0,)), ((), ())), preferred_element_type=f32)

            x_r = num * pl.reciprocal(1e-9 + den, approx=True)       # [N, C]
            t = jnp.dot((cur - x_r).astype(bf16), wt_ref[l],
                        preferred_element_type=f32) + bt_ref[l]
            t = jnp.maximum(t * sa_ref[l] + ba_ref[l], 0.0)          # BN + ReLU
            cur = cur + t                                            # residual
            o_ref[0, (l + 1) * C:(l + 2) * C, :] = jnp.transpose(cur, (1, 0))

    return kernel


# ------------------------------- wrapper ------------------------------------ #

def spct_encoder_forward(x_ncw, params, q_tile=None):
    """x_ncw: [B, 9, N] (PyTorch NCW). Returns [B, 640, N] (NCW)."""
    B, cin, N = x_ncw.shape
    assert cin == CIN
    if q_tile is None:
        q_tile = N if N <= 512 else 512
    if (N % q_tile != 0) or (q_tile % 16 != 0):
        q_tile = N                       # fall back to a single query tile

    # Tiny input transpose (9 channels) so points sit on sublanes in-kernel.
    x = jnp.transpose(x_ncw, (0, 2, 1)).astype(jnp.float32)          # [B, N, 9]
    bf = jnp.bfloat16

    vec = pl.BlockSpec((1, C), lambda b: (0, 0))
    vec4 = pl.BlockSpec((4, 1, C), lambda b: (0, 0, 0))

    out = pl.pallas_call(
        _make_spct_kernel(N, q_tile),
        out_shape=jax.ShapeDtypeStruct((B, 5 * C, N), jnp.float32),
        grid=(B,),
        in_specs=[
            pl.BlockSpec((1, N, CIN), lambda b: (b, 0, 0)),          # x
            pl.BlockSpec((CIN, C), lambda b: (0, 0)),                # W1 (f32)
            vec, vec,                                                # s1, b1
            pl.BlockSpec((C, C), lambda b: (0, 0)),                  # W2 (bf16)
            vec, vec,                                                # s2, b2
            pl.BlockSpec((4, C, CQ), lambda b: (0, 0, 0)),           # Wq (bf16)
            pl.BlockSpec((4, C, C), lambda b: (0, 0, 0)),            # Wv (bf16)
            vec4,                                                    # bv
            pl.BlockSpec((4, C, C), lambda b: (0, 0, 0)),            # Wt (bf16)
            vec4, vec4, vec4,                                        # bt, s, b
        ],
        out_specs=pl.BlockSpec((1, 5 * C, N), lambda b: (b, 0, 0)),
        compiler_params=pltpu.CompilerParams(
            dimension_semantics=("parallel",),
            vmem_limit_bytes=64 * 1024 * 1024),
    )(x,
      params["W1"], params["s1"], params["b1"],
      params["W2"].astype(bf), params["s2"], params["b2"],
      params["Wq"].astype(bf), params["Wv"].astype(bf), params["bv"],
      params["Wt"].astype(bf), params["bt"], params["s"], params["b"])
    return out


# ------------------------------ parameters ---------------------------------- #

def _bn_fold(key, c):
    k1, k2 = jax.random.split(key)
    gamma = 1.0 + 0.1 * jax.random.normal(k1, (1, c), jnp.float32)
    beta = 0.1 * jax.random.normal(k2, (1, c), jnp.float32)
    # eval-mode BN with default running stats (mean=0, var=1), eps=1e-5
    scale = gamma / jnp.sqrt(1.0 + 1e-5)
    bias = beta
    return scale, bias


def init_params(key):
    keys = jax.random.split(key, 32)
    it = iter(keys)

    def w(shape, fan_in):
        return jax.random.normal(next(it), shape, jnp.float32) / math.sqrt(fan_in)

    p = {}
    p["W1"] = w((CIN, C), CIN)
    p["s1"], p["b1"] = _bn_fold(next(it), C)
    p["W2"] = w((C, C), C)
    p["s2"], p["b2"] = _bn_fold(next(it), C)
    # 4 OA layers, weights stacked on a leading axis.
    p["Wq"] = w((4, C, CQ), C)                   # shared by q_conv / k_conv
    p["Wv"] = w((4, C, C), C)
    p["bv"] = 0.05 * jax.random.normal(next(it), (4, 1, C), jnp.float32)
    p["Wt"] = w((4, C, C), C)
    p["bt"] = 0.05 * jax.random.normal(next(it), (4, 1, C), jnp.float32)
    sb = [_bn_fold(next(it), C) for _ in range(4)]
    p["s"] = jnp.stack([s for s, _ in sb])       # [4, 1, C]
    p["b"] = jnp.stack([b for _, b in sb])       # [4, 1, C]
    return p


# --------------------------- pure-JAX reference ------------------------------ #

def ref_forward(x_ncw, params):
    hp = lax.Precision.HIGHEST
    x = jnp.transpose(x_ncw, (0, 2, 1)).astype(jnp.float32)          # [B, N, 9]
    h = jnp.einsum("bnk,kc->bnc", x, params["W1"], precision=hp)
    h = jnp.maximum(h * params["s1"] + params["b1"], 0.0)
    h = jnp.einsum("bnk,kc->bnc", h, params["W2"], precision=hp)
    h = jnp.maximum(h * params["s2"] + params["b2"], 0.0)
    feats = [h]
    cur = h
    for l in range(4):
        q = jnp.einsum("bnk,kc->bnc", cur, params["Wq"][l], precision=hp)
        v = jnp.einsum("bnk,kc->bnc", cur, params["Wv"][l], precision=hp)
        v = v + params["bv"][l]
        energy = jnp.einsum("bic,bjc->bij", q, q, precision=hp)
        attn = jax.nn.softmax(energy, axis=-1)
        attn = attn / (1e-9 + attn.sum(axis=1, keepdims=True))
        x_r = jnp.einsum("bij,bic->bjc", attn, v, precision=hp)
        t = jnp.einsum("bnk,kc->bnc", cur - x_r, params["Wt"][l], precision=hp)
        t = t + params["bt"][l]
        t = jnp.maximum(t * params["s"][l] + params["b"][l], 0.0)
        cur = cur + t
        feats.append(cur)
    out = jnp.concatenate(feats, axis=-1)                            # [B, N, 640]
    return jnp.transpose(out, (0, 2, 1))                             # [B, 640, N]


# ---------------------------------- main ------------------------------------ #

if __name__ == "__main__":
    B, N = 2, 64
    key = jax.random.PRNGKey(0)
    kx, kp = jax.random.split(key)
    x = jax.random.normal(kx, (B, CIN, N), jnp.float32)   # PyTorch NCW input
    params = init_params(kp)

    # q_tile=32 exercises the multi-tile (accumulating) attention path.
    out = spct_encoder_forward(x, params, q_tile=32)
    out = jax.block_until_ready(out)
    assert out.shape == (B, 5 * C, N), out.shape

    ref = jax.block_until_ready(ref_forward(x, params))
    abs_err = float(jnp.max(jnp.abs(out - ref)))
    rel_err = float(jnp.linalg.norm(out - ref) / jnp.linalg.norm(ref))
    # bf16 MXU operands with f32 accumulation across a 5-stage residual chain,
    # compared against an f32 "highest"-precision reference.
    assert rel_err < 5e-2 and abs_err < 0.3, (rel_err, abs_err)

    print("KERNEL_OK")
</pallas_src>

<mosaic_0001>
module attributes {stable_mosaic.version = 11 : i64} {
  func.func @kernel(%arg0: i32, %arg1: memref<1x64x9xf32, #tpu.memory_space<vmem>>, %arg2: memref<9x128xf32, #tpu.memory_space<vmem>>, %arg3: memref<1x128xf32, #tpu.memory_space<vmem>>, %arg4: memref<1x128xf32, #tpu.memory_space<vmem>>, %arg5: memref<128x128xbf16, #tpu.memory_space<vmem>>, %arg6: memref<1x128xf32, #tpu.memory_space<vmem>>, %arg7: memref<1x128xf32, #tpu.memory_space<vmem>>, %arg8: memref<4x128x32xbf16, #tpu.memory_space<vmem>>, %arg9: memref<4x128x128xbf16, #tpu.memory_space<vmem>>, %arg10: memref<4x1x128xf32, #tpu.memory_space<vmem>>, %arg11: memref<4x128x128xbf16, #tpu.memory_space<vmem>>, %arg12: memref<4x1x128xf32, #tpu.memory_space<vmem>>, %arg13: memref<4x1x128xf32, #tpu.memory_space<vmem>>, %arg14: memref<4x1x128xf32, #tpu.memory_space<vmem>>, %arg15: memref<1x640x64xf32, #tpu.memory_space<vmem>>) attributes {dimension_semantics = [#tpu.dimension_semantics<parallel>], iteration_bounds = array<i64: 2>, scalar_prefetch = 0 : i64, scratch_operands = 0 : i64, tpu.core_type = #tpu.core_type<tc>, window_params = [{transform_indices = @transform_0, window_bounds = array<i64: 1, 64, 9>}, {pipeline_mode = #tpu.pipeline_mode<synchronous>, transform_indices = @transform_1, window_bounds = array<i64: 9, 128>}, {pipeline_mode = #tpu.pipeline_mode<synchronous>, transform_indices = @transform_2, window_bounds = array<i64: 1, 128>}, {pipeline_mode = #tpu.pipeline_mode<synchronous>, transform_indices = @transform_3, window_bounds = array<i64: 1, 128>}, {pipeline_mode = #tpu.pipeline_mode<synchronous>, transform_indices = @transform_4, window_bounds = array<i64: 128, 128>}, {pipeline_mode = #tpu.pipeline_mode<synchronous>, transform_indices = @transform_5, window_bounds = array<i64: 1, 128>}, {pipeline_mode = #tpu.pipeline_mode<synchronous>, transform_indices = @transform_6, window_bounds = array<i64: 1, 128>}, {pipeline_mode = #tpu.pipeline_mode<synchronous>, transform_indices = @transform_7, window_bounds = array<i64: 4, 128, 32>}, {pipeline_mode = #tpu.pipeline_mode<synchronous>, transform_indices = @transform_8, window_bounds = array<i64: 4, 128, 128>}, {pipeline_mode = #tpu.pipeline_mode<synchronous>, transform_indices = @transform_9, window_bounds = array<i64: 4, 1, 128>}, {pipeline_mode = #tpu.pipeline_mode<synchronous>, transform_indices = @transform_10, window_bounds = array<i64: 4, 128, 128>}, {pipeline_mode = #tpu.pipeline_mode<synchronous>, transform_indices = @transform_11, window_bounds = array<i64: 4, 1, 128>}, {pipeline_mode = #tpu.pipeline_mode<synchronous>, transform_indices = @transform_12, window_bounds = array<i64: 4, 1, 128>}, {pipeline_mode = #tpu.pipeline_mode<synchronous>, transform_indices = @transform_13, window_bounds = array<i64: 4, 1, 128>}, {transform_indices = @transform_14, window_bounds = array<i64: 1, 640, 64>}]} {
    %c0 = arith.constant 0 : index
    %c0_0 = arith.constant 0 : index
    %c0_1 = arith.constant 0 : index
    %0 = vector.load %arg1[%c0, %c0_0, %c0_1] : memref<1x64x9xf32, #tpu.memory_space<vmem>>, vector<1x64x9xf32>
    %1 = vector.shape_cast %0 : vector<1x64x9xf32> to vector<64x9xf32>
    %c0_2 = arith.constant 0 : index
    %c0_3 = arith.constant 0 : index
    %2 = vector.load %arg2[%c0_2, %c0_3] : memref<9x128xf32, #tpu.memory_space<vmem>>, vector<9x128xf32>
    %cst = arith.constant dense<0.000000e+00> : vector<64x128xf32>
    %3 = tpu.matmul %1, %2, %cst {dimension_numbers = #tpu.dot_dimension_numbers<[1], [0], [0], [1], [0, 0, 1, 1], [], []>} : vector<64x9xf32>, vector<9x128xf32>, vector<64x128xf32> -> vector<64x128xf32>
    %c0_4 = arith.constant 0 : index
    %c0_5 = arith.constant 0 : index
    %4 = vector.load %arg3[%c0_4, %c0_5] : memref<1x128xf32, #tpu.memory_space<vmem>>, vector<1x128xf32>
    %5 = vector.broadcast %4 : vector<1x128xf32> to vector<64x128xf32>
    %6 = arith.mulf %3, %5 : vector<64x128xf32>
    %c0_6 = arith.constant 0 : index
    %c0_7 = arith.constant 0 : index
    %7 = vector.load %arg4[%c0_6, %c0_7] : memref<1x128xf32, #tpu.memory_space<vmem>>, vector<1x128xf32>
    %8 = vector.broadcast %7 : vector<1x128xf32> to vector<64x128xf32>
    %9 = arith.addf %6, %8 : vector<64x128xf32>
    %cst_8 = arith.constant 0.000000e+00 : f32
    %10 = vector.broadcast %cst_8 : f32 to vector<64x128xf32>
    %11 = arith.maximumf %9, %10 : vector<64x128xf32>
    %12 = arith.truncf %11 : vector<64x128xf32> to vector<64x128xbf16>
    %c0_9 = arith.constant 0 : index
    %c0_10 = arith.constant 0 : index
    %13 = vector.load %arg5[%c0_9, %c0_10] : memref<128x128xbf16, #tpu.memory_space<vmem>>, vector<128x128xbf16>
    %cst_11 = arith.constant dense<0.000000e+00> : vector<64x128xf32>
    %14 = tpu.matmul %12, %13, %cst_11 {dimension_numbers = #tpu.dot_dimension_numbers<[1], [0], [0], [1], [0, 0, 1, 1], [], []>} : vector<64x128xbf16>, vector<128x128xbf16>, vector<64x128xf32> -> vector<64x128xf32>
    %c0_12 = arith.constant 0 : index
    %c0_13 = arith.constant 0 : index
    %15 = vector.load %arg6[%c0_12, %c0_13] : memref<1x128xf32, #tpu.memory_space<vmem>>, vector<1x128xf32>
    %16 = vector.broadcast %15 : vector<1x128xf32> to vector<64x128xf32>
    %17 = arith.mulf %14, %16 : vector<64x128xf32>
    %c0_14 = arith.constant 0 : index
    %c0_15 = arith.constant 0 : index
    %18 = vector.load %arg7[%c0_14, %c0_15] : memref<1x128xf32, #tpu.memory_space<vmem>>, vector<1x128xf32>
    %19 = vector.broadcast %18 : vector<1x128xf32> to vector<64x128xf32>
    %20 = arith.addf %17, %19 : vector<64x128xf32>
    %cst_16 = arith.constant 0.000000e+00 : f32
    %21 = vector.broadcast %cst_16 : f32 to vector<64x128xf32>
    %22 = arith.maximumf %20, %21 : vector<64x128xf32>
    %23 = tpu.transpose %22, [1, 0] : vector<64x128xf32> -> vector<128x64xf32>
    %c0_17 = arith.constant 0 : index
    %c0_18 = arith.constant 0 : index
    %c0_19 = arith.constant 0 : index
    %24 = vector.load %arg15[%c0_17, %c0_18, %c0_19] : memref<1x640x64xf32, #tpu.memory_space<vmem>>, vector<1x128x64xf32>
    %25 = vector.shape_cast %24 : vector<1x128x64xf32> to vector<128x64xf32>
    %26 = vector.shape_cast %23 : vector<128x64xf32> to vector<1x128x64xf32>
    tpu.vector_store %arg15[%c0_17, %c0_18, %c0_19], %26 {strides = array<i32>} : memref<1x640x64xf32, #tpu.memory_space<vmem>>, vector<1x128x64xf32>,
    %27 = arith.truncf %22 : vector<64x128xf32> to vector<64x128xbf16>
    %c0_20 = arith.constant 0 : index
    %c0_21 = arith.constant 0 : index
    %c0_22 = arith.constant 0 : index
    %28 = vector.load %arg8[%c0_20, %c0_21, %c0_22] : memref<4x128x32xbf16, #tpu.memory_space<vmem>>, vector<1x128x32xbf16>
    %29 = vector.shape_cast %28 : vector<1x128x32xbf16> to vector<128x32xbf16>
    %cst_23 = arith.constant dense<0.000000e+00> : vector<64x32xf32>
    %30 = tpu.matmul %27, %29, %cst_23 {dimension_numbers = #tpu.dot_dimension_numbers<[1], [0], [0], [1], [0, 0, 1, 1], [], []>} : vector<64x128xbf16>, vector<128x32xbf16>, vector<64x32xf32> -> vector<64x32xf32>
    %c0_24 = arith.constant 0 : index
    %c0_25 = arith.constant 0 : index
    %c0_26 = arith.constant 0 : index
    %31 = vector.load %arg9[%c0_24, %c0_25, %c0_26] : memref<4x128x128xbf16, #tpu.memory_space<vmem>>, vector<1x128x128xbf16>
    %32 = vector.shape_cast %31 : vector<1x128x128xbf16> to vector<128x128xbf16>
    %cst_27 = arith.constant dense<0.000000e+00> : vector<64x128xf32>
    %33 = tpu.matmul %27, %32, %cst_27 {dimension_numbers = #tpu.dot_dimension_numbers<[1], [0], [0], [1], [0, 0, 1, 1], [], []>} : vector<64x128xbf16>, vector<128x128xbf16>, vector<64x128xf32> -> vector<64x128xf32>
    %c0_28 = arith.constant 0 : index
    %c0_29 = arith.constant 0 : index
    %c0_30 = arith.constant 0 : index
    %34 = vector.load %arg10[%c0_28, %c0_29, %c0_30] : memref<4x1x128xf32, #tpu.memory_space<vmem>>, vector<1x1x128xf32>
    %35 = vector.shape_cast %34 : vector<1x1x128xf32> to vector<1x128xf32>
    %36 = vector.broadcast %35 : vector<1x128xf32> to vector<64x128xf32>
    %37 = arith.addf %33, %36 : vector<64x128xf32>
    %38 = arith.truncf %30 : vector<64x32xf32> to vector<64x32xbf16>
    %cst_31 = arith.constant 0.000000e+00 : f32
    %39 = vector.broadcast %cst_31 : f32 to vector<64x128xf32>
    %cst_32 = arith.constant 0.000000e+00 : f32
    %40 = vector.broadcast %cst_32 : f32 to vector<64x1xf32>
    %41 = vector.extract_strided_slice %38 {offsets = [0, 0], sizes = [32, 32], strides = [1, 1]} : vector<64x32xbf16> to vector<32x32xbf16>
    %cst_33 = arith.constant dense<0.000000e+00> : vector<32x64xf32>
    %42 = tpu.matmul %41, %38, %cst_33 {dimension_numbers = #tpu.dot_dimension_numbers<[1], [1], [0], [0], [0, 0, 1, 0], [], []>} : vector<32x32xbf16>, vector<64x32xbf16>, vector<32x64xf32> -> vector<32x64xf32>
    %cst_34 = arith.constant dense<0xFF800000> : vector<32xf32>
    %43 = vector.multi_reduction <maximumf>, %42, %cst_34 [1] : vector<32x64xf32> to vector<32xf32>
    %44 = vector.shape_cast %43 : vector<32xf32> to vector<32x1xf32>
    %45 = vector.broadcast %44 : vector<32x1xf32> to vector<32x64xf32>
    %46 = arith.subf %42, %45 : vector<32x64xf32>
    %47 = math.exp %46 : vector<32x64xf32>
    %cst_35 = arith.constant dense<0.000000e+00> : vector<32xf32>
    %48 = vector.multi_reduction <add>, %47, %cst_35 [1] : vector<32x64xf32> to vector<32xf32>
    %49 = vector.shape_cast %48 : vector<32xf32> to vector<32x1xf32>
    %50 = tpu.reciprocal %49 {approx = true} : vector<32x1xf32> -> vector<32x1xf32>
    %51 = arith.truncf %47 : vector<32x64xf32> to vector<32x64xbf16>
    %52 = vector.extract_strided_slice %37 {offsets = [0, 0], sizes = [32, 128], strides = [1, 1]} : vector<64x128xf32> to vector<32x128xf32>
    %53 = vector.broadcast %50 : vector<32x1xf32> to vector<32x128xf32>
    %54 = arith.mulf %52, %53 : vector<32x128xf32>
    %55 = arith.truncf %54 : vector<32x128xf32> to vector<32x128xbf16>
    %56 = arith.truncf %50 : vector<32x1xf32> to vector<32x1xbf16>
    %cst_36 = arith.constant dense<0.000000e+00> : vector<64x128xf32>
    %57 = tpu.matmul %51, %55, %cst_36 {dimension_numbers = #tpu.dot_dimension_numbers<[0], [0], [1], [1], [0, 1, 1, 1], [], []>} : vector<32x64xbf16>, vector<32x128xbf16>, vector<64x128xf32> -> vector<64x128xf32>
    %58 = arith.addf %39, %57 : vector<64x128xf32>
    %cst_37 = arith.constant dense<0.000000e+00> : vector<64x1xf32>
    %59 = tpu.matmul %51, %56, %cst_37 {dimension_numbers = #tpu.dot_dimension_numbers<[0], [0], [1], [1], [0, 1, 1, 1], [], []>} : vector<32x64xbf16>, vector<32x1xbf16>, vector<64x1xf32> -> vector<64x1xf32>
    %60 = arith.addf %40, %59 : vector<64x1xf32>
    %61 = vector.extract_strided_slice %38 {offsets = [32, 0], sizes = [32, 32], strides = [1, 1]} : vector<64x32xbf16> to vector<32x32xbf16>
    %cst_38 = arith.constant dense<0.000000e+00> : vector<32x64xf32>
    %62 = tpu.matmul %61, %38, %cst_38 {dimension_numbers = #tpu.dot_dimension_numbers<[1], [1], [0], [0], [0, 0, 1, 0], [], []>} : vector<32x32xbf16>, vector<64x32xbf16>, vector<32x64xf32> -> vector<32x64xf32>
    %cst_39 = arith.constant dense<0xFF800000> : vector<32xf32>
    %63 = vector.multi_reduction <maximumf>, %62, %cst_39 [1] : vector<32x64xf32> to vector<32xf32>
    %64 = vector.shape_cast %63 : vector<32xf32> to vector<32x1xf32>
    %65 = vector.broadcast %64 : vector<32x1xf32> to vector<32x64xf32>
    %66 = arith.subf %62, %65 : vector<32x64xf32>
    %67 = math.exp %66 : vector<32x64xf32>
    %cst_40 = arith.constant dense<0.000000e+00> : vector<32xf32>
    %68 = vector.multi_reduction <add>, %67, %cst_40 [1] : vector<32x64xf32> to vector<32xf32>
    %69 = vector.shape_cast %68 : vector<32xf32> to vector<32x1xf32>
    %70 = tpu.reciprocal %69 {approx = true} : vector<32x1xf32> -> vector<32x1xf32>
    %71 = arith.truncf %67 : vector<32x64xf32> to vector<32x64xbf16>
    %72 = vector.extract_strided_slice %37 {offsets = [32, 0], sizes = [32, 128], strides = [1, 1]} : vector<64x128xf32> to vector<32x128xf32>
    %73 = vector.broadcast %70 : vector<32x1xf32> to vector<32x128xf32>
    %74 = arith.mulf %72, %73 : vector<32x128xf32>
    %75 = arith.truncf %74 : vector<32x128xf32> to vector<32x128xbf16>
    %76 = arith.truncf %70 : vector<32x1xf32> to vector<32x1xbf16>
    %cst_41 = arith.constant dense<0.000000e+00> : vector<64x128xf32>
    %77 = tpu.matmul %71, %75, %cst_41 {dimension_numbers = #tpu.dot_dimension_numbers<[0], [0], [1], [1], [0, 1, 1, 1], [], []>} : vector<32x64xbf16>, vector<32x128xbf16>, vector<64x128xf32> -> vector<64x128xf32>
    %78 = arith.addf %58, %77 : vector<64x128xf32>
    %cst_42 = arith.constant dense<0.000000e+00> : vector<64x1xf32>
    %79 = tpu.matmul %71, %76, %cst_42 {dimension_numbers = #tpu.dot_dimension_numbers<[0], [0], [1], [1], [0, 1, 1, 1], [], []>} : vector<32x64xbf16>, vector<32x1xbf16>, vector<64x1xf32> -> vector<64x1xf32>
    %80 = arith.addf %60, %79 : vector<64x1xf32>
    %cst_43 = arith.constant 9.99999971E-10 : f32
    %81 = vector.broadcast %cst_43 : f32 to vector<64x1xf32>
    %82 = arith.addf %81, %80 : vector<64x1xf32>
    %83 = tpu.reciprocal %82 {approx = true} : vector<64x1xf32> -> vector<64x1xf32>
    %84 = vector.broadcast %83 : vector<64x1xf32> to vector<64x128xf32>
    %85 = arith.mulf %78, %84 : vector<64x128xf32>
    %86 = arith.subf %22, %85 : vector<64x128xf32>
    %87 = arith.truncf %86 : vector<64x128xf32> to vector<64x128xbf16>
    %c0_44 = arith.constant 0 : index
    %c0_45 = arith.constant 0 : index
    %c0_46 = arith.constant 0 : index
    %88 = vector.load %arg11[%c0_44, %c0_45, %c0_46] : memref<4x128x128xbf16, #tpu.memory_space<vmem>>, vector<1x128x128xbf16>
    %89 = vector.shape_cast %88 : vector<1x128x128xbf16> to vector<128x128xbf16>
    %cst_47 = arith.constant dense<0.000000e+00> : vector<64x128xf32>
    %90 = tpu.matmul %87, %89, %cst_47 {dimension_numbers = #tpu.dot_dimension_numbers<[1], [0], [0], [1], [0, 0, 1, 1], [], []>} : vector<64x128xbf16>, vector<128x128xbf16>, vector<64x128xf32> -> vector<64x128xf32>
    %c0_48 = arith.constant 0 : index
    %c0_49 = arith.constant 0 : index
    %c0_50 = arith.constant 0 : index
    %91 = vector.load %arg12[%c0_48, %c0_49, %c0_50] : memref<4x1x128xf32, #tpu.memory_space<vmem>>, vector<1x1x128xf32>
    %92 = vector.shape_cast %91 : vector<1x1x128xf32> to vector<1x128xf32>
    %93 = vector.broadcast %92 : vector<1x128xf32> to vector<64x128xf32>
    %94 = arith.addf %90, %93 : vector<64x128xf32>
    %c0_51 = arith.constant 0 : index
    %c0_52 = arith.constant 0 : index
    %c0_53 = arith.constant 0 : index
    %95 = vector.load %arg13[%c0_51, %c0_52, %c0_53] : memref<4x1x128xf32, #tpu.memory_space<vmem>>, vector<1x1x128xf32>
    %96 = vector.shape_cast %95 : vector<1x1x128xf32> to vector<1x128xf32>
    %97 = vector.broadcast %96 : vector<1x128xf32> to vector<64x128xf32>
    %98 = arith.mulf %94, %97 : vector<64x128xf32>
    %c0_54 = arith.constant 0 : index
    %c0_55 = arith.constant 0 : index
    %c0_56 = arith.constant 0 : index
    %99 = vector.load %arg14[%c0_54, %c0_55, %c0_56] : memref<4x1x128xf32, #tpu.memory_space<vmem>>, vector<1x1x128xf32>
    %100 = vector.shape_cast %99 : vector<1x1x128xf32> to vector<1x128xf32>
    %101 = vector.broadcast %100 : vector<1x128xf32> to vector<64x128xf32>
    %102 = arith.addf %98, %101 : vector<64x128xf32>
    %cst_57 = arith.constant 0.000000e+00 : f32
    %103 = vector.broadcast %cst_57 : f32 to vector<64x128xf32>
    %104 = arith.maximumf %102, %103 : vector<64x128xf32>
    %105 = arith.addf %22, %104 : vector<64x128xf32>
    %106 = tpu.transpose %105, [1, 0] : vector<64x128xf32> -> vector<128x64xf32>
    %c0_58 = arith.constant 0 : index
    %c128 = arith.constant 128 : index
    %c0_59 = arith.constant 0 : index
    %107 = vector.load %arg15[%c0_58, %c128, %c0_59] : memref<1x640x64xf32, #tpu.memory_space<vmem>>, vector<1x128x64xf32>
    %108 = vector.shape_cast %107 : vector<1x128x64xf32> to vector<128x64xf32>
    %109 = vector.shape_cast %106 : vector<128x64xf32> to vector<1x128x64xf32>
    tpu.vector_store %arg15[%c0_58, %c128, %c0_59], %109 {strides = array<i32>} : memref<1x640x64xf32, #tpu.memory_space<vmem>>, vector<1x128x64xf32>,
    %110 = arith.truncf %105 : vector<64x128xf32> to vector<64x128xbf16>
    %c1 = arith.constant 1 : index
    %c0_60 = arith.constant 0 : index
    %c0_61 = arith.constant 0 : index
    %111 = vector.load %arg8[%c1, %c0_60, %c0_61] : memref<4x128x32xbf16, #tpu.memory_space<vmem>>, vector<1x128x32xbf16>
    %112 = vector.shape_cast %111 : vector<1x128x32xbf16> to vector<128x32xbf16>
    %cst_62 = arith.constant dense<0.000000e+00> : vector<64x32xf32>
    %113 = tpu.matmul %110, %112, %cst_62 {dimension_numbers = #tpu.dot_dimension_numbers<[1], [0], [0], [1], [0, 0, 1, 1], [], []>} : vector<64x128xbf16>, vector<128x32xbf16>, vector<64x32xf32> -> vector<64x32xf32>
    %c1_63 = arith.constant 1 : index
    %c0_64 = arith.constant 0 : index
    %c0_65 = arith.constant 0 : index
    %114 = vector.load %arg9[%c1_63, %c0_64, %c0_65] : memref<4x128x128xbf16, #tpu.memory_space<vmem>>, vector<1x128x128xbf16>
    %115 = vector.shape_cast %114 : vector<1x128x128xbf16> to vector<128x128xbf16>
    %cst_66 = arith.constant dense<0.000000e+00> : vector<64x128xf32>
    %116 = tpu.matmul %110, %115, %cst_66 {dimension_numbers = #tpu.dot_dimension_numbers<[1], [0], [0], [1], [0, 0, 1, 1], [], []>} : vector<64x128xbf16>, vector<128x128xbf16>, vector<64x128xf32> -> vector<64x128xf32>
    %c1_67 = arith.constant 1 : index
    %c0_68 = arith.constant 0 : index
    %c0_69 = arith.constant 0 : index
    %117 = vector.load %arg10[%c1_67, %c0_68, %c0_69] : memref<4x1x128xf32, #tpu.memory_space<vmem>>, vector<1x1x128xf32>
    %118 = vector.shape_cast %117 : vector<1x1x128xf32> to vector<1x128xf32>
    %119 = vector.broadcast %118 : vector<1x128xf32> to vector<64x128xf32>
    %120 = arith.addf %116, %119 : vector<64x128xf32>
    %121 = arith.truncf %113 : vector<64x32xf32> to vector<64x32xbf16>
    %cst_70 = arith.constant 0.000000e+00 : f32
    %122 = vector.broadcast %cst_70 : f32 to vector<64x128xf32>
    %cst_71 = arith.constant 0.000000e+00 : f32
    %123 = vector.broadcast %cst_71 : f32 to vector<64x1xf32>
    %124 = vector.extract_strided_slice %121 {offsets = [0, 0], sizes = [32, 32], strides = [1, 1]} : vector<64x32xbf16> to vector<32x32xbf16>
    %cst_72 = arith.constant dense<0.000000e+00> : vector<32x64xf32>
    %125 = tpu.matmul %124, %121, %cst_72 {dimension_numbers = #tpu.dot_dimension_numbers<[1], [1], [0], [0], [0, 0, 1, 0], [], []>} : vector<32x32xbf16>, vector<64x32xbf16>, vector<32x64xf32> -> vector<32x64xf32>
    %cst_73 = arith.constant dense<0xFF800000> : vector<32xf32>
    %126 = vector.multi_reduction <maximumf>, %125, %cst_73 [1] : vector<32x64xf32> to vector<32xf32>
    %127 = vector.shape_cast %126 : vector<32xf32> to vector<32x1xf32>
    %128 = vector.broadcast %127 : vector<32x1xf32> to vector<32x64xf32>
    %129 = arith.subf %125, %128 : vector<32x64xf32>
    %130 = math.exp %129 : vector<32x64xf32>
    %cst_74 = arith.constant dense<0.000000e+00> : vector<32xf32>
    %131 = vector.multi_reduction <add>, %130, %cst_74 [1] : vector<32x64xf32> to vector<32xf32>
    %132 = vector.shape_cast %131 : vector<32xf32> to vector<32x1xf32>
    %133 = tpu.reciprocal %132 {approx = true} : vector<32x1xf32> -> vector<32x1xf32>
    %134 = arith.truncf %130 : vector<32x64xf32> to vector<32x64xbf16>
    %135 = vector.extract_strided_slice %120 {offsets = [0, 0], sizes = [32, 128], strides = [1, 1]} : vector<64x128xf32> to vector<32x128xf32>
    %136 = vector.broadcast %133 : vector<32x1xf32> to vector<32x128xf32>
    %137 = arith.mulf %135, %136 : vector<32x128xf32>
    %138 = arith.truncf %137 : vector<32x128xf32> to vector<32x128xbf16>
    %139 = arith.truncf %133 : vector<32x1xf32> to vector<32x1xbf16>
    %cst_75 = arith.constant dense<0.000000e+00> : vector<64x128xf32>
    %140 = tpu.matmul %134, %138, %cst_75 {dimension_numbers = #tpu.dot_dimension_numbers<[0], [0], [1], [1], [0, 1, 1, 1], [], []>} : vector<32x64xbf16>, vector<32x128xbf16>, vector<64x128xf32> -> vector<64x128xf32>
    %141 = arith.addf %122, %140 : vector<64x128xf32>
    %cst_76 = arith.constant dense<0.000000e+00> : vector<64x1xf32>
    %142 = tpu.matmul %134, %139, %cst_76 {dimension_numbers = #tpu.dot_dimension_numbers<[0], [0], [1], [1], [0, 1, 1, 1], [], []>} : vector<32x64xbf16>, vector<32x1xbf16>, vector<64x1xf32> -> vector<64x1xf32>
    %143 = arith.addf %123, %142 : vector<64x1xf32>
    %144 = vector.extract_strided_slice %121 {offsets = [32, 0], sizes = [32, 32], strides = [1, 1]} : vector<64x32xbf16> to vector<32x32xbf16>
    %cst_77 = arith.constant dense<0.000000e+00> : vector<32x64xf32>
    %145 = tpu.matmul %144, %121, %cst_77 {dimension_numbers = #tpu.dot_dimension_numbers<[1], [1], [0], [0], [0, 0, 1, 0], [], []>} : vector<32x32xbf16>, vector<64x32xbf16>, vector<32x64xf32> -> vector<32x64xf32>
    %cst_78 = arith.constant dense<0xFF800000> : vector<32xf32>
    %146 = vector.multi_reduction <maximumf>, %145, %cst_78 [1] : vector<32x64xf32> to vector<32xf32>
    %147 = vector.shape_cast %146 : vector<32xf32> to vector<32x1xf32>
    %148 = vector.broadcast %147 : vector<32x1xf32> to vector<32x64xf32>
    %149 = arith.subf %145, %148 : vector<32x64xf32>
    %150 = math.exp %149 : vector<32x64xf32>
    %cst_79 = arith.constant dense<0.000000e+00> : vector<32xf32>
    %151 = vector.multi_reduction <add>, %150, %cst_79 [1] : vector<32x64xf32> to vector<32xf32>
    %152 = vector.shape_cast %151 : vector<32xf32> to vector<32x1xf32>
    %153 = tpu.reciprocal %152 {approx = true} : vector<32x1xf32> -> vector<32x1xf32>
    %154 = arith.truncf %150 : vector<32x64xf32> to vector<32x64xbf16>
    %155 = vector.extract_strided_slice %120 {offsets = [32, 0], sizes = [32, 128], strides = [1, 1]} : vector<64x128xf32> to vector<32x128xf32>
    %156 = vector.broadcast %153 : vector<32x1xf32> to vector<32x128xf32>
    %157 = arith.mulf %155, %156 : vector<32x128xf32>
    %158 = arith.truncf %157 : vector<32x128xf32> to vector<32x128xbf16>
    %159 = arith.truncf %153 : vector<32x1xf32> to vector<32x1xbf16>
    %cst_80 = arith.constant dense<0.000000e+00> : vector<64x128xf32>
    %160 = tpu.matmul %154, %158, %cst_80 {dimension_numbers = #tpu.dot_dimension_numbers<[0], [0], [1], [1], [0, 1, 1, 1], [], []>} : vector<32x64xbf16>, vector<32x128xbf16>, vector<64x128xf32> -> vector<64x128xf32>
    %161 = arith.addf %141, %160 : vector<64x128xf32>
    %cst_81 = arith.constant dense<0.000000e+00> : vector<64x1xf32>
    %162 = tpu.matmul %154, %159, %cst_81 {dimension_numbers = #tpu.dot_dimension_numbers<[0], [0], [1], [1], [0, 1, 1, 1], [], []>} : vector<32x64xbf16>, vector<32x1xbf16>, vector<64x1xf32> -> vector<64x1xf32>
    %163 = arith.addf %143, %162 : vector<64x1xf32>
    %cst_82 = arith.constant 9.99999971E-10 : f32
    %164 = vector.broadcast %cst_82 : f32 to vector<64x1xf32>
    %165 = arith.addf %164, %163 : vector<64x1xf32>
    %166 = tpu.reciprocal %165 {approx = true} : vector<64x1xf32> -> vector<64x1xf32>
    %167 = vector.broadcast %166 : vector<64x1xf32> to vector<64x128xf32>
    %168 = arith.mulf %161, %167 : vector<64x128xf32>
    %169 = arith.subf %105, %168 : vector<64x128xf32>
    %170 = arith.truncf %169 : vector<64x128xf32> to vector<64x128xbf16>
    %c1_83 = arith.constant 1 : index
    %c0_84 = arith.constant 0 : index
    %c0_85 = arith.constant 0 : index
    %171 = vector.load %arg11[%c1_83, %c0_84, %c0_85] : memref<4x128x128xbf16, #tpu.memory_space<vmem>>, vector<1x128x128xbf16>
    %172 = vector.shape_cast %171 : vector<1x128x128xbf16> to vector<128x128xbf16>
    %cst_86 = arith.constant dense<0.000000e+00> : vector<64x128xf32>
    %173 = tpu.matmul %170, %172, %cst_86 {dimension_numbers = #tpu.dot_dimension_numbers<[1], [0], [0], [1], [0, 0, 1, 1], [], []>} : vector<64x128xbf16>, vector<128x128xbf16>, vector<64x128xf32> -> vector<64x128xf32>
    %c1_87 = arith.constant 1 : index
    %c0_88 = arith.constant 0 : index
    %c0_89 = arith.constant 0 : index
    %174 = vector.load %arg12[%c1_87, %c0_88, %c0_89] : memref<4x1x128xf32, #tpu.memory_space<vmem>>, vector<1x1x128xf32>
    %175 = vector.shape_cast %174 : vector<1x1x128xf32> to vector<1x128xf32>
    %176 = vector.broadcast %175 : vector<1x128xf32> to vector<64x128xf32>
    %177 = arith.addf %173, %176 : vector<64x128xf32>
    %c1_90 = arith.constant 1 : index
    %c0_91 = arith.constant 0 : index
    %c0_92 = arith.constant 0 : index
    %178 = vector.load %arg13[%c1_90, %c0_91, %c0_92] : memref<4x1x128xf32, #tpu.memory_space<vmem>>, vector<1x1x128xf32>
    %179 = vector.shape_cast %178 : vector<1x1x128xf32> to vector<1x128xf32>
    %180 = vector.broadcast %179 : vector<1x128xf32> to vector<64x128xf32>
    %181 = arith.mulf %177, %180 : vector<64x128xf32>
    %c1_93 = arith.constant 1 : index
    %c0_94 = arith.constant 0 : index
    %c0_95 = arith.constant 0 : index
    %182 = vector.load %arg14[%c1_93, %c0_94, %c0_95] : memref<4x1x128xf32, #tpu.memory_space<vmem>>, vector<1x1x128xf32>
    %183 = vector.shape_cast %182 : vector<1x1x128xf32> to vector<1x128xf32>
    %184 = vector.broadcast %183 : vector<1x128xf32> to vector<64x128xf32>
    %185 = arith.addf %181, %184 : vector<64x128xf32>
    %cst_96 = arith.constant 0.000000e+00 : f32
    %186 = vector.broadcast %cst_96 : f32 to vector<64x128xf32>
    %187 = arith.maximumf %185, %186 : vector<64x128xf32>
    %188 = arith.addf %105, %187 : vector<64x128xf32>
    %189 = tpu.transpose %188, [1, 0] : vector<64x128xf32> -> vector<128x64xf32>
    %c0_97 = arith.constant 0 : index
    %c256 = arith.constant 256 : index
    %c0_98 = arith.constant 0 : index
    %190 = vector.load %arg15[%c0_97, %c256, %c0_98] : memref<1x640x64xf32, #tpu.memory_space<vmem>>, vector<1x128x64xf32>
    %191 = vector.shape_cast %190 : vector<1x128x64xf32> to vector<128x64xf32>
    %192 = vector.shape_cast %189 : vector<128x64xf32> to vector<1x128x64xf32>
    tpu.vector_store %arg15[%c0_97, %c256, %c0_98], %192 {strides = array<i32>} : memref<1x640x64xf32, #tpu.memory_space<vmem>>, vector<1x128x64xf32>,
    %193 = arith.truncf %188 : vector<64x128xf32> to vector<64x128xbf16>
    %c2 = arith.constant 2 : index
    %c0_99 = arith.constant 0 : index
    %c0_100 = arith.constant 0 : index
    %194 = vector.load %arg8[%c2, %c0_99, %c0_100] : memref<4x128x32xbf16, #tpu.memory_space<vmem>>, vector<1x128x32xbf16>
    %195 = vector.shape_cast %194 : vector<1x128x32xbf16> to vector<128x32xbf16>
    %cst_101 = arith.constant dense<0.000000e+00> : vector<64x32xf32>
    %196 = tpu.matmul %193, %195, %cst_101 {dimension_numbers = #tpu.dot_dimension_numbers<[1], [0], [0], [1], [0, 0, 1, 1], [], []>} : vector<64x128xbf16>, vector<128x32xbf16>, vector<64x32xf32> -> vector<64x32xf32>
    %c2_102 = arith.constant 2 : index
    %c0_103 = arith.constant 0 : index
    %c0_104 = arith.constant 0 : index
    %197 = vector.load %arg9[%c2_102, %c0_103, %c0_104] : memref<4x128x128xbf16, #tpu.memory_space<vmem>>, vector<1x128x128xbf16>
    %198 = vector.shape_cast %197 : vector<1x128x128xbf16> to vector<128x128xbf16>
    %cst_105 = arith.constant dense<0.000000e+00> : vector<64x128xf32>
    %199 = tpu.matmul %193, %198, %cst_105 {dimension_numbers = #tpu.dot_dimension_numbers<[1], [0], [0], [1], [0, 0, 1, 1], [], []>} : vector<64x128xbf16>, vector<128x128xbf16>, vector<64x128xf32> -> vector<64x128xf32>
    %c2_106 = arith.constant 2 : index
    %c0_107 = arith.constant 0 : index
    %c0_108 = arith.constant 0 : index
    %200 = vector.load %arg10[%c2_106, %c0_107, %c0_108] : memref<4x1x128xf32, #tpu.memory_space<vmem>>, vector<1x1x128xf32>
    %201 = vector.shape_cast %200 : vector<1x1x128xf32> to vector<1x128xf32>
    %202 = vector.broadcast %201 : vector<1x128xf32> to vector<64x128xf32>
    %203 = arith.addf %199, %202 : vector<64x128xf32>
    %204 = arith.truncf %196 : vector<64x32xf32> to vector<64x32xbf16>
    %cst_109 = arith.constant 0.000000e+00 : f32
    %205 = vector.broadcast %cst_109 : f32 to vector<64x128xf32>
    %cst_110 = arith.constant 0.000000e+00 : f32
    %206 = vector.broadcast %cst_110 : f32 to vector<64x1xf32>
    %207 = vector.extract_strided_slice %204 {offsets = [0, 0], sizes = [32, 32], strides = [1, 1]} : vector<64x32xbf16> to vector<32x32xbf16>
    %cst_111 = arith.constant dense<0.000000e+00> : vector<32x64xf32>
    %208 = tpu.matmul %207, %204, %cst_111 {dimension_numbers = #tpu.dot_dimension_numbers<[1], [1], [0], [0], [0, 0, 1, 0], [], []>} : vector<32x32xbf16>, vector<64x32xbf16>, vector<32x64xf32> -> vector<32x64xf32>
    %cst_112 = arith.constant dense<0xFF800000> : vector<32xf32>
    %209 = vector.multi_reduction <maximumf>, %208, %cst_112 [1] : vector<32x64xf32> to vector<32xf32>
    %210 = vector.shape_cast %209 : vector<32xf32> to vector<32x1xf32>
    %211 = vector.broadcast %210 : vector<32x1xf32> to vector<32x64xf32>
    %212 = arith.subf %208, %211 : vector<32x64xf32>
    %213 = math.exp %212 : vector<32x64xf32>
    %cst_113 = arith.constant dense<0.000000e+00> : vector<32xf32>
    %214 = vector.multi_reduction <add>, %213, %cst_113 [1] : vector<32x64xf32> to vector<32xf32>
    %215 = vector.shape_cast %214 : vector<32xf32> to vector<32x1xf32>
    %216 = tpu.reciprocal %215 {approx = true} : vector<32x1xf32> -> vector<32x1xf32>
    %217 = arith.truncf %213 : vector<32x64xf32> to vector<32x64xbf16>
    %218 = vector.extract_strided_slice %203 {offsets = [0, 0], sizes = [32, 128], strides = [1, 1]} : vector<64x128xf32> to vector<32x128xf32>
    %219 = vector.broadcast %216 : vector<32x1xf32> to vector<32x128xf32>
    %220 = arith.mulf %218, %219 : vector<32x128xf32>
    %221 = arith.truncf %220 : vector<32x128xf32> to vector<32x128xbf16>
    %222 = arith.truncf %216 : vector<32x1xf32> to vector<32x1xbf16>
    %cst_114 = arith.constant dense<0.000000e+00> : vector<64x128xf32>
    %223 = tpu.matmul %217, %221, %cst_114 {dimension_numbers = #tpu.dot_dimension_numbers<[0], [0], [1], [1], [0, 1, 1, 1], [], []>} : vector<32x64xbf16>, vector<32x128xbf16>, vector<64x128xf32> -> vector<64x128xf32>
    %224 = arith.addf %205, %223 : vector<64x128xf32>
    %cst_115 = arith.constant dense<0.000000e+00> : vector<64x1xf32>
    %225 = tpu.matmul %217, %222, %cst_115 {dimension_numbers = #tpu.dot_dimension_numbers<[0], [0], [1], [1], [0, 1, 1, 1], [], []>} : vector<32x64xbf16>, vector<32x1xbf16>, vector<64x1xf32> -> vector<64x1xf32>
    %226 = arith.addf %206, %225 : vector<64x1xf32>
    %227 = vector.extract_strided_slice %204 {offsets = [32, 0], sizes = [32, 32], strides = [1, 1]} : vector<64x32xbf16> to vector<32x32xbf16>
    %cst_116 = arith.constant dense<0.000000e+00> : vector<32x64xf32>
    %228 = tpu.matmul %227, %204, %cst_116 {dimension_numbers = #tpu.dot_dimension_numbers<[1], [1], [0], [0], [0, 0, 1, 0], [], []>} : vector<32x32xbf16>, vector<64x32xbf16>, vector<32x64xf32> -> vector<32x64xf32>
    %cst_117 = arith.constant dense<0xFF800000> : vector<32xf32>
    %229 = vector.multi_reduction <maximumf>, %228, %cst_117 [1] : vector<32x64xf32> to vector<32xf32>
    %230 = vector.shape_cast %229 : vector<32xf32> to vector<32x1xf32>
    %231 = vector.broadcast %230 : vector<32x1xf32> to vector<32x64xf32>
    %232 = arith.subf %228, %231 : vector<32x64xf32>
    %233 = math.exp %232 : vector<32x64xf32>
    %cst_118 = arith.constant dense<0.000000e+00> : vector<32xf32>
    %234 = vector.multi_reduction <add>, %233, %cst_118 [1] : vector<32x64xf32> to vector<32xf32>
    %235 = vector.shape_cast %234 : vector<32xf32> to vector<32x1xf32>
    %236 = tpu.reciprocal %235 {approx = true} : vector<32x1xf32> -> vector<32x1xf32>
    %237 = arith.truncf %233 : vector<32x64xf32> to vector<32x64xbf16>
    %238 = vector.extract_strided_slice %203 {offsets = [32, 0], sizes = [32, 128], strides = [1, 1]} : vector<64x128xf32> to vector<32x128xf32>
    %239 = vector.broadcast %236 : vector<32x1xf32> to vector<32x128xf32>
    %240 = arith.mulf %238, %239 : vector<32x128xf32>
    %241 = arith.truncf %240 : vector<32x128xf32> to vector<32x128xbf16>
    %242 = arith.truncf %236 : vector<32x1xf32> to vector<32x1xbf16>
    %cst_119 = arith.constant dense<0.000000e+00> : vector<64x128xf32>
    %243 = tpu.matmul %237, %241, %cst_119 {dimension_numbers = #tpu.dot_dimension_numbers<[0], [0], [1], [1], [0, 1, 1, 1], [], []>} : vector<32x64xbf16>, vector<32x128xbf16>, vector<64x128xf32> -> vector<64x128xf32>
    %244 = arith.addf %224, %243 : vector<64x128xf32>
    %cst_120 = arith.constant dense<0.000000e+00> : vector<64x1xf32>
    %245 = tpu.matmul %237, %242, %cst_120 {dimension_numbers = #tpu.dot_dimension_numbers<[0], [0], [1], [1], [0, 1, 1, 1], [], []>} : vector<32x64xbf16>, vector<32x1xbf16>, vector<64x1xf32> -> vector<64x1xf32>
    %246 = arith.addf %226, %245 : vector<64x1xf32>
    %cst_121 = arith.constant 9.99999971E-10 : f32
    %247 = vector.broadcast %cst_121 : f32 to vector<64x1xf32>
    %248 = arith.addf %247, %246 : vector<64x1xf32>
    %249 = tpu.reciprocal %248 {approx = true} : vector<64x1xf32> -> vector<64x1xf32>
    %250 = vector.broadcast %249 : vector<64x1xf32> to vector<64x128xf32>
    %251 = arith.mulf %244, %250 : vector<64x128xf32>
    %252 = arith.subf %188, %251 : vector<64x128xf32>
    %253 = arith.truncf %252 : vector<64x128xf32> to vector<64x128xbf16>
    %c2_122 = arith.constant 2 : index
    %c0_123 = arith.constant 0 : index
    %c0_124 = arith.constant 0 : index
    %254 = vector.load %arg11[%c2_122, %c0_123, %c0_124] : memref<4x128x128xbf16, #tpu.memory_space<vmem>>, vector<1x128x128xbf16>
    %255 = vector.shape_cast %254 : vector<1x128x128xbf16> to vector<128x128xbf16>
    %cst_125 = arith.constant dense<0.000000e+00> : vector<64x128xf32>
    %256 = tpu.matmul %253, %255, %cst_125 {dimension_numbers = #tpu.dot_dimension_numbers<[1], [0], [0], [1], [0, 0, 1, 1], [], []>} : vector<64x128xbf16>, vector<128x128xbf16>, vector<64x128xf32> -> vector<64x128xf32>
    %c2_126 = arith.constant 2 : index
    %c0_127 = arith.constant 0 : index
    %c0_128 = arith.constant 0 : index
    %257 = vector.load %arg12[%c2_126, %c0_127, %c0_128] : memref<4x1x128xf32, #tpu.memory_space<vmem>>, vector<1x1x128xf32>
    %258 = vector.shape_cast %257 : vector<1x1x128xf32> to vector<1x128xf32>
    %259 = vector.broadcast %258 : vector<1x128xf32> to vector<64x128xf32>
    %260 = arith.addf %256, %259 : vector<64x128xf32>
    %c2_129 = arith.constant 2 : index
    %c0_130 = arith.constant 0 : index
    %c0_131 = arith.constant 0 : index
    %261 = vector.load %arg13[%c2_129, %c0_130, %c0_131] : memref<4x1x128xf32, #tpu.memory_space<vmem>>, vector<1x1x128xf32>
    %262 = vector.shape_cast %261 : vector<1x1x128xf32> to vector<1x128xf32>
    %263 = vector.broadcast %262 : vector<1x128xf32> to vector<64x128xf32>
    %264 = arith.mulf %260, %263 : vector<64x128xf32>
    %c2_132 = arith.constant 2 : index
    %c0_133 = arith.constant 0 : index
    %c0_134 = arith.constant 0 : index
    %265 = vector.load %arg14[%c2_132, %c0_133, %c0_134] : memref<4x1x128xf32, #tpu.memory_space<vmem>>, vector<1x1x128xf32>
    %266 = vector.shape_cast %265 : vector<1x1x128xf32> to vector<1x128xf32>
    %267 = vector.broadcast %266 : vector<1x128xf32> to vector<64x128xf32>
    %268 = arith.addf %264, %267 : vector<64x128xf32>
    %cst_135 = arith.constant 0.000000e+00 : f32
    %269 = vector.broadcast %cst_135 : f32 to vector<64x128xf32>
    %270 = arith.maximumf %268, %269 : vector<64x128xf32>
    %271 = arith.addf %188, %270 : vector<64x128xf32>
    %272 = tpu.transpose %271, [1, 0] : vector<64x128xf32> -> vector<128x64xf32>
    %c0_136 = arith.constant 0 : index
    %c384 = arith.constant 384 : index
    %c0_137 = arith.constant 0 : index
    %273 = vector.load %arg15[%c0_136, %c384, %c0_137] : memref<1x640x64xf32, #tpu.memory_space<vmem>>, vector<1x128x64xf32>
    %274 = vector.shape_cast %273 : vector<1x128x64xf32> to vector<128x64xf32>
    %275 = vector.shape_cast %272 : vector<128x64xf32> to vector<1x128x64xf32>
    tpu.vector_store %arg15[%c0_136, %c384, %c0_137], %275 {strides = array<i32>} : memref<1x640x64xf32, #tpu.memory_space<vmem>>, vector<1x128x64xf32>,
    %276 = arith.truncf %271 : vector<64x128xf32> to vector<64x128xbf16>
    %c3 = arith.constant 3 : index
    %c0_138 = arith.constant 0 : index
    %c0_139 = arith.constant 0 : index
    %277 = vector.load %arg8[%c3, %c0_138, %c0_139] : memref<4x128x32xbf16, #tpu.memory_space<vmem>>, vector<1x128x32xbf16>
    %278 = vector.shape_cast %277 : vector<1x128x32xbf16> to vector<128x32xbf16>
    %cst_140 = arith.constant dense<0.000000e+00> : vector<64x32xf32>
    %279 = tpu.matmul %276, %278, %cst_140 {dimension_numbers = #tpu.dot_dimension_numbers<[1], [0], [0], [1], [0, 0, 1, 1], [], []>} : vector<64x128xbf16>, vector<128x32xbf16>, vector<64x32xf32> -> vector<64x32xf32>
    %c3_141 = arith.constant 3 : index
    %c0_142 = arith.constant 0 : index
    %c0_143 = arith.constant 0 : index
    %280 = vector.load %arg9[%c3_141, %c0_142, %c0_143] : memref<4x128x128xbf16, #tpu.memory_space<vmem>>, vector<1x128x128xbf16>
    %281 = vector.shape_cast %280 : vector<1x128x128xbf16> to vector<128x128xbf16>
    %cst_144 = arith.constant dense<0.000000e+00> : vector<64x128xf32>
    %282 = tpu.matmul %276, %281, %cst_144 {dimension_numbers = #tpu.dot_dimension_numbers<[1], [0], [0], [1], [0, 0, 1, 1], [], []>} : vector<64x128xbf16>, vector<128x128xbf16>, vector<64x128xf32> -> vector<64x128xf32>
    %c3_145 = arith.constant 3 : index
    %c0_146 = arith.constant 0 : index
    %c0_147 = arith.constant 0 : index
    %283 = vector.load %arg10[%c3_145, %c0_146, %c0_147] : memref<4x1x128xf32, #tpu.memory_space<vmem>>, vector<1x1x128xf32>
    %284 = vector.shape_cast %283 : vector<1x1x128xf32> to vector<1x128xf32>
    %285 = vector.broadcast %284 : vector<1x128xf32> to vector<64x128xf32>
    %286 = arith.addf %282, %285 : vector<64x128xf32>
    %287 = arith.truncf %279 : vector<64x32xf32> to vector<64x32xbf16>
    %cst_148 = arith.constant 0.000000e+00 : f32
    %288 = vector.broadcast %cst_148 : f32 to vector<64x128xf32>
    %cst_149 = arith.constant 0.000000e+00 : f32
    %289 = vector.broadcast %cst_149 : f32 to vector<64x1xf32>
    %290 = vector.extract_strided_slice %287 {offsets = [0, 0], sizes = [32, 32], strides = [1, 1]} : vector<64x32xbf16> to vector<32x32xbf16>
    %cst_150 = arith.constant dense<0.000000e+00> : vector<32x64xf32>
    %291 = tpu.matmul %290, %287, %cst_150 {dimension_numbers = #tpu.dot_dimension_numbers<[1], [1], [0], [0], [0, 0, 1, 0], [], []>} : vector<32x32xbf16>, vector<64x32xbf16>, vector<32x64xf32> -> vector<32x64xf32>
    %cst_151 = arith.constant dense<0xFF800000> : vector<32xf32>
    %292 = vector.multi_reduction <maximumf>, %291, %cst_151 [1] : vector<32x64xf32> to vector<32xf32>
    %293 = vector.shape_cast %292 : vector<32xf32> to vector<32x1xf32>
    %294 = vector.broadcast %293 : vector<32x1xf32> to vector<32x64xf32>
    %295 = arith.subf %291, %294 : vector<32x64xf32>
    %296 = math.exp %295 : vector<32x64xf32>
    %cst_152 = arith.constant dense<0.000000e+00> : vector<32xf32>
    %297 = vector.multi_reduction <add>, %296, %cst_152 [1] : vector<32x64xf32> to vector<32xf32>
    %298 = vector.shape_cast %297 : vector<32xf32> to vector<32x1xf32>
    %299 = tpu.reciprocal %298 {approx = true} : vector<32x1xf32> -> vector<32x1xf32>
    %300 = arith.truncf %296 : vector<32x64xf32> to vector<32x64xbf16>
    %301 = vector.extract_strided_slice %286 {offsets = [0, 0], sizes = [32, 128], strides = [1, 1]} : vector<64x128xf32> to vector<32x128xf32>
    %302 = vector.broadcast %299 : vector<32x1xf32> to vector<32x128xf32>
    %303 = arith.mulf %301, %302 : vector<32x128xf32>
    %304 = arith.truncf %303 : vector<32x128xf32> to vector<32x128xbf16>
    %305 = arith.truncf %299 : vector<32x1xf32> to vector<32x1xbf16>
    %cst_153 = arith.constant dense<0.000000e+00> : vector<64x128xf32>
    %306 = tpu.matmul %300, %304, %cst_153 {dimension_numbers = #tpu.dot_dimension_numbers<[0], [0], [1], [1], [0, 1, 1, 1], [], []>} : vector<32x64xbf16>, vector<32x128xbf16>, vector<64x128xf32> -> vector<64x128xf32>
    %307 = arith.addf %288, %306 : vector<64x128xf32>
    %cst_154 = arith.constant dense<0.000000e+00> : vector<64x1xf32>
    %308 = tpu.matmul %300, %305, %cst_154 {dimension_numbers = #tpu.dot_dimension_numbers<[0], [0], [1], [1], [0, 1, 1, 1], [], []>} : vector<32x64xbf16>, vector<32x1xbf16>, vector<64x1xf32> -> vector<64x1xf32>
    %309 = arith.addf %289, %308 : vector<64x1xf32>
    %310 = vector.extract_strided_slice %287 {offsets = [32, 0], sizes = [32, 32], strides = [1, 1]} : vector<64x32xbf16> to vector<32x32xbf16>
    %cst_155 = arith.constant dense<0.000000e+00> : vector<32x64xf32>
    %311 = tpu.matmul %310, %287, %cst_155 {dimension_numbers = #tpu.dot_dimension_numbers<[1], [1], [0], [0], [0, 0, 1, 0], [], []>} : vector<32x32xbf16>, vector<64x32xbf16>, vector<32x64xf32> -> vector<32x64xf32>
    %cst_156 = arith.constant dense<0xFF800000> : vector<32xf32>
    %312 = vector.multi_reduction <maximumf>, %311, %cst_156 [1] : vector<32x64xf32> to vector<32xf32>
    %313 = vector.shape_cast %312 : vector<32xf32> to vector<32x1xf32>
    %314 = vector.broadcast %313 : vector<32x1xf32> to vector<32x64xf32>
    %315 = arith.subf %311, %314 : vector<32x64xf32>
    %316 = math.exp %315 : vector<32x64xf32>
    %cst_157 = arith.constant dense<0.000000e+00> : vector<32xf32>
    %317 = vector.multi_reduction <add>, %316, %cst_157 [1] : vector<32x64xf32> to vector<32xf32>
    %318 = vector.shape_cast %317 : vector<32xf32> to vector<32x1xf32>
    %319 = tpu.reciprocal %318 {approx = true} : vector<32x1xf32> -> vector<32x1xf32>
    %320 = arith.truncf %316 : vector<32x64xf32> to vector<32x64xbf16>
    %321 = vector.extract_strided_slice %286 {offsets = [32, 0], sizes = [32, 128], strides = [1, 1]} : vector<64x128xf32> to vector<32x128xf32>
    %322 = vector.broadcast %319 : vector<32x1xf32> to vector<32x128xf32>
    %323 = arith.mulf %321, %322 : vector<32x128xf32>
    %324 = arith.truncf %323 : vector<32x128xf32> to vector<32x128xbf16>
    %325 = arith.truncf %319 : vector<32x1xf32> to vector<32x1xbf16>
    %cst_158 = arith.constant dense<0.000000e+00> : vector<64x128xf32>
    %326 = tpu.matmul %320, %324, %cst_158 {dimension_numbers = #tpu.dot_dimension_numbers<[0], [0], [1], [1], [0, 1, 1, 1], [], []>} : vector<32x64xbf16>, vector<32x128xbf16>, vector<64x128xf32> -> vector<64x128xf32>
    %327 = arith.addf %307, %326 : vector<64x128xf32>
    %cst_159 = arith.constant dense<0.000000e+00> : vector<64x1xf32>
    %328 = tpu.matmul %320, %325, %cst_159 {dimension_numbers = #tpu.dot_dimension_numbers<[0], [0], [1], [1], [0, 1, 1, 1], [], []>} : vector<32x64xbf16>, vector<32x1xbf16>, vector<64x1xf32> -> vector<64x1xf32>
    %329 = arith.addf %309, %328 : vector<64x1xf32>
    %cst_160 = arith.constant 9.99999971E-10 : f32
    %330 = vector.broadcast %cst_160 : f32 to vector<64x1xf32>
    %331 = arith.addf %330, %329 : vector<64x1xf32>
    %332 = tpu.reciprocal %331 {approx = true} : vector<64x1xf32> -> vector<64x1xf32>
    %333 = vector.broadcast %332 : vector<64x1xf32> to vector<64x128xf32>
    %334 = arith.mulf %327, %333 : vector<64x128xf32>
    %335 = arith.subf %271, %334 : vector<64x128xf32>
    %336 = arith.truncf %335 : vector<64x128xf32> to vector<64x128xbf16>
    %c3_161 = arith.constant 3 : index
    %c0_162 = arith.constant 0 : index
    %c0_163 = arith.constant 0 : index
    %337 = vector.load %arg11[%c3_161, %c0_162, %c0_163] : memref<4x128x128xbf16, #tpu.memory_space<vmem>>, vector<1x128x128xbf16>
    %338 = vector.shape_cast %337 : vector<1x128x128xbf16> to vector<128x128xbf16>
    %cst_164 = arith.constant dense<0.000000e+00> : vector<64x128xf32>
    %339 = tpu.matmul %336, %338, %cst_164 {dimension_numbers = #tpu.dot_dimension_numbers<[1], [0], [0], [1], [0, 0, 1, 1], [], []>} : vector<64x128xbf16>, vector<128x128xbf16>, vector<64x128xf32> -> vector<64x128xf32>
    %c3_165 = arith.constant 3 : index
    %c0_166 = arith.constant 0 : index
    %c0_167 = arith.constant 0 : index
    %340 = vector.load %arg12[%c3_165, %c0_166, %c0_167] : memref<4x1x128xf32, #tpu.memory_space<vmem>>, vector<1x1x128xf32>
    %341 = vector.shape_cast %340 : vector<1x1x128xf32> to vector<1x128xf32>
    %342 = vector.broadcast %341 : vector<1x128xf32> to vector<64x128xf32>
    %343 = arith.addf %339, %342 : vector<64x128xf32>
    %c3_168 = arith.constant 3 : index
    %c0_169 = arith.constant 0 : index
    %c0_170 = arith.constant 0 : index
    %344 = vector.load %arg13[%c3_168, %c0_169, %c0_170] : memref<4x1x128xf32, #tpu.memory_space<vmem>>, vector<1x1x128xf32>
    %345 = vector.shape_cast %344 : vector<1x1x128xf32> to vector<1x128xf32>
    %346 = vector.broadcast %345 : vector<1x128xf32> to vector<64x128xf32>
    %347 = arith.mulf %343, %346 : vector<64x128xf32>
    %c3_171 = arith.constant 3 : index
    %c0_172 = arith.constant 0 : index
    %c0_173 = arith.constant 0 : index
    %348 = vector.load %arg14[%c3_171, %c0_172, %c0_173] : memref<4x1x128xf32, #tpu.memory_space<vmem>>, vector<1x1x128xf32>
    %349 = vector.shape_cast %348 : vector<1x1x128xf32> to vector<1x128xf32>
    %350 = vector.broadcast %349 : vector<1x128xf32> to vector<64x128xf32>
    %351 = arith.addf %347, %350 : vector<64x128xf32>
    %cst_174 = arith.constant 0.000000e+00 : f32
    %352 = vector.broadcast %cst_174 : f32 to vector<64x128xf32>
    %353 = arith.maximumf %351, %352 : vector<64x128xf32>
    %354 = arith.addf %271, %353 : vector<64x128xf32>
    %355 = tpu.transpose %354, [1, 0] : vector<64x128xf32> -> vector<128x64xf32>
    %c0_175 = arith.constant 0 : index
    %c512 = arith.constant 512 : index
    %c0_176 = arith.constant 0 : index
    %356 = vector.load %arg15[%c0_175, %c512, %c0_176] : memref<1x640x64xf32, #tpu.memory_space<vmem>>, vector<1x128x64xf32>
    %357 = vector.shape_cast %356 : vector<1x128x64xf32> to vector<128x64xf32>
    %358 = vector.shape_cast %355 : vector<128x64xf32> to vector<1x128x64xf32>
    tpu.vector_store %arg15[%c0_175, %c512, %c0_176], %358 {strides = array<i32>} : memref<1x640x64xf32, #tpu.memory_space<vmem>>, vector<1x128x64xf32>,
    return
  }
  func.func @transform_0(%arg0: i32) -> (i32, i32, i32) {
    %c0_i32 = arith.constant 0 : i32
    %c0_i32_0 = arith.constant 0 : i32
    %c0_i32_1 = arith.constant 0 : i32
    return %arg0, %c0_i32, %c0_i32_0 : i32, i32, i32
  }
  func.func @transform_1(%arg0: i32) -> (i32, i32) {
    %c0_i32 = arith.constant 0 : i32
    %c0_i32_0 = arith.constant 0 : i32
    %c0_i32_1 = arith.constant 0 : i32
    return %c0_i32, %c0_i32_0 : i32, i32
  }
  func.func @transform_2(%arg0: i32) -> (i32, i32) {
    %c0_i32 = arith.constant 0 : i32
    %c0_i32_0 = arith.constant 0 : i32
    %c0_i32_1 = arith.constant 0 : i32
    return %c0_i32, %c0_i32_0 : i32, i32
  }
  func.func @transform_3(%arg0: i32) -> (i32, i32) {
    %c0_i32 = arith.constant 0 : i32
    %c0_i32_0 = arith.constant 0 : i32
    %c0_i32_1 = arith.constant 0 : i32
    return %c0_i32, %c0_i32_0 : i32, i32
  }
  func.func @transform_4(%arg0: i32) -> (i32, i32) {
    %c0_i32 = arith.constant 0 : i32
    %c0_i32_0 = arith.constant 0 : i32
    %c0_i32_1 = arith.constant 0 : i32
    return %c0_i32, %c0_i32_0 : i32, i32
  }
  func.func @transform_5(%arg0: i32) -> (i32, i32) {
    %c0_i32 = arith.constant 0 : i32
    %c0_i32_0 = arith.constant 0 : i32
    %c0_i32_1 = arith.constant 0 : i32
    return %c0_i32, %c0_i32_0 : i32, i32
  }
  func.func @transform_6(%arg0: i32) -> (i32, i32) {
    %c0_i32 = arith.constant 0 : i32
    %c0_i32_0 = arith.constant 0 : i32
    %c0_i32_1 = arith.constant 0 : i32
    return %c0_i32, %c0_i32_0 : i32, i32
  }
  func.func @transform_7(%arg0: i32) -> (i32, i32, i32) {
    %c0_i32 = arith.constant 0 : i32
    %c0_i32_0 = arith.constant 0 : i32
    %c0_i32_1 = arith.constant 0 : i32
    %c0_i32_2 = arith.constant 0 : i32
    return %c0_i32, %c0_i32_0, %c0_i32_1 : i32, i32, i32
  }
  func.func @transform_8(%arg0: i32) -> (i32, i32, i32) {
    %c0_i32 = arith.constant 0 : i32
    %c0_i32_0 = arith.constant 0 : i32
    %c0_i32_1 = arith.constant 0 : i32
    %c0_i32_2 = arith.constant 0 : i32
    return %c0_i32, %c0_i32_0, %c0_i32_1 : i32, i32, i32
  }
  func.func @transform_9(%arg0: i32) -> (i32, i32, i32) {
    %c0_i32 = arith.constant 0 : i32
    %c0_i32_0 = arith.constant 0 : i32
    %c0_i32_1 = arith.constant 0 : i32
    %c0_i32_2 = arith.constant 0 : i32
    return %c0_i32, %c0_i32_0, %c0_i32_1 : i32, i32, i32
  }
  func.func @transform_10(%arg0: i32) -> (i32, i32, i32) {
    %c0_i32 = arith.constant 0 : i32
    %c0_i32_0 = arith.constant 0 : i32
    %c0_i32_1 = arith.constant 0 : i32
    %c0_i32_2 = arith.constant 0 : i32
    return %c0_i32, %c0_i32_0, %c0_i32_1 : i32, i32, i32
  }
  func.func @transform_11(%arg0: i32) -> (i32, i32, i32) {
    %c0_i32 = arith.constant 0 : i32
    %c0_i32_0 = arith.constant 0 : i32
    %c0_i32_1 = arith.constant 0 : i32
    %c0_i32_2 = arith.constant 0 : i32
    return %c0_i32, %c0_i32_0, %c0_i32_1 : i32, i32, i32
  }
  func.func @transform_12(%arg0: i32) -> (i32, i32, i32) {
    %c0_i32 = arith.constant 0 : i32
    %c0_i32_0 = arith.constant 0 : i32
    %c0_i32_1 = arith.constant 0 : i32
    %c0_i32_2 = arith.constant 0 : i32
    return %c0_i32, %c0_i32_0, %c0_i32_1 : i32, i32, i32
  }
  func.func @transform_13(%arg0: i32) -> (i32, i32, i32) {
    %c0_i32 = arith.constant 0 : i32
    %c0_i32_0 = arith.constant 0 : i32
    %c0_i32_1 = arith.constant 0 : i32
    %c0_i32_2 = arith.constant 0 : i32
    return %c0_i32, %c0_i32_0, %c0_i32_1 : i32, i32, i32
  }
  func.func @transform_14(%arg0: i32) -> (i32, i32, i32) {
    %c0_i32 = arith.constant 0 : i32
    %c0_i32_0 = arith.constant 0 : i32
    %c0_i32_1 = arith.constant 0 : i32
    return %arg0, %c0_i32, %c0_i32_0 : i32, i32, i32
  }
}

</mosaic_0001>

<bundles_post_ra>
// kernel: tpu_custom_call.1
= control target key start
LH: loop header
LB: loop body
LE: loop exit
PB: predicated region body
PF: predicated region fallthrough
CT: control target
= control target key end

     0   :  { %s9325_s0 = inlined_call_operand.hbm [shape: f32[2,64,9], index: 0, kind: input, shape index: {}]   ;;  %s9326_s1 = inlined_call_operand.hbm [shape: f32[9,128], index: 1, kind: input, shape index: {}]   ;;  %s9327_s2 = inlined_call_operand.hbm [shape: f32[1,128], index: 2, kind: input, shape index: {}]   ;;  %s9328_s3 = inlined_call_operand.hbm [shape: f32[1,128], index: 3, kind: input, shape index: {}]   ;;  %s9329_s4 = inlined_call_operand.hbm [shape: bf16[128,128], index: 4, kind: input, shape index: {}]   ;;  %s9330_s5 = inlined_call_operand.hbm [shape: f32[1,128], index: 5, kind: input, shape index: {}]   ;;  %s9331_s6 = inlined_call_operand.hbm [shape: f32[1,128], index: 6, kind: input, shape index: {}]   ;;  %s9332_s7 = inlined_call_operand.hbm [shape: bf16[4,128,32], index: 7, kind: input, shape index: {}]   ;;  %s9333_s8 = inlined_call_operand.hbm [shape: bf16[4,128,128], index: 8, kind: input, shape index: {}]   ;;  %s9334_s9 = inlined_call_operand.hbm [shape: f32[4,1,128], index: 9, kind: input, shape index: {}]   ;;  %s9335_s10 = inlined_call_operand.hbm [shape: bf16[4,128,128], index: 10, kind: input, shape index: {}]   ;;  %s9336_s11 = inlined_call_operand.hbm [shape: f32[4,1,128], index: 11, kind: input, shape index: {}]   ;;  %s9337_s12 = inlined_call_operand.hbm [shape: f32[4,1,128], index: 12, kind: input, shape index: {}]   ;;  %s9338_s13 = inlined_call_operand.hbm [shape: f32[4,1,128], index: 13, kind: input, shape index: {}]   ;;  %s9339_s14 = inlined_call_operand.hbm [shape: f32[2,640,64], index: 14, kind: output, shape index: {}]  }
   0x1   :  { %9362 = sst [smem:[#allocation41_spill]] %s9325_s0 }
   0x2   :  { %9363 = sst [smem:[#allocation42_spill]] %s9326_s1 }
   0x3   :  { %9364 = sst [smem:[#allocation43_spill]] %s9328_s3 }
   0x4   :  { %9365 = sst [smem:[#allocation44_spill]] %s9339_s14 }
   0x5   :  { %19 = vsyncpa [#allocation3], 0 }
   0x6   :  { %21 = vsyncpa [#allocation3 + $0x1], 0 }
   0x7   :  { %22 = vsyncpa [#allocation6], 0 }
   0x8   :  { %23 = vsyncpa [#allocation9], 0 }
   0x9   :  { %24 = vsyncpa [#allocation12], 0 }
   0xa   :  { %25 = vsyncpa [#allocation15], 0 }
   0xb   :  { %26 = vsyncpa [#allocation18], 0 }
   0xc   :  { %27 = vsyncpa [#allocation21], 0 }
   0xd   :  { %28 = vsyncpa [#allocation24], 0 }
   0xe   :  { %29 = vsyncpa [#allocation4], 0 }
   0xf   :  { %31 = vsyncpa [#allocation4 + $0x1], 0  ;;  %s8080_s29 = smov 0   ;;  %s8082_s30 = smov 0  }
  0x10   :  { %s8084_s15 = smov 0   ;;  %s8086_s16 = smov 0  }
  0x11 LB: > { %9366 = sst [smem:[#allocation35_spill]] %s7966_s29  ;;  %s7980_s17 = smov [#allocation5]   ;;  %s7978_s16 = sphi %s8086_s16, %s9420_s16   ;;  %s7974_s15 = sphi %s8084_s15, %s9419_s15   ;;  %s7970_s30 = sphi %s8082_s30, %s9418_s30   ;;  %s7966_s29 = sphi %s8080_s29, %s9416_s29  }
  0x12   : > { %9367 = sst [smem:[#allocation36_spill]] %s7970_s30  ;;  %s379_s18 = sshll.u32 %s7980_s17, 4  ;;  %s8106_s18 = int_to_ptr.vmem [resolvable:$true] %s379_s18 }
  0x13   : > { %s8101_s19 = sadd.s32 4294967295, %s7978_s16   ;;  %p5724_p0 = scmp.ge.s32.totalorder %s7978_s16, 1 }
  0x14   : > { %9368 = sst [smem:[#allocation37_spill]] %s8101_s19  ;;  %p9348_p1 = scmp.eq.s32.totalorder %s8101_s19, 0 }
  0x15   : > { %p367_p2 = scmp.lt.s32.totalorder %s7978_s16, 3  ;;  %s7981_s21 = smov [#allocation8]  }
  0x16   : > { %s404_s22 = sshll.u32 %s7981_s21, 4  ;;  %s7982_s24 = smov [#allocation11]   ;;  %s8121_s22 = int_to_ptr.vmem [resolvable:$true] %s404_s22 }
  0x17   : > { %p8108_p3 = pnand %p5724_p0, %p367_p2  ;;  %s428_s25 = sshll.u32 %s7982_s24, 4  ;;  %s8123_s25 = int_to_ptr.vmem [resolvable:$true] %s428_s25 }
  0x18   : > { %s9372_s1 = sld [smem:[#allocation42_spill]] }
  0x19   : > { %s9369_s20 = scalar_select %p8108_p3, 1, 0 }
  0x1a   : > { %p7060_p5 = pneg %p8108_p3 }
  0x1b   : > { %9370 = sst [smem:[#allocation38_spill]] %s9369_s20 }
  0x1c   : > { %p8117_p6 = pnand %p7060_p5, %p9348_p1 }
  0x1e   : > { %s7490_s28 = scalar_lea.hbm %s9372_s1, 256  ;;  %p8133_p8 = pneg %p8117_p6 }
  0x1f   : > { %p7491_p7 = scmp.ne.s32.totalorder %s9372_s1, %s7490_s28  ;;  %p7497_p11 = scmp.lt.u32.totalorder %s7490_s28, %s9372_s1 }
  0x21   : > { %p7493_p9 = pnand %p8133_p8, %p7491_p7 }
  0x23   : > { %p7494_p10 = pneg %p7493_p9 }
  0x25   : > { %p7499_p12 = pnand %p7497_p11, %p7494_p10 }
  0x27   : > { %7502 = shalt.err (!%p7499_p12)
}
  0x28   : > { %s7503_s14 = scalar_lea.vmem %s8106_s18, 256  ;;  %p7511_p5 = scmp.lt.s32.totalorder %s8106_s18, %s8106_s18 }
  0x29   : > { %p7504_p13 = scmp.ne.s32.totalorder %s8106_s18, %s7503_s14  ;;  %p7512_p4 = scmp.lt.s32.totalorder %s7503_s14, %s7503_s14 }
  0x2b   : > { %p7506_p0 = pnand %p7504_p13, %p8133_p8  ;;  %p7513_p7 = por %p7512_p4, %p7511_p5 }
  0x2d   : > { %p7507_p2 = pneg %p7506_p0 }
  0x2f   : > { %p7514_p9 = pnand %p7513_p7, %p7507_p2 }
  0x31   : > { %7517 = shalt.err (!%p7514_p9)
}
  0x32   : > { %s9347_s26 = smov 128   ;;  %s9350_s20 = smov 8  }
  0x33   : > { %7063 = dma.hbm_to_vmem [thread:$0]  (!%p8117_p6), %s9372_s1, 256, %s8106_s18, [#allocation6], %s9347_s26, %s9347_s26, %s9350_s20  }
  0x34   : > { %s9374_s3 = sld [smem:[#allocation43_spill]] }
  0x3a   : > { %s7518_s14 = scalar_lea.hbm %s9374_s3, 16 }
  0x3b   : > { %p7519_p4 = scmp.ne.s32.totalorder %s9374_s3, %s7518_s14  ;;  %p7525_p12 = scmp.lt.u32.totalorder %s7518_s14, %s9374_s3 }
  0x3d   : > { %p7521_p10 = pnand %p7519_p4, %p8133_p8 }
  0x3f   : > { %p7522_p11 = pneg %p7521_p10 }
  0x41   : > { %p7527_p13 = pnand %p7525_p12, %p7522_p11 }
  0x43   : > { %7530 = shalt.err (!%p7527_p13)
}
  0x44   : > { %s7531_s18 = scalar_lea.vmem %s8121_s22, 16  ;;  %s7538_s0 = scalar_lea.vmem %s8121_s22, 32 }
  0x45   : > { %p7532_p0 = scmp.ne.s32.totalorder %s8121_s22, %s7531_s18  ;;  %p7539_p7 = scmp.lt.s32.totalorder %s8121_s22, %s8121_s22 }
  0x46   : > { %p7540_p9 = scmp.lt.s32.totalorder %s7538_s0, %s7531_s18 }
  0x47   : > { %p7534_p2 = pnand %p7532_p0, %p8133_p8 }
  0x48   : > { %p7541_p4 = por %p7540_p9, %p7539_p7 }
  0x49   : > { %p7535_p5 = pneg %p7534_p2 }
  0x4b   : > { %p7542_p10 = pnand %p7541_p4, %p7535_p5 }
  0x4d   : > { %7545 = shalt.err (!%p7542_p10)
}
  0x4e   : > { %7069 = dma.hbm_to_vmem [thread:$0]  (!%p8117_p6), %s9374_s3, 16, %s8121_s22, [#allocation9]  }
  0x4f   : > { %s7546_s28 = scalar_lea.hbm %s9330_s5, 16 }
  0x50   : > { %p7547_p11 = scmp.ne.s32.totalorder %s9330_s5, %s7546_s28  ;;  %p7553_p0 = scmp.lt.u32.totalorder %s7546_s28, %s9330_s5 }
  0x52   : > { %p7549_p12 = pnand %p7547_p11, %p8133_p8 }
  0x54   : > { %p7550_p13 = pneg %p7549_p12 }
  0x56   : > { %p7555_p2 = pnand %p7553_p0, %p7550_p13 }
  0x58   : > { %7558 = shalt.err (!%p7555_p2)
}
  0x59   : > { %s7559_s22 = scalar_lea.vmem %s8123_s25, 16  ;;  %s7566_s0 = scalar_lea.vmem %s8123_s25, 32 }
  0x5a   : > { %p7560_p5 = scmp.ne.s32.totalorder %s8123_s25, %s7559_s22  ;;  %p7567_p4 = scmp.lt.s32.totalorder %s8123_s25, %s8123_s25 }
  0x5b   : > { %p7568_p10 = scmp.lt.s32.totalorder %s7566_s0, %s7559_s22 }
  0x5c   : > { %p7562_p7 = pnand %p7560_p5, %p8133_p8 }
  0x5d   : > { %p7569_p11 = por %p7568_p10, %p7567_p4 }
  0x5e   : > { %p7563_p9 = pneg %p7562_p7 }
  0x60   : > { %p7570_p12 = pnand %p7569_p11, %p7563_p9 }
  0x62   : > { %7573 = shalt.err (!%p7570_p12)
}
  0x63   : > { %7075 = dma.hbm_to_vmem [thread:$0]  (!%p8117_p6), %s9330_s5, 16, %s8123_s25, [#allocation12]  }
  0x64   : > { %s7985_s19 = smov [#allocation14]   ;;  %s7986_s28 = smov [#allocation17]  }
  0x65   : > { %s449_s27 = sshll.u32 %s7985_s19, 4  ;;  %s475_s17 = sshll.u32 %s7986_s28, 4  ;;  %s450_s27 = int_to_ptr.vmem [resolvable:$true] %s449_s27  ;;  %s476_s17 = int_to_ptr.vmem [resolvable:$true] %s475_s17 }
  0x66   : > { %s7574_s18 = scalar_lea.hbm %s9332_s7, 4096 }
  0x67   : > { %p7575_p13 = scmp.ne.s32.totalorder %s9332_s7, %s7574_s18  ;;  %p7581_p5 = scmp.lt.u32.totalorder %s7574_s18, %s9332_s7 }
  0x69   : > { %p7577_p0 = pnand %p7575_p13, %p8133_p8 }
  0x6b   : > { %p7578_p2 = pneg %p7577_p0 }
  0x6d   : > { %p7583_p7 = pnand %p7581_p5, %p7578_p2 }
  0x6f   : > { %7586 = shalt.err (!%p7583_p7)
}
  0x70   : > { %s7587_s25 = scalar_lea.vmem %s450_s27, 4096  ;;  %p7595_p11 = scmp.lt.s32.totalorder %s450_s27, %s450_s27 }
  0x71   : > { %p7588_p9 = scmp.ne.s32.totalorder %s450_s27, %s7587_s25  ;;  %p7596_p12 = scmp.lt.s32.totalorder %s7587_s25, %s7587_s25 }
  0x73   : > { %p7590_p4 = pnand %p7588_p9, %p8133_p8  ;;  %p7597_p1 = por %p7596_p12, %p7595_p11 }
  0x75   : > { %p7591_p10 = pneg %p7590_p4 }
  0x77   : > { %p7598_p3 = pnand %p7597_p1, %p7591_p10 }
  0x79   : > { %7601 = shalt.err (!%p7598_p3)
}
  0x7a   : > { %s9351_s30 = smov 64   ;;  %s9353_s19 = smov 4  }
  0x7b   : > { %7081 = dma.hbm_to_vmem [thread:$0]  (!%p8117_p6), %s9332_s7, 4096, %s450_s27, [#allocation15], %s9351_s30, %s9351_s30, %s9353_s19  }
  0x7c   : > { %s7602_s18 = scalar_lea.hbm %s9334_s9, 64 }
  0x7d   : > { %p7603_p1 = scmp.ne.s32.totalorder %s9334_s9, %s7602_s18  ;;  %p7609_p0 = scmp.lt.u32.totalorder %s7602_s18, %s9334_s9 }
  0x7f   : > { %p7605_p3 = pnand %p7603_p1, %p8133_p8 }
  0x81   : > { %p7606_p13 = pneg %p7605_p3 }
  0x83   : > { %p7611_p2 = pnand %p7609_p0, %p7606_p13 }
  0x85   : > { %7614 = shalt.err (!%p7611_p2)
}
  0x86   : > { %s7615_s26 = scalar_lea.vmem %s476_s17, 64  ;;  %p7623_p4 = scmp.lt.s32.totalorder %s476_s17, %s476_s17 }
  0x87   : > { %p7616_p5 = scmp.ne.s32.totalorder %s476_s17, %s7615_s26  ;;  %p7624_p10 = scmp.lt.s32.totalorder %s7615_s26, %s7615_s26 }
  0x89   : > { %p7618_p7 = pnand %p7616_p5, %p8133_p8  ;;  %p7625_p11 = por %p7624_p10, %p7623_p4 }
  0x8b   : > { %p7619_p9 = pneg %p7618_p7 }
  0x8d   : > { %p7626_p12 = pnand %p7625_p11, %p7619_p9 }
  0x8f   : > { %7629 = shalt.err (!%p7626_p12)
}
  0x90   : > { %s9355_s27 = smov 16   ;;  %s7990_s28 = smov 1  }
  0x91   : > { %7087 = dma.hbm_to_vmem [thread:$0]  (!%p8117_p6), %s9334_s9, 64, %s476_s17, [#allocation18], %s9355_s27, %s9355_s27, %s7990_s28  }
  0x92   : > { %s7991_s18 = smov [#allocation20]   ;;  %s7992_s0 = smov [#allocation7]  }
  0x93   : > { %s501_s22 = sshll.u32 %s7991_s18, 4  ;;  %s393_s29 = sshll.u32 %s7992_s0, 4  ;;  %s502_s22 = int_to_ptr.vmem [resolvable:$true] %s501_s22  ;;  %s394_s29 = int_to_ptr.vmem [resolvable:$true] %s393_s29 }
  0x94   : > { %s7630_s20 = scalar_lea.hbm %s9336_s11, 64 }
  0x95   : > { %p7631_p1 = scmp.ne.s32.totalorder %s9336_s11, %s7630_s20  ;;  %p7637_p0 = scmp.lt.u32.totalorder %s7630_s20, %s9336_s11 }
  0x97   : > { %p7633_p3 = pnand %p7631_p1, %p8133_p8 }
  0x99   : > { %p7634_p13 = pneg %p7633_p3 }
  0x9b   : > { %p7639_p2 = pnand %p7637_p0, %p7634_p13 }
  0x9d   : > { %7642 = shalt.err (!%p7639_p2)
}
  0x9e   : > { %s7643_s17 = scalar_lea.vmem %s502_s22, 64  ;;  %p7651_p4 = scmp.lt.s32.totalorder %s502_s22, %s502_s22 }
  0x9f   : > { %p7644_p5 = scmp.ne.s32.totalorder %s502_s22, %s7643_s17  ;;  %p7652_p10 = scmp.lt.s32.totalorder %s7643_s17, %s7643_s17 }
  0xa1   : > { %p7646_p7 = pnand %p7644_p5, %p8133_p8  ;;  %p7653_p11 = por %p7652_p10, %p7651_p4 }
  0xa3   : > { %p7647_p9 = pneg %p7646_p7 }
  0xa5   : > { %p7654_p12 = pnand %p7653_p11, %p7647_p9 }
  0xa7   : > { %7657 = shalt.err (!%p7654_p12)
}
  0xa8   : > { %7093 = dma.hbm_to_vmem [thread:$0]  (!%p8117_p6), %s9336_s11, 64, %s502_s22, [#allocation21], %s9355_s27, %s9355_s27, %s7990_s28  }
  0xa9   : > { %s7658_s19 = scalar_lea.hbm %s9327_s2, 16 }
  0xaa   : > { %p7659_p1 = scmp.ne.s32.totalorder %s9327_s2, %s7658_s19  ;;  %p7665_p0 = scmp.lt.u32.totalorder %s7658_s19, %s9327_s2 }
  0xac   : > { %p7661_p3 = pnand %p7659_p1, %p8133_p8 }
  0xae   : > { %p7662_p13 = pneg %p7661_p3 }
  0xb0   : > { %p7667_p2 = pnand %p7665_p0, %p7662_p13 }
  0xb2   : > { %7670 = shalt.err (!%p7667_p2)
}
  0xb3   : > { %s7671_s25 = scalar_lea.vmem %s394_s29, 16  ;;  %s7678_s22 = scalar_lea.vmem %s394_s29, 32 }
  0xb4   : > { %p7672_p5 = scmp.ne.s32.totalorder %s394_s29, %s7671_s25  ;;  %p7679_p4 = scmp.lt.s32.totalorder %s394_s29, %s394_s29 }
  0xb5   : > { %p7680_p10 = scmp.lt.s32.totalorder %s7678_s22, %s7671_s25 }
  0xb6   : > { %p7674_p7 = pnand %p7672_p5, %p8133_p8 }
  0xb7   : > { %p7681_p11 = por %p7680_p10, %p7679_p4 }
  0xb8   : > { %p7675_p9 = pneg %p7674_p7 }
  0xba   : > { %p7682_p12 = pnand %p7681_p11, %p7675_p9 }
  0xbc   : > { %7685 = shalt.err (!%p7682_p12)
}
  0xbd   : > { %7066 = dma.hbm_to_vmem [thread:$0]  (!%p8117_p6), %s9327_s2, 16, %s394_s29, [#allocation6]  }
  0xbe   : > { %s7993_s1 = smov [#allocation10]   ;;  %s7994_s20 = smov [#allocation13]  }
  0xbf   : > { %s414_s3 = sshll.u32 %s7993_s1, 4  ;;  %s439_s30 = sshll.u32 %s7994_s20, 4  ;;  %s415_s3 = int_to_ptr.vmem [resolvable:$true] %s414_s3  ;;  %s440_s30 = int_to_ptr.vmem [resolvable:$true] %s439_s30 }
  0xc0   : > { %s7686_s14 = scalar_lea.hbm %s9329_s4, 1024 }
  0xc1   : > { %p7687_p1 = scmp.ne.s32.totalorder %s9329_s4, %s7686_s14  ;;  %p7693_p0 = scmp.lt.u32.totalorder %s7686_s14, %s9329_s4 }
  0xc3   : > { %p7689_p3 = pnand %p7687_p1, %p8133_p8 }
  0xc5   : > { %p7690_p13 = pneg %p7689_p3 }
  0xc7   : > { %p7695_p2 = pnand %p7693_p0, %p7690_p13 }
  0xc9   : > { %7698 = shalt.err (!%p7695_p2)
}
  0xca   : > { %s7699_s29 = scalar_lea.vmem %s415_s3, 1024  ;;  %p7707_p4 = scmp.lt.s32.totalorder %s415_s3, %s415_s3 }
  0xcb   : > { %p7700_p5 = scmp.ne.s32.totalorder %s415_s3, %s7699_s29  ;;  %p7708_p10 = scmp.lt.s32.totalorder %s7699_s29, %s7699_s29 }
  0xcd   : > { %p7702_p7 = pnand %p7700_p5, %p8133_p8  ;;  %p7709_p11 = por %p7708_p10, %p7707_p4 }
  0xcf   : > { %p7703_p9 = pneg %p7702_p7 }
  0xd1   : > { %p7710_p12 = pnand %p7709_p11, %p7703_p9 }
  0xd3   : > { %7713 = shalt.err (!%p7710_p12)
}
  0xd4   : > { %s9375_s26 = smov 4   ;;  %s9376_s17 = smov 64  }
  0xd5   : > { %7072 = dma.hbm_to_vmem [thread:$0]  (!%p8117_p6), %s9329_s4, 1024, %s415_s3, [#allocation9], %s9376_s17, %s9376_s17, %s9375_s26  }
  0xd6   : > { %s7714_s14 = scalar_lea.hbm %s9331_s6, 16 }
  0xd7   : > { %p7715_p1 = scmp.ne.s32.totalorder %s9331_s6, %s7714_s14  ;;  %p7721_p0 = scmp.lt.u32.totalorder %s7714_s14, %s9331_s6 }
  0xd9   : > { %p7717_p3 = pnand %p7715_p1, %p8133_p8 }
  0xdb   : > { %p7718_p13 = pneg %p7717_p3 }
  0xdd   : > { %p7723_p2 = pnand %p7721_p0, %p7718_p13 }
  0xdf   : > { %7726 = shalt.err (!%p7723_p2)
}
  0xe0   : > { %s7727_s29 = scalar_lea.vmem %s440_s30, 16  ;;  %s7734_s3 = scalar_lea.vmem %s440_s30, 32 }
  0xe1   : > { %p7728_p5 = scmp.ne.s32.totalorder %s440_s30, %s7727_s29  ;;  %p7735_p4 = scmp.lt.s32.totalorder %s440_s30, %s440_s30 }
  0xe2   : > { %p7736_p10 = scmp.lt.s32.totalorder %s7734_s3, %s7727_s29 }
  0xe3   : > { %p7730_p7 = pnand %p7728_p5, %p8133_p8 }
  0xe4   : > { %p7737_p11 = por %p7736_p10, %p7735_p4 }
  0xe5   : > { %p7731_p9 = pneg %p7730_p7 }
  0xe7   : > { %p7738_p12 = pnand %p7737_p11, %p7731_p9 }
  0xe9   : > { %7741 = shalt.err (!%p7738_p12)
}
  0xea   : > { %7078 = dma.hbm_to_vmem [thread:$0]  (!%p8117_p6), %s9331_s6, 16, %s440_s30, [#allocation12]  }
  0xeb   : > { %s7995_s19 = smov [#allocation16]   ;;  %s7996_s14 = smov [#allocation19]  }
  0xec   : > { %s462_s24 = sshll.u32 %s7995_s19, 4  ;;  %s488_s18 = sshll.u32 %s7996_s14, 4  ;;  %s463_s24 = int_to_ptr.vmem [resolvable:$true] %s462_s24  ;;  %s489_s18 = int_to_ptr.vmem [resolvable:$true] %s488_s18 }
  0xed   : > { %s7742_s22 = scalar_lea.hbm %s9333_s8, 4096 }
  0xee   : > { %p7743_p1 = scmp.ne.s32.totalorder %s9333_s8, %s7742_s22  ;;  %p7749_p0 = scmp.lt.u32.totalorder %s7742_s22, %s9333_s8 }
  0xf0   : > { %p7745_p3 = pnand %p7743_p1, %p8133_p8 }
  0xf2   : > { %p7746_p13 = pneg %p7745_p3 }
  0xf4   : > { %p7751_p2 = pnand %p7749_p0, %p7746_p13 }
  0xf6   : > { %7754 = shalt.err (!%p7751_p2)
}
  0xf7   : > { %s7755_s30 = scalar_lea.vmem %s463_s24, 4096  ;;  %p7763_p4 = scmp.lt.s32.totalorder %s463_s24, %s463_s24 }
  0xf8   : > { %p7756_p5 = scmp.ne.s32.totalorder %s463_s24, %s7755_s30  ;;  %p7764_p10 = scmp.lt.s32.totalorder %s7755_s30, %s7755_s30 }
  0xfa   : > { %p7758_p7 = pnand %p7756_p5, %p8133_p8  ;;  %p7765_p11 = por %p7764_p10, %p7763_p4 }
  0xfc   : > { %p7759_p9 = pneg %p7758_p7 }
  0xfe   : > { %p7766_p12 = pnand %p7765_p11, %p7759_p9 }
 0x100   : > { %7769 = shalt.err (!%p7766_p12)
}
 0x101   : > { %7084 = dma.hbm_to_vmem [thread:$0]  (!%p8117_p6), %s9333_s8, 4096, %s463_s24, [#allocation15], %s9376_s17, %s9376_s17, %s9375_s26  }
 0x102   : > { %s7770_s0 = scalar_lea.hbm %s9335_s10, 4096 }
 0x103   : > { %p7771_p1 = scmp.ne.s32.totalorder %s9335_s10, %s7770_s0  ;;  %p7777_p0 = scmp.lt.u32.totalorder %s7770_s0, %s9335_s10 }
 0x105   : > { %p7773_p3 = pnand %p7771_p1, %p8133_p8 }
 0x107   : > { %p7774_p13 = pneg %p7773_p3 }
 0x109   : > { %p7779_p2 = pnand %p7777_p0, %p7774_p13 }
 0x10b   : > { %7782 = shalt.err (!%p7779_p2)
}
 0x10c   : > { %s7783_s1 = scalar_lea.vmem %s489_s18, 4096  ;;  %p7791_p4 = scmp.lt.s32.totalorder %s489_s18, %s489_s18 }
 0x10d   : > { %p7784_p5 = scmp.ne.s32.totalorder %s489_s18, %s7783_s1  ;;  %p7792_p10 = scmp.lt.s32.totalorder %s7783_s1, %s7783_s1 }
 0x10f   : > { %p7786_p7 = pnand %p7784_p5, %p8133_p8  ;;  %p7793_p11 = por %p7792_p10, %p7791_p4 }
 0x111   : > { %p7787_p9 = pneg %p7786_p7 }
 0x113   : > { %p7794_p12 = pnand %p7793_p11, %p7787_p9 }
 0x115   : > { %7797 = shalt.err (!%p7794_p12)
}
 0x116   : > { %7090 = dma.hbm_to_vmem [thread:$0]  (!%p8117_p6), %s9335_s10, 4096, %s489_s18, [#allocation18], %s9376_s17, %s9376_s17, %s9375_s26  }
 0x117   : > { %s7997_s27 = smov [#allocation22]   ;;  %s7998_s19 = smov [#allocation23]  }
 0x118   : > { %s514_s20 = sshll.u32 %s7997_s27, 4  ;;  %s527_s14 = sshll.u32 %s7998_s19, 4  ;;  %s515_s20 = int_to_ptr.vmem [resolvable:$true] %s514_s20  ;;  %s528_s14 = int_to_ptr.vmem [resolvable:$true] %s527_s14 }
 0x119   : > { %s7798_s22 = scalar_lea.hbm %s9337_s12, 64 }
 0x11a   : > { %p7799_p1 = scmp.ne.s32.totalorder %s9337_s12, %s7798_s22  ;;  %p7805_p0 = scmp.lt.u32.totalorder %s7798_s22, %s9337_s12 }
 0x11c   : > { %p7801_p3 = pnand %p7799_p1, %p8133_p8 }
 0x11e   : > { %p7802_p13 = pneg %p7801_p3 }
 0x120   : > { %p7807_p2 = pnand %p7805_p0, %p7802_p13 }
 0x122   : > { %7810 = shalt.err (!%p7807_p2)
}
 0x123   : > { %s7811_s26 = scalar_lea.vmem %s515_s20, 64  ;;  %p7819_p4 = scmp.lt.s32.totalorder %s515_s20, %s515_s20 }
 0x124   : > { %p7812_p5 = scmp.ne.s32.totalorder %s515_s20, %s7811_s26  ;;  %p7820_p10 = scmp.lt.s32.totalorder %s7811_s26, %s7811_s26 }
 0x126   : > { %p7814_p7 = pnand %p7812_p5, %p8133_p8  ;;  %p7821_p11 = por %p7820_p10, %p7819_p4 }
 0x128   : > { %p7815_p9 = pneg %p7814_p7 }
 0x12a   : > { %p7822_p12 = pnand %p7821_p11, %p7815_p9 }
 0x12c   : > { %7825 = shalt.err (!%p7822_p12)
}
 0x12d   : > { %s9377_s17 = smov 16   ;;  %s7826_s0 = scalar_lea.hbm %s9338_s13, 64 }
 0x12e   : > { %7096 = dma.hbm_to_vmem [thread:$0]  (!%p8117_p6), %s9337_s12, 64, %s515_s20, [#allocation21], %s9377_s17, %s9377_s17, %s7990_s28  }
 0x12f   : > { %p7827_p1 = scmp.ne.s32.totalorder %s9338_s13, %s7826_s0  ;;  %p7833_p0 = scmp.lt.u32.totalorder %s7826_s0, %s9338_s13 }
 0x131   : > { %p7829_p3 = pnand %p7827_p1, %p8133_p8 }
 0x133   : > { %p7830_p13 = pneg %p7829_p3 }
 0x135   : > { %p7835_p2 = pnand %p7833_p0, %p7830_p13 }
 0x137   : > { %7838 = shalt.err (!%p7835_p2)
}
 0x138   : > { %s7839_s1 = scalar_lea.vmem %s528_s14, 64  ;;  %p7847_p4 = scmp.lt.s32.totalorder %s528_s14, %s528_s14 }
 0x139   : > { %p7840_p5 = scmp.ne.s32.totalorder %s528_s14, %s7839_s1  ;;  %p7848_p10 = scmp.lt.s32.totalorder %s7839_s1, %s7839_s1 }
 0x13b   : > { %p7842_p7 = pnand %p7840_p5, %p8133_p8  ;;  %p7849_p11 = por %p7848_p10, %p7847_p4 }
 0x13d   : > { %p7843_p9 = pneg %p7842_p7 }
 0x13f   : > { %p7850_p12 = pnand %p7849_p11, %p7843_p9 }
 0x141   : > { %7853 = shalt.err (!%p7850_p12)
}
 0x142   : > { %s9378_s21 = sld [smem:[#allocation36_spill]]  ;;  %s9379_s26 = sld [smem:[#allocation35_spill]] }
 0x143   : > { %s9380_s18 = sld [smem:[#allocation37_spill]]  ;;  %s5723_s23 = sadd.s32 4294967294, %s7978_s16  }
 0x144   : > { %7099 = dma.hbm_to_vmem [thread:$0]  (!%p8117_p6), %s9338_s13, 64, %s528_s14, [#allocation24], %s9377_s17, %s9377_s17, %s7990_s28  }
 0x145   : > { %s8411_s30 = sadd.s32 1, %s7978_s16   ;;  %s44_s27 = sadd.s32 1, %s7974_s15 }
 0x146   : > { %s41_s19 = ssub.s32 %s7978_s16, %s8411_s30  ;;  %p52_p3 = scmp.eq.s32.totalorder %s7978_s16, 0 }
 0x147   : > { %p42_p1 = scmp.eq.s32.totalorder %s41_s19, 0  ;;  %p360_p9 = scmp.eq.s32.totalorder %s5723_s23, 1 }
 0x148   : > { %p51_p8 = scmp.ne.s32.totalorder %s7974_s15, %s9378_s21  ;;  %p57_p13 = scmp.ne.s32.totalorder %s9378_s21, %s9379_s26 }
 0x149   : > { %p354_p0 = scmp.eq.s32.totalorder %s9380_s18, 1  ;;  %p9381_p5 = scmp.eq.s32.totalorder %s9380_s18, 0 }
 0x14a   : > { %s8423_s0 = scalar_select %p42_p1, %s7974_s15, %s44_s27  }
 0x14b   : > { %p53_p2 = por %p52_p3, %p51_p8  ;;  %p8427_p7 = por %p9381_p5, %p57_p13 }
 0x14c   : > { %p8431_p6 = por %p354_p0, %p51_p8  ;;  %p7121_p4 = scmp.lt.s32.totalorder %s7978_s16, 2 }
 0x14d   : > { %s541_s14 = sand.u32 1, %s7974_s15   ;;  %p8437_p10 = por %p360_p9, %p57_p13 }
 0x14e   : > { %s9383_s28 = scalar_select %p8431_p6, 1, 0 }
 0x14f   : > { %s9384_s17 = scalar_select %p8437_p10, 1, 0 }
 0x150   : > { %s5739_s22 = sshll.u32 %s541_s14, 6  ;;  %s5973_s29 = sshll.u32 %s7978_s16, 10 }
 0x151   : > { %s9385_s20 = sld [smem:[#allocation41_spill]]  ;;  %s545_s21 = scalar_lea.vmem [#allocation2], %s5739_s22 }
 0x152   : > { %s552_s26 = sshll.u32 %s545_s21, 4  ;;  %p8447_p11 = pnand %p7121_p4, %p53_p2  ;;  %s8451_s26 = int_to_ptr.vmem [resolvable:$true] %s552_s26 }
 0x153   : > { %s8453_s23 = scalar_lea.sflag [#allocation3], %s541_s14 }
 0x154   : > { %p7856_p8 = pneg %p8447_p11 }
 0x157   : > { %s8445_s24 = scalar_lea.hbm %s9385_s20, %s5973_s29  ;;  %s7859_s29 = scalar_lea.hbm %s9385_s20, 2048 }
 0x158   : > { %s7854_s27 = scalar_lea.hbm %s8445_s24, 1024  ;;  %p7860_p13 = scmp.lt.u32.totalorder %s8445_s24, %s9385_s20 }
 0x159   : > { %p7855_p12 = scmp.ne.s32.totalorder %s8445_s24, %s7854_s27  ;;  %p7861_p0 = scmp.lt.u32.totalorder %s7859_s29, %s7854_s27 }
 0x15a   : > { %p7863_p5 = scmp.lt.u32.totalorder %s7854_s27, %s8445_s24 }
 0x15b   : > { %p7857_p1 = pnand %p7856_p8, %p7855_p12  ;;  %p7862_p2 = por %p7861_p0, %p7860_p13 }
 0x15d   : > { %p7858_p3 = pneg %p7857_p1  ;;  %p7864_p9 = por %p7863_p5, %p7862_p2 }
 0x15f   : > { %p7865_p4 = pnand %p7864_p9, %p7858_p3 }
 0x161   : > { %7868 = shalt.err (!%p7865_p4)
}
 0x162   : > { %s7869_s14 = scalar_lea.vmem %s8451_s26, 1024  ;;  %s7999_s21 = smov [#allocation2]  }
 0x163   : > { %p7870_p12 = scmp.ne.s32.totalorder %s8451_s26, %s7869_s14  ;;  %s7874_s19 = sshll.u32 %s7999_s21, 4  ;;  %s7875_s19 = int_to_ptr.vmem [resolvable:$false] %s7874_s19 }
 0x164   : > { %s7876_s22 = scalar_lea.vmem %s7875_s19, 2048  ;;  %p7877_p6 = scmp.lt.s32.totalorder %s8451_s26, %s7875_s19 }
 0x165   : > { %p7872_p1 = pnand %p7870_p12, %p7856_p8  ;;  %p7878_p13 = scmp.lt.s32.totalorder %s7876_s22, %s7869_s14 }
 0x167   : > { %p7873_p10 = pneg %p7872_p1  ;;  %p7879_p0 = por %p7878_p13, %p7877_p6 }
 0x169   : > { %p7880_p2 = pnand %p7879_p0, %p7873_p10 }
 0x16b   : > { %7883 = shalt.err (!%p7880_p2)
}
 0x16c   : > { %s9387_s27 = smov 8   ;;  %s9388_s29 = smov 128  }
 0x16d   : > { %7103 = dma.hbm_to_vmem [thread:$0]  (!%p8447_p11), %s8445_s24, 1024, %s8451_s26, %s8453_s23, %s9388_s29, %s9388_s29, %s9387_s27  }
 0x16e   : > { %s9389_s3 = sld [smem:[#allocation38_spill]] }
 0x174   : > { %p9390_p8 = scmp.ne.s32.totalorder %s9389_s3, 0 }
 0x176   : > { %564 = sbr.rel (%p9390_p8) target bundleno = 6707 (0x1a33), region = 76 }
 0x17d   : > { %s9391_s1 = sld [smem:[#allocation36_spill]] }
 0x183   : > { %s8487_s21 = sand.u32 1, %s9391_s1  }
 0x184   : > { %s5743_s14 = sshll.u32 %s8487_s21, 6  ;;  %s567_s19 = scalar_lea.sflag [#allocation3], %s8487_s21 }
 0x185   : > { %s8491_s22 = scalar_lea.vmem [#allocation2], %s5743_s14 }
 0x186   : > { %7929 = dma.done.wait (%p8427_p7), %s567_s19, 1024  }
 0x187   : > { %7931 = vsyncadd (%p8427_p7), %s567_s19, 4294966272  ;;  %s9392_s18 = sld [smem:[#allocation37_spill]] }
 0x18d   : > { %p9393_p6 = scmp.eq.s32.totalorder %s9392_s18, 0 }
 0x18f   : > { %7933 = dma.done.wait (%p9393_p6), [#allocation6], 272   ;;  %p9394_p10 = pmov %p9393_p6 }
 0x190   : > { %p9395_p11 = pmov %p9393_p6 }
 0x191   : > { %7935 = vsyncadd (%p9394_p10), [#allocation6], 4294967024 }
 0x192   : > { %7937 = dma.done.wait (%p9395_p11), [#allocation9], 1040   ;;  %p9396_p3 = pmov %p9393_p6 }
 0x194   : > { %7939 = vsyncadd (%p9396_p3), [#allocation9], 4294966256  ;;  %p9397_p5 = pmov %p9396_p3 }
 0x195   : > { %p9398_p9 = pmov %p9396_p3 }
 0x196   : > { %7941 = dma.done.wait (%p9397_p5), [#allocation12], 32  }
 0x197   : > { %7943 = vsyncadd (%p9398_p9), [#allocation12], 4294967264  ;;  %p9399_p7 = pmov %p9396_p3 }
 0x198   : > { %p9400_p4 = pmov %p9396_p3 }
 0x199   : > { %7945 = dma.done.wait (%p9399_p7), [#allocation15], 8192  }
 0x19a   : > { %7947 = vsyncadd (%p9400_p4), [#allocation15], 4294959104  ;;  %p9401_p12 = pmov %p9396_p3 }
 0x19b   : > { %p9402_p1 = pmov %p9396_p3 }
 0x19c   : > { %7949 = dma.done.wait (%p9401_p12), [#allocation18], 4160  }
 0x19d   : > { %7951 = vsyncadd (%p9402_p1), [#allocation18], 4294963136  ;;  %p9403_p13 = pmov %p9402_p1 }
 0x19e   : > { %p9404_p0 = pmov %p9402_p1 }
 0x19f   : > { %7953 = dma.done.wait (%p9403_p13), [#allocation21], 128  }
 0x1a0   : > { %7955 = vsyncadd (%p9404_p0), [#allocation21], 4294967168  ;;  %p9405_p2 = pmov %p9404_p0 }
 0x1a1   : > { %p9406_p8 = pmov %p9404_p0 }
 0x1a2   : > { %7957 = dma.done.wait (%p9405_p2), [#allocation24], 64  }
 0x1a3   : > { %7959 = vsyncadd (%p9406_p8), [#allocation24], 4294967232  ;;  %vm703_vm0 = vcmask 1040384   ;;  %vm678_vm1 = vcmask 72704   ;;  %vm8000_vm2 = vmmov 1   ;;  %v676_v0 = vld [vmem:[#allocation5] sm:$0xff] }
 0x1a4   : > { %vm6901_vm3 = vmpackc.low %vm703_vm0, %vm8000_vm2  ;;  %v677_v1 = vld [vmem:[#allocation5 + $0x8] sm:$0x1]  ;;  %v668_v2 = vld [vmem:[%s8491_s22] sm:$0xff]  ;;  %vm1343_vm4 = vcmask 261120   ;;  %vm1053_vm5 = vcmask 523264   ;;  %s7002_s25 = smul.u32 640, %s8487_s21 }
 0x1a5   : > { %v6900_v3 = vpack.c.bf16 %v677_v1, %v676_v0  ;;  %6288 = vmatprep.mubr.msk.f32.mxu0 %vm678_vm1, %v668_v2  ;;  %v669_v4 = vld [vmem:[%s8491_s22 + $0x8] sm:$0xff]  ;;  %v670_v5 = vld [vmem:[%s8491_s22 + $0x10] sm:$0xff]  ;;  %v7195_v7 = vld [vmem:[#allocation10 + $0x8] sm:$0xff]   ;;  %s7003_s26 = smul.u32 10240, %s9392_s18  ;;  %s9411_s3 = sld [smem:[#allocation44_spill]] }
 0x1a6   : > { %v7194_v6 = vld [vmem:[#allocation10] sm:$0xff]   ;;  %v672_v9 = vld [vmem:[%s8491_s22 + $0x20] sm:$0xff]  ;;  %v673_v11 = vld [vmem:[%s8491_s22 + $0x28] sm:$0xff]  ;;  %s9104_s24 = scalar_lea.vmem [#allocation25], %s7002_s25  ;;  %s5513_s14 = scalar_lea.sflag [#allocation4], %s8487_s21 }
 0x1a7   : > { %6902 = vmatprep.subr.msk.bf16.mxu0 %vm6901_vm3, %v6900_v3  ;;  %v671_v8 = vld [vmem:[%s8491_s22 + $0x18] sm:$0xff]  ;;  %6300 = vmatprep.subr.bf16.mxu1 %v7194_v6  ;;  %v7196_v10 = vld [vmem:[#allocation10 + $0x10] sm:$0xff]   ;;  %v7197_v12 = vld [vmem:[#allocation10 + $0x18] sm:$0xff]   ;;  %s5526_s23 = sshll.u32 %s9104_s24, 4  ;;  %p9412_p10 = scmp.ne.s32.totalorder %s9383_s28, 0  ;;  %s9279_s23 = int_to_ptr.vmem [resolvable:$true] %s5526_s23 }
 0x1a8   : > { %6905 = vmatpush3.bf16.msk.msra.mxu0 %vm6901_vm3, %v6900_v3  ;;  %6301 = vmatpush3.bf16.msra.mxu1 %v7194_v6  ;;  %v674_v13 = vld [vmem:[%s8491_s22 + $0x30] sm:$0xff]  ;;  %v675_v14 = vld [vmem:[%s8491_s22 + $0x38] sm:$0xff]  ;;  %v7200_v17 = vld [vmem:[#allocation10 + $0x30] sm:$0xff]   ;;  %s7884_s19 = scalar_lea.vmem %s9279_s23, 10240  ;;  %s8002_s22 = smov [#allocation25]  }
 0x1a9   : > { %6302 = vmatprep.subr.bf16.mxu1 %v7195_v7  ;;  %v7198_v15 = vld [vmem:[#allocation10 + $0x20] sm:$0xff]   ;;  %v7199_v16 = vld [vmem:[#allocation10 + $0x28] sm:$0xff]   ;;  %v7201_v18 = vld [vmem:[#allocation10 + $0x38] sm:$0xff]   ;;  %p7885_p6 = scmp.ne.s32.totalorder %s9279_s23, %s7884_s19  ;;  %s7888_s18 = sshll.u32 %s8002_s22, 4  ;;  %s7889_s18 = int_to_ptr.vmem [resolvable:$false] %s7888_s18 }
 0x1aa   : > { %v7202_v19 = vld [vmem:[#allocation14] sm:$0xff]   ;;  %v7204_v21 = vld [vmem:[#allocation14 + $0x8] sm:$0xff]   ;;  %v7206_v22 = vld [vmem:[#allocation14 + $0x10] sm:$0xff]   ;;  %s7890_s25 = scalar_lea.vmem %s7889_s18, 20480  ;;  %p7891_p5 = scmp.lt.s32.totalorder %s9279_s23, %s7889_s18 }
 0x1ab   : > { %6289 = vmatmul.mubr.msk.f32.vlgmr.msra.gmra.mrb[0].mxu0 %vm678_vm1, %v669_v4  ;;  %v7203_v20 = vld [vmem:[#allocation16] sm:$0xff]   ;;  %6324 = vmatprep.subr.bf16.mxu0 %v7202_v19  ;;  %v7208_v23 = vld [vmem:[#allocation14 + $0x18] sm:$0xff]   ;;  %v7205_v52 = vld [vmem:[#allocation16 + $0x8] sm:$0xff]   ;;  %s9277_s1 = scalar_lea.hbm %s9411_s3, %s7003_s26  ;;  %p7886_p11 = pnand %p7885_p6, %p9412_p10 }
 0x1ac   : > { %6291 = vmatprep.mubr.msk.f32.mxu0 %vm678_vm1, %v670_v5  ;;  %6303 = vmatpush3.bf16.msra.mxu1 %v7195_v7  ;;  %v7210_v24 = vld [vmem:[#allocation14 + $0x20] sm:$0xff]   ;;  %v5766_v25 = vld [vmem:[#allocation7] ss:$0 sm:$0xff]  ;;  %v5767_v27 = vld [vmem:[#allocation8] ss:$0 sm:$0xff]  ;;  %p7892_p9 = scmp.lt.s32.totalorder %s7890_s25, %s7884_s19 }
 0x1ad   : > { %6304 = vmatprep.subr.bf16.mxu1 %v7196_v10  ;;  %6325 = vmatpush3.bf16.msra.mxu0 %v7202_v19  ;;  %v7207_v61 = vld [vmem:[#allocation16 + $0x10] sm:$0xff]   ;;  %v7209_v1 = vld [vmem:[#allocation16 + $0x18] sm:$0xff]   ;;  %v7211_v2 = vld [vmem:[#allocation16 + $0x20] sm:$0xff]   ;;  %p7887_p3 = pneg %p7886_p11 }
 0x1ae   : > { %6326 = vmatprep.subr.bf16.mxu0 %v7204_v21  ;;  %v7212_v3 = vld [vmem:[#allocation14 + $0x28] sm:$0xff]   ;;  %v7214_v5 = vld [vmem:[#allocation14 + $0x30] sm:$0xff]   ;;  %v7216_v7 = vld [vmem:[#allocation14 + $0x38] sm:$0xff]   ;;  %p7893_p7 = por %p7892_p9, %p7891_p5 }
 0x1af   : > { %6292 = vmatmul.mubr.msk.f32.gmra.mrb[2].mxu0 %vm678_vm1, %v671_v8  ;;  %v7213_v4 = vld [vmem:[#allocation16 + $0x28] sm:$0xff]   ;;  %v7215_v6 = vld [vmem:[#allocation16 + $0x30] sm:$0xff]   ;;  %v7217_v8 = vld [vmem:[#allocation16 + $0x38] sm:$0xff]  }
 0x1b0   : > { %6294 = vmatprep.mubr.msk.f32.mxu0 %vm678_vm1, %v672_v9  ;;  %6305 = vmatpush3.bf16.msra.mxu1 %v7196_v10  ;;  %v5776_v9 = vld [vmem:[#allocation11] ss:$0 sm:$0xff]  ;;  %p7894_p4 = pnand %p7893_p7, %p7887_p3 }
 0x1b1   : > { %6306 = vmatprep.subr.bf16.mxu1 %v7197_v12  ;;  %6327 = vmatpush3.bf16.msra.mxu0 %v7204_v21 }
 0x1b2   : > { %6328 = vmatprep.subr.bf16.mxu0 %v7206_v22 }
 0x1b3   : > { %6295 = vmatmul.mubr.msk.f32.gmra.mrb[4].mxu0 %vm678_vm1, %v673_v11 }
 0x1b4   : > { %6297 = vmatprep.mubr.msk.f32.mxu0 %vm678_vm1, %v674_v13  ;;  %6307 = vmatpush3.bf16.msra.mxu1 %v7197_v12  ;;  %v5777_v12 = vld [vmem:[#allocation13] ss:$0 sm:$0xff] }
 0x1b5   : > { %6308 = vmatprep.subr.bf16.mxu1 %v7198_v15  ;;  %6329 = vmatpush3.bf16.msra.mxu0 %v7206_v22 }
 0x1b6   : > { %6330 = vmatprep.subr.bf16.mxu0 %v7208_v23 }
 0x1b7   : > { %6298 = vmatmul.mubr.msk.f32.gmra.mrb[6].mxu0 %vm678_vm1, %v675_v14 }
 0x1b8   : > { %6309 = vmatpush3.bf16.msra.mxu1 %v7198_v15 }
 0x1b9   : > { %6310 = vmatprep.subr.bf16.mxu1 %v7199_v16  ;;  %6331 = vmatpush3.bf16.msra.mxu0 %v7208_v23 }
 0x1ba   : > { %6332 = vmatprep.subr.bf16.mxu0 %v7210_v24 }
 0x1bc   : > { %6311 = vmatpush3.bf16.msra.mxu1 %v7199_v16 }
 0x1bd   : > { %6312 = vmatprep.subr.bf16.mxu1 %v7200_v17  ;;  %6333 = vmatpush3.bf16.msra.mxu0 %v7210_v24 }
 0x1be   : > { %6334 = vmatprep.subr.bf16.mxu0 %v7212_v3 }
 0x1c0   : > { %6313 = vmatpush3.bf16.msra.mxu1 %v7200_v17 }
 0x1c1   : > { %6314 = vmatprep.subr.bf16.mxu1 %v7201_v18  ;;  %6335 = vmatpush3.bf16.msra.mxu0 %v7212_v3 }
 0x1c2   : > { %6336 = vmatprep.subr.bf16.mxu0 %v7214_v5 }
 0x1c4   : > { %6315 = vmatpush3.bf16.msra.mxu1 %v7201_v18 }
 0x1c5   : > { %6348 = vmatprep.subr.bf16.mxu1 %v7203_v20  ;;  %6337 = vmatpush3.bf16.msra.mxu0 %v7214_v5 }
 0x1c6   : > { %6338 = vmatprep.subr.bf16.mxu0 %v7216_v7 }
 0x1c9   : > { %6339 = vmatpush3.bf16.msra.mxu0 %v7216_v7 }
 0x27e   : > { %v6290_v26 = vpop.f32.mrb[0].mxu0 }
 0x27f   : > { %v820_v28 = vmul.f32 %v6290_v26, %v5766_v25  ;;  %v773_v29 = vpop.f32.mrb[1].mxu0 }
 0x280   : > { %v819_v30 = vmul.f32 %v5766_v25, %v773_v29 }
 0x281   : > { %v835_v31 = vadd.f32 %v5767_v27, %v820_v28 }
 0x282   : > { %v6293_v32 = vpop.f32.mrb[2].mxu0  ;;  %v834_v33 = vadd.f32 %v5767_v27, %v819_v30 }
 0x283   : > { %v822_v34 = vmul.f32 %v6293_v32, %v5766_v25  ;;  %v783_v35 = vpop.f32.mrb[3].mxu0  ;;  %v843_v36 = vmax.f32 %v835_v31, 0.0 }
 0x284   : > { %v821_v37 = vmul.f32 %v5766_v25, %v783_v35  ;;  %v842_v38 = vmax.f32 %v834_v33, 0.0 }
 0x285   : > { %v837_v39 = vadd.f32 %v5767_v27, %v822_v34 }
 0x286   : > { %v836_v40 = vadd.f32 %v5767_v27, %v821_v37  ;;  %v6296_v41 = vpop.f32.mrb[4].mxu0  ;;  %v850_v42 = vpack.c.bf16 %v843_v36, %v842_v38 }
 0x287   : > { %v845_v43 = vmax.f32 %v837_v39, 0.0  ;;  %v824_v44 = vmul.f32 %v6296_v41, %v5766_v25  ;;  %v793_v45 = vpop.f32.mrb[5].mxu0 }
 0x288   : > { %v844_v46 = vmax.f32 %v836_v40, 0.0  ;;  %6316 = vmatprep.mubr.bf16.mxu1 %v850_v42  ;;  %v823_v47 = vmul.f32 %v5766_v25, %v793_v45 }
 0x289   : > { %v839_v48 = vadd.f32 %v5767_v27, %v824_v44 }
 0x28a   : > { %v838_v49 = vadd.f32 %v5767_v27, %v823_v47  ;;  %v6299_v50 = vpop.f32.mrb[6].mxu0  ;;  %v851_v51 = vpack.c.bf16 %v845_v43, %v844_v46 }
 0x28b   : > { %v847_v53 = vmax.f32 %v839_v48, 0.0  ;;  %v826_v54 = vmul.f32 %v6299_v50, %v5766_v25  ;;  %v803_v55 = vpop.f32.mrb[7].mxu0 }
 0x28c   : > { %v846_v56 = vmax.f32 %v838_v49, 0.0  ;;  %v825_v57 = vmul.f32 %v5766_v25, %v803_v55  ;;  %6317 = vmatmul.mubr.bf16.vlgmr.msra.gmra.mrb[0].mxu1 %v851_v51 }
 0x28d   : > { %v841_v58 = vadd.f32 %v5767_v27, %v826_v54  ;;  %6349 = vmatpush3.bf16.msra.mxu1 %v7203_v20 }
 0x28e   : > { %v840_v59 = vadd.f32 %v5767_v27, %v825_v57  ;;  %v852_v60 = vpack.c.bf16 %v847_v53, %v846_v56  ;;  %6350 = vmatprep.subr.bf16.mxu1 %v7205_v52 }
 0x28f   : > { %v849_v62 = vmax.f32 %v841_v58, 0.0 }
 0x290   : > { %v848_v63 = vmax.f32 %v840_v59, 0.0  ;;  %6320 = vmatprep.mubr.bf16.mxu1 %v852_v60 }
 0x291   : > { %6351 = vmatpush3.bf16.msra.mxu1 %v7205_v52 }
 0x292   : > { %v853_v0 = vpack.c.bf16 %v849_v62, %v848_v63  ;;  %6352 = vmatprep.subr.bf16.mxu1 %v7207_v61 }
 0x294   : > { %6321 = vmatmul.mubr.bf16.gmra.mrb[4].mxu1 %v853_v0 }
 0x295   : > { %6353 = vmatpush3.bf16.msra.mxu1 %v7207_v61 }
 0x296   : > { %6354 = vmatprep.subr.bf16.mxu1 %v7209_v1 }
 0x299   : > { %6355 = vmatpush3.bf16.msra.mxu1 %v7209_v1 }
 0x29a   : > { %6356 = vmatprep.subr.bf16.mxu1 %v7211_v2 }
 0x29d   : > { %6357 = vmatpush3.bf16.msra.mxu1 %v7211_v2 }
 0x29e   : > { %6358 = vmatprep.subr.bf16.mxu1 %v7213_v4 }
 0x2a1   : > { %6359 = vmatpush3.bf16.msra.mxu1 %v7213_v4 }
 0x2a2   : > { %6360 = vmatprep.subr.bf16.mxu1 %v7215_v6 }
 0x2a5   : > { %6361 = vmatpush3.bf16.msra.mxu1 %v7215_v6 }
 0x2a6   : > { %6362 = vmatprep.subr.bf16.mxu1 %v7217_v8 }
 0x2a9   : > { %6363 = vmatpush3.bf16.msra.mxu1 %v7217_v8 }
 0x35f   : > { %v6318_v10 = vpop.f32.mrb[0].mxu1 }
 0x360   : > { %v992_v11 = vmul.f32 %v6318_v10, %v5776_v9  ;;  %v952_v13 = vpop.f32.mrb[1].mxu1 }
 0x361   : > { %v990_v14 = vmul.f32 %v5776_v9, %v952_v13  ;;  %v6319_v15 = vpop.f32.mrb[2].mxu1 }
 0x362   : > { %v993_v16 = vmul.f32 %v6319_v15, %v5776_v9  ;;  %v955_v17 = vpop.f32.mrb[3].mxu1  ;;  %v1007_v20 = vadd.f32 %v5777_v12, %v992_v11 }
 0x363   : > { %v1005_v18 = vadd.f32 %v5777_v12, %v990_v14  ;;  %v991_v19 = vmul.f32 %v5776_v9, %v955_v17 }
 0x364   : > { %v1008_v21 = vadd.f32 %v5777_v12, %v993_v16  ;;  %v8547_v27 = vmax.f32 %v1007_v20, 0.0 }
 0x365   : > { %v1006_v22 = vadd.f32 %v5777_v12, %v991_v19  ;;  %v8543_v24 = vmax.f32 %v1005_v18, 0.0 }
 0x366   : > { %v8541_v23 = vmax.f32 %v1008_v21, 0.0 }
 0x367   : > { %v8545_v25 = vmax.f32 %v1006_v22, 0.0  ;;  %v6322_v26 = vpop.f32.mrb[4].mxu1 }
 0x368   : > { %v996_v28 = vmul.f32 %v6322_v26, %v5776_v9  ;;  %v968_v29 = vpop.f32.mrb[5].mxu1  ;;  %v1071_v33 = vpack.c.bf16 %v8541_v23, %v8547_v27 }
 0x369   : > { %v994_v30 = vmul.f32 %v5776_v9, %v968_v29  ;;  %v6323_v31 = vpop.f32.mrb[6].mxu1  ;;  %v1070_v32 = vpack.c.bf16 %v8545_v25, %v8543_v24 }
 0x36a   : > { %v1011_v34 = vadd.f32 %v5777_v12, %v996_v28  ;;  %v997_v35 = vmul.f32 %v6323_v31, %v5776_v9  ;;  %v971_v36 = vpop.f32.mrb[7].mxu1 }
 0x36b   : > { %v1009_v37 = vadd.f32 %v5777_v12, %v994_v30  ;;  %v995_v38 = vmul.f32 %v5776_v9, %v971_v36  ;;  %6340 = vmatprep.mubr.bf16.mxu0 %v1070_v32  ;;  %6364 = vmatprep.mubr.bf16.mxu1 %v1070_v32 }
 0x36c   : > { %v8553_v39 = vmax.f32 %v1011_v34, 0.0  ;;  %v1012_v40 = vadd.f32 %v5777_v12, %v997_v35  ;;  %6341 = vmatmul.mubr.bf16.vlgmr.msra.gmra.mrb[8].mxu0 %v1071_v33  ;;  %6365 = vmatmul.mubr.bf16.vlgmr.msra.gmra.mrb[8].mxu1 %v1071_v33 }
 0x36d   : > { %v8555_v41 = vmax.f32 %v1009_v37, 0.0  ;;  %v1010_v42 = vadd.f32 %v5777_v12, %v995_v38 }
 0x36e   : > { %v8557_v43 = vmax.f32 %v1012_v40, 0.0 }
 0x36f   : > { %v8559_v44 = vmax.f32 %v1010_v42, 0.0 }
 0x370   : > { %v1073_v45 = vpack.c.bf16 %v8557_v43, %v8553_v39 }
 0x371   : > { %v1072_v46 = vpack.c.bf16 %v8559_v44, %v8555_v41 }
 0x373   : > { %6344 = vmatprep.mubr.bf16.mxu0 %v1072_v46  ;;  %6368 = vmatprep.mubr.bf16.mxu1 %v1072_v46 }
 0x374   : > { %6345 = vmatmul.mubr.bf16.gmra.mrb[12].mxu0 %v1073_v45  ;;  %6369 = vmatmul.mubr.bf16.gmra.mrb[12].mxu1 %v1073_v45 }
 0x43f   : > { %v6342_v47 = vpop.f32.mrb[8].mxu0  ;;  %v8565_v48 = vpop.f32.mrb[8].mxu1 }
 0x440   : > { %v1172_v49 = vpop.f32.mrb[9].mxu0  ;;  %v8567_v50 = vpop.f32.mrb[9].mxu1 }
 0x441   : > { %v6343_v51 = vpop.f32.mrb[10].mxu0  ;;  %v8569_v52 = vpop.f32.mrb[10].mxu1 }
 0x442   : > { %v1340_v53 = vpack.c.bf16 %v6343_v51, %v6342_v47  ;;  %v1175_v54 = vpop.f32.mrb[11].mxu0  ;;  %v8571_v55 = vpop.f32.mrb[11].mxu1 }
 0x443   : > { %v1339_v56 = vpack.c.bf16 %v1175_v54, %v1172_v49 }
 0x444   : > { %v1348_v4 = vsel %vm1343_vm4, %v1340_v53, 0 }
 0x445   : > { %6970 = vmatprep.subr.msk.bf16.mxu0 %vm1343_vm4, %v1339_v56  ;;  %6380 = vmatprep.mubr.msk.bf16.mxu0 %vm1343_vm4, %v1339_v56  ;;  %v1345_v57 = vsel %vm1343_vm4, %v1339_v56, 0 }
 0x446   : > { %6974 = vmatprep.subr.msk.bf16.mxu1 %vm1343_vm4, %v1339_v56  ;;  %6373 = vmatpush3.bf16.xpose.msra.mxu0 %v1345_v57 }
 0x447   : > { %6385 = vmatpush3.bf16.xpose.msra.mxu1 %v1345_v57  ;;  %v6346_v58 = vpop.f32.mrb[12].mxu0  ;;  %v8577_v59 = vpop.f32.mrb[12].mxu1  ;;  %6971 = vmatprep.subr.msk.bf16.mxu0 %vm1343_vm4, %v1340_v53 }
 0x448   : > { %6975 = vmatprep.subr.msk.bf16.mxu1 %vm1343_vm4, %v1340_v53  ;;  %v1188_v60 = vpop.f32.mrb[13].mxu0  ;;  %v8581_v61 = vpop.f32.mrb[13].mxu1 }
 0x449   : > { %v6347_v62 = vpop.f32.mrb[14].mxu0  ;;  %v8583_v63 = vpop.f32.mrb[14].mxu1 }
 0x44a   : > { %v1342_v0 = vpack.c.bf16 %v6347_v62, %v6346_v58  ;;  %v1191_v1 = vpop.f32.mrb[15].mxu0  ;;  %v8585_v2 = vpop.f32.mrb[15].mxu1 }
 0x44b   : > { %v1341_v3 = vpack.c.bf16 %v1191_v1, %v1188_v60 }
 0x44c   : > { %v1354_v6 = vsel %vm1343_vm4, %v1342_v0, 0 }
 0x44d   : > { %6392 = vmatprep.mubr.msk.bf16.mxu1 %vm1343_vm4, %v1341_v3  ;;  %v1351_v5 = vsel %vm1343_vm4, %v1341_v3, 0 }
 0x44e   : > { %6375 = vmatpush3.bf16.xpose.msra.mxu0 %v1348_v4 }
 0x44f   : > { %6387 = vmatpush3.bf16.xpose.msra.mxu1 %v1348_v4  ;;  %6972 = vmatprep.subr.msk.bf16.mxu0 %vm1343_vm4, %v1341_v3 }
 0x450   : > { %6976 = vmatprep.subr.msk.bf16.mxu1 %vm1343_vm4, %v1341_v3 }
 0x456   : > { %6377 = vmatpush3.bf16.xpose.msra.mxu0 %v1351_v5 }
 0x457   : > { %6389 = vmatpush3.bf16.xpose.msra.mxu1 %v1351_v5  ;;  %6973 = vmatprep.subr.msk.bf16.mxu0 %vm1343_vm4, %v1342_v0 }
 0x458   : > { %6977 = vmatprep.subr.msk.bf16.mxu1 %vm1343_vm4, %v1342_v0 }
 0x45e   : > { %6379 = vmatpush3.bf16.xpose.msra.mxu0 %v1354_v6 }
 0x45f   : > { %6391 = vmatpush3.bf16.xpose.msra.mxu1 %v1354_v6 }
 0x465   : > { %6381 = vmatmul.mubr.msk.bf16.vlgmr.msra.gmra.mrb[16].mxu0 %vm1343_vm4, %v1340_v53 }
 0x466   : > { %6393 = vmatmul.mubr.msk.bf16.vlgmr.msra.gmra.mrb[16].mxu1 %vm1343_vm4, %v1342_v0 }
 0x538   : > { %v6382_v7 = vpop.f32.mrb[16].mxu0 }
 0x539   : > { %v6394_v8 = vpop.f32.mrb[16].mxu1  ;;  %v1390_v9 = vpop.f32.mrb[17].mxu0  ;;  %v1411_v22 = vsel %vm1053_vm5, %v6382_v7, -inf }
 0x53a   : > { %v1489_v10 = vpop.f32.mrb[17].mxu1  ;;  %v1510_v11 = vsel %vm1053_vm5, %v6394_v8, -inf  ;;  %v6383_v12 = vpop.f32.mrb[18].mxu0  ;;  %v1405_v20 = vsel %vm1053_vm5, %v1390_v9, -inf }
 0x53b   : > { %1511 = vmax.xlane.f32.xlu1 %v1510_v11  ;;  %v6395_v13 = vpop.f32.mrb[18].mxu1  ;;  %v1504_v14 = vsel %vm1053_vm5, %v1489_v10, -inf  ;;  %v1393_v15 = vpop.f32.mrb[19].mxu0  ;;  %v1414_v21 = vsel %vm1053_vm5, %v6383_v12, -inf }
 0x53c   : > { %1505 = vmax.xlane.f32.xlu0 %v1504_v14  ;;  %v1492_v16 = vpop.f32.mrb[19].mxu1  ;;  %v1513_v17 = vsel %vm1053_vm5, %v6395_v13, -inf  ;;  %v1408_v19 = vsel %vm1053_vm5, %v1393_v15, -inf }
 0x53d   : > { %v1507_v18 = vsel %vm1053_vm5, %v1492_v16, -inf }
 0x53f   : > { %1514 = vmax.xlane.f32.xlu1 %v1513_v17 }
 0x540   : > { %1508 = vmax.xlane.f32.xlu0 %v1507_v18 }
 0x543   : > { %1409 = vmax.xlane.f32.xlu1 %v1408_v19 }
 0x544   : > { %1406 = vmax.xlane.f32.xlu0 %v1405_v20 }
 0x547   : > { %1415 = vmax.xlane.f32.xlu1 %v1414_v21 }
 0x548   : > { %1412 = vmax.xlane.f32.xlu0 %v1411_v22 }
 0x5c8   : > { %v1512_v26 = vpop.xlane.xlu1 %1511 }
 0x5c9   : > { %v1518_v28 = vsub.f32 %v6394_v8, %v1512_v26  ;;  %v1506_v29 = vpop.xlane.xlu0 %1505 }
 0x5ca   : > { %v1516_v30 = vsub.f32 %v1489_v10, %v1506_v29 }
 0x5cb   : > { %v1524_v31 = vmul.f32 1.442695, %v1518_v28  ;;  %v5786_v28 = vld [vmem:[#allocation17] ss:$0 sm:$0xff] }
 0x5cc   : > { %v1520_v32 = vmul.f32 1.442695, %v1516_v30  ;;  %v1515_v33 = vpop.xlane.xlu1 %1514 }
 0x5cd   : > { %7298 = vpow2.f32 %v1524_v31  ;;  %v1519_v34 = vsub.f32 %v6395_v13, %v1515_v33  ;;  %v1509_v35 = vpop.xlane.xlu0 %1508  ;;  %v1325_v31 = vadd.f32 %v5786_v28, %v8581_v61  ;;  %v1328_v33 = vadd.f32 %v5786_v28, %v8585_v2 }
 0x5ce   : > { %v1517_v36 = vsub.f32 %v1492_v16, %v1509_v35  ;;  %7300 = vpow2.f32 %v1520_v32 }
 0x5cf   : > { %v1526_v37 = vmul.f32 1.442695, %v1519_v34 }
 0x5d0   : > { %v1522_v38 = vmul.f32 1.442695, %v1517_v36  ;;  %v1410_v40 = vpop.xlane.xlu1 %1409 }
 0x5d1   : > { %7302 = vpow2.f32 %v1526_v37  ;;  %v1418_v42 = vsub.f32 %v1393_v15, %v1410_v40  ;;  %v1407_v45 = vpop.xlane.xlu0 %1406 }
 0x5d2   : > { %7304 = vpow2.f32 %v1522_v38  ;;  %v1417_v46 = vsub.f32 %v1390_v9, %v1407_v45  ;;  %v1333_v45 = vadd.f32 %v8577_v59, %v5786_v28 }
 0x5d3   : > { %v1423_v47 = vmul.f32 1.442695, %v1418_v42 }
 0x5d4   : > { %v1421_v49 = vmul.f32 1.442695, %v1417_v46  ;;  %v1416_v51 = vpop.xlane.xlu1 %1415  ;;  %v1336_v46 = vadd.f32 %v8583_v63, %v5786_v28 }
 0x5d5   : > { %7306 = vpow2.f32 %v1423_v47  ;;  %v1420_v53 = vsub.f32 %v6383_v12, %v1416_v51  ;;  %v1413_v54 = vpop.xlane.xlu0 %1412 }
 0x5d6   : > { %7308 = vpow2.f32 %v1421_v49  ;;  %v1419_v56 = vsub.f32 %v6382_v7, %v1413_v54  ;;  %v1309_v54 = vadd.f32 %v5786_v28, %v8567_v50 }
 0x5d7   : > { %v7299_v57 = vpop.eup %7298  ;;  %v1427_v58 = vmul.f32 1.442695, %v1420_v53 }
 0x5d8   : > { %v1425_v60 = vmul.f32 1.442695, %v1419_v56  ;;  %v1534_v62 = vsel %vm1053_vm5, %v7299_v57, 0.0  ;;  %v7301_v0 = vpop.eup %7300  ;;  %v1312_v56 = vadd.f32 %v5786_v28, %v8571_v55 }
 0x5d9   : > { %7310 = vpow2.f32 %v1427_v58  ;;  %1535 = vadd.xlane.f32.xlu0 %v1534_v62  ;;  %v1528_v4 = vsel %vm1053_vm5, %v7301_v0, 0.0 }
 0x5da   : > { %7312 = vpow2.f32 %v1425_v60 }
 0x5db   : > { %v7303_v1 = vpop.eup %7302 }
 0x5dc   : > { %v7305_v3 = vpop.eup %7304  ;;  %v1545_v5 = vpack.c.bf16 %v7303_v1, %v7299_v57  ;;  %v1537_v11 = vsel %vm1053_vm5, %v7303_v1, 0.0  ;;  %v1320_v1 = vadd.f32 %v8569_v52, %v5786_v28 }
 0x5dd   : > { %1529 = vadd.xlane.f32.xlu0 %v1528_v4  ;;  %v1531_v6 = vsel %vm1053_vm5, %v7305_v3, 0.0  ;;  %v1544_v8 = vpack.c.bf16 %v7305_v3, %v7301_v0  ;;  %v1317_v0 = vadd.f32 %v8565_v48, %v5786_v28 }
 0x5de   : > { %1532 = vadd.xlane.f32.xlu1 %v1531_v6 }
 0x5df   : > { %v7307_v7 = vpop.eup %7306 }
 0x5e0   : > { %v7309_v9 = vpop.eup %7308  ;;  %v1432_v16 = vsel %vm1053_vm5, %v7307_v7, 0.0 }
 0x5e1   : > { %v1429_v10 = vsel %vm1053_vm5, %v7309_v9, 0.0  ;;  %v1445_v12 = vpack.c.bf16 %v7307_v7, %v7309_v9 }
 0x5e2   : > { %1430 = vadd.xlane.f32.xlu0 %v1429_v10  ;;  %1538 = vadd.xlane.f32.xlu1 %v1537_v11 }
 0x5e3   : > { %v7311_v13 = vpop.eup %7310 }
 0x5e4   : > { %v7313_v14 = vpop.eup %7312  ;;  %v1438_v18 = vsel %vm1053_vm5, %v7311_v13, 0.0 }
 0x5e5   : > { %v1435_v15 = vsel %vm1053_vm5, %v7313_v14, 0.0  ;;  %v1446_v17 = vpack.c.bf16 %v7311_v13, %v7313_v14  ;;  %v7218_v13 = vld [vmem:[#allocation19] sm:$0xff]   ;;  %v7219_v14 = vld [vmem:[#allocation19 + $0x8] sm:$0xff]  }
 0x5e6   : > { %1436 = vadd.xlane.f32.xlu0 %v1435_v15  ;;  %1433 = vadd.xlane.f32.xlu1 %v1432_v16  ;;  %v7220_v15 = vld [vmem:[#allocation19 + $0x10] sm:$0xff]   ;;  %v7221_v16 = vld [vmem:[#allocation19 + $0x18] sm:$0xff]  }
 0x5ea   : > { %1439 = vadd.xlane.f32.xlu1 %v1438_v18 }
 0x613   : > { %1554 = vxpose.xlu0.c.b16.start [1/2] (short) (narrow) %v1544_v8, 64 }
 0x617   : > { %1555 = vxpose.xlu0.c.b16.end [2/2] (short) (narrow) %v1545_v5, 64  ;;  %1647 = vxpose.xlu1.c.b16.start [1/2] (short) (narrow) %v1445_v12, 64  ;;  %v8001_v12 = vmov 0  }
 0x61b   : > { %1648 = vxpose.xlu1.c.b16.end [2/2] (short) (narrow) %v1446_v17, 64  ;;  %v7222_v17 = vld [vmem:[#allocation19 + $0x20] sm:$0xff]  }
 0x61f   : > { %7193 = vset.pattern.permute.xlu1 %v8001_v12 }
 0x620   : > { %7192 = vset.pattern.permute.xlu0 %v8001_v12 }
 0x666   : > { %v1536_v19 = vpop.xlane.xlu0 %1535 }
 0x66a   : > { %v1530_v20 = vpop.xlane.xlu0 %1529 }
 0x66b   : > { %7314 = vrcp.f32 %v1530_v20  ;;  %v1533_v21 = vpop.xlane.xlu1 %1532 }
 0x66c   : > { %7316 = vrcp.f32 %v1533_v21 }
 0x66d   : > { %7318 = vrcp.f32 %v1536_v19 }
 0x66f   : > { %v1431_v22 = vpop.xlane.xlu0 %1430  ;;  %v1539_v26 = vpop.xlane.xlu1 %1538 }
 0x670   : > { %7320 = vrcp.f32 %v1539_v26 }
 0x671   : > { %7322 = vrcp.f32 %v1431_v22 }
 0x673   : > { %v1437_v29 = vpop.xlane.xlu0 %1436  ;;  %v1434_v30 = vpop.xlane.xlu1 %1433 }
 0x674   : > { %7324 = vrcp.f32 %v1434_v30 }
 0x675   : > { %v7315_v32 = vpop.eup %7314  ;;  %7326 = vrcp.f32 %v1437_v29 }
 0x676   : > { %v7317_v34 = vpop.eup %7316  ;;  %v1546_v35 = vmul.f32 %v7315_v32, %v1325_v31 }
 0x677   : > { %v1440_v36 = vpop.xlane.xlu1 %1439  ;;  %v1547_v37 = vmul.f32 %v7317_v34, %v1328_v33  ;;  %v7319_v38 = vpop.eup %7318  ;;  %v1552_v48 = vpack.c.bf16 %v7317_v34, %v7315_v32 }
 0x678   : > { %7328 = vrcp.f32 %v1440_v36  ;;  %v1548_v2 = vmul.f32 %v7319_v38, %v1333_v45 }
 0x679   : > { %v1550_v40 = vpack.c.bf16 %v1547_v37, %v1546_v35  ;;  %v1562_v42 = vpop.trf.xlu0 }
 0x67a   : > { %6400 = vmatprep.mubr.msk.bf16.mxu0 %vm1343_vm4, %v1562_v42  ;;  %v7321_v61 = vpop.eup %7320 }
 0x67b   : > { %6396 = vmatprep.subr.bf16.mxu0 %v1550_v40  ;;  %v1549_v47 = vmul.f32 %v7321_v61, %v1336_v46  ;;  %v7323_v49 = vpop.eup %7322  ;;  %v1553_v11 = vpack.c.bf16 %v7321_v61, %v7319_v38 }
 0x67c   : > { %6397 = vmatpush3.bf16.msra.mxu0 %v1550_v40  ;;  %v1447_v60 = vmul.f32 %v7323_v49, %v1309_v54 }
 0x67d   : > { %v1563_v51 = vpop.trf.xlu0  ;;  %v1655_v53 = vpop.trf.xlu1  ;;  %v1551_v57 = vpack.c.bf16 %v1549_v47, %v1548_v2 }
 0x67e   : > { %6436 = vmatprep.mubr.msk.bf16.mxu1 %vm1343_vm4, %v1655_v53  ;;  %v7325_v59 = vpop.eup %7324 }
 0x67f   : > { %v7327_v58 = vpop.eup %7326  ;;  %6398 = vmatprep.subr.bf16.mxu0 %v1551_v57  ;;  %v1453_v63 = vpack.c.bf16 %v7325_v59, %v7323_v49  ;;  %v1448_v62 = vmul.f32 %v7325_v59, %v1312_v56 }
 0x680   : > { %6399 = vmatpush3.bf16.msra.mxu0 %v1551_v57  ;;  %v1449_v5 = vmul.f32 %v7327_v58, %v1317_v0 }
 0x681   : > { %6432 = vmatprep.subr.bf16.mxu1 %v1453_v63  ;;  %v1451_v4 = vpack.c.bf16 %v1448_v62, %v1447_v60  ;;  %v1564_v55 = vpop.trf.xlu0  ;;  %v1656_v8 = vpop.trf.xlu1 }
 0x682   : > { %v7329_v3 = vpop.eup %7328  ;;  %6433 = vmatpush3.bf16.msra.mxu1 %v1453_v63 }
 0x683   : > { %v1454_v50 = vpack.c.bf16 %v7329_v3, %v7327_v58  ;;  %v1450_v6 = vmul.f32 %v7329_v3, %v1320_v1  ;;  %6401 = vmatmul.mubr.msk.bf16.vlgmr.msra.gmra.mrb[20].mxu0 %vm1343_vm4, %v1563_v51  ;;  %6408 = vmatprep.subr.bf16.mxu0 %v1451_v4 }
 0x684   : > { %6409 = vmatpush3.bf16.msra.mxu0 %v1451_v4  ;;  %6404 = vmatprep.mubr.msk.bf16.mxu0 %vm1343_vm4, %v1564_v55 }
 0x685   : > { %6434 = vmatprep.subr.bf16.mxu1 %v1454_v50  ;;  %v1452_v7 = vpack.c.bf16 %v1450_v6, %v1449_v5  ;;  %v1565_v52 = vpop.trf.xlu0  ;;  %v1657_v9 = vpop.trf.xlu1  ;;  %v7223_v6 = vld [vmem:[#allocation19 + $0x28] sm:$0xff]  }
 0x686   : > { %6435 = vmatpush3.bf16.msra.mxu1 %v1454_v50 }
 0x687   : > { %6410 = vmatprep.subr.bf16.mxu0 %v1452_v7 }
 0x688   : > { %6411 = vmatpush3.bf16.msra.mxu0 %v1452_v7  ;;  %v7224_v7 = vld [vmem:[#allocation19 + $0x30] sm:$0xff]  }
 0x689   : > { %6420 = vmatprep.subr.bf16.mxu0 %v1552_v48  ;;  %6437 = vmatmul.mubr.msk.bf16.vlgmr.msra.gmra.mrb[20].mxu1 %vm1343_vm4, %v1656_v8  ;;  %v1658_v10 = vpop.trf.xlu1 }
 0x68a   : > { %6440 = vmatprep.mubr.msk.bf16.mxu1 %vm1343_vm4, %v1657_v9 }
 0x68b   : > { %6405 = vmatmul.mubr.msk.bf16.gmra.mrb[24].mxu0 %vm1343_vm4, %v1565_v52 }
 0x68c   : > { %6412 = vmatprep.mubr.msk.bf16.mxu0 %vm1343_vm4, %v1655_v53 }
 0x691   : > { %6441 = vmatmul.mubr.msk.bf16.gmra.mrb[24].mxu1 %vm1343_vm4, %v1658_v10 }
 0x693   : > { %6413 = vmatmul.mubr.msk.bf16.vlgmr.msra.gmra.mrb[20].mxu0 %vm1343_vm4, %v1656_v8 }
 0x694   : > { %6421 = vmatpush3.bf16.msra.mxu0 %v1552_v48  ;;  %6416 = vmatprep.mubr.msk.bf16.mxu0 %vm1343_vm4, %v1657_v9  ;;  %v7225_v9 = vld [vmem:[#allocation19 + $0x38] sm:$0xff]  }
 0x695   : > { %6422 = vmatprep.subr.bf16.mxu0 %v1553_v11 }
 0x698   : > { %6423 = vmatpush3.bf16.msra.mxu0 %v1553_v11 }
 0x699   : > { %6444 = vmatprep.subr.bf16.mxu0 %v7218_v13 }
 0x69b   : > { %6417 = vmatmul.mubr.msk.bf16.gmra.mrb[24].mxu0 %vm1343_vm4, %v1658_v10 }
 0x69c   : > { %6424 = vmatprep.mubr.msk.bf16.mxu0 %vm1343_vm4, %v1562_v42 }
 0x6a3   : > { %6425 = vmatmul.mubr.msk.bf16.vlgmr.msra.gmra.mrb[28].mxu0 %vm1343_vm4, %v1563_v51 }
 0x6a4   : > { %6428 = vmatprep.mubr.msk.bf16.mxu0 %vm1343_vm4, %v1564_v55  ;;  %6445 = vmatpush3.bf16.msra.mxu0 %v7218_v13  ;;  %v7226_v13 = vld [vmem:[#allocation14 + $0x40] sm:$0xff]  }
 0x6a5   : > { %6446 = vmatprep.subr.bf16.mxu0 %v7219_v14  ;;  %6468 = vmatprep.subr.bf16.mxu1 %v7226_v13 }
 0x6a6   : > { %6469 = vmatpush3.bf16.msra.mxu1 %v7226_v13 }
 0x6a8   : > { %6447 = vmatpush3.bf16.msra.mxu0 %v7219_v14  ;;  %v7227_v14 = vld [vmem:[#allocation16 + $0x40] sm:$0xff]  }
 0x6a9   : > { %6448 = vmatprep.subr.bf16.mxu0 %v7220_v15 }
 0x6ab   : > { %6429 = vmatmul.mubr.msk.bf16.gmra.mrb[32].mxu0 %vm1343_vm4, %v1565_v52 }
 0x6ac   : > { %6449 = vmatpush3.bf16.msra.mxu0 %v7220_v15  ;;  %v7228_v15 = vld [vmem:[#allocation14 + $0x48] sm:$0xff]  }
 0x6ad   : > { %6450 = vmatprep.subr.bf16.mxu0 %v7221_v16  ;;  %6470 = vmatprep.subr.bf16.mxu1 %v7228_v15 }
 0x6ae   : > { %6471 = vmatpush3.bf16.msra.mxu1 %v7228_v15 }
 0x6b0   : > { %6451 = vmatpush3.bf16.msra.mxu0 %v7221_v16  ;;  %v7230_v16 = vld [vmem:[#allocation14 + $0x50] sm:$0xff]  }
 0x6b1   : > { %6452 = vmatprep.subr.bf16.mxu0 %v7222_v17  ;;  %6472 = vmatprep.subr.bf16.mxu1 %v7230_v16 }
 0x6b2   : > { %6473 = vmatpush3.bf16.msra.mxu1 %v7230_v16 }
 0x6b4   : > { %6453 = vmatpush3.bf16.msra.mxu0 %v7222_v17  ;;  %v7232_v17 = vld [vmem:[#allocation14 + $0x58] sm:$0xff]  }
 0x6b5   : > { %6454 = vmatprep.subr.bf16.mxu0 %v7223_v6  ;;  %6474 = vmatprep.subr.bf16.mxu1 %v7232_v17 }
 0x6b6   : > { %6475 = vmatpush3.bf16.msra.mxu1 %v7232_v17 }
 0x6b8   : > { %6455 = vmatpush3.bf16.msra.mxu0 %v7223_v6 }
 0x6b9   : > { %6456 = vmatprep.subr.bf16.mxu0 %v7224_v7 }
 0x6bc   : > { %6457 = vmatpush3.bf16.msra.mxu0 %v7224_v7  ;;  %v5825_v7 = vld [vmem:[#allocation23] ss:$0 sm:$0xff] }
 0x6bd   : > { %6458 = vmatprep.subr.bf16.mxu0 %v7225_v9 }
 0x6c0   : > { %6459 = vmatpush3.bf16.msra.mxu0 %v7225_v9 }
 0x6c1   : > { %6492 = vmatprep.subr.bf16.mxu0 %v7227_v14 }
 0x75c   : > { %v6438_v18 = vpop.f32.mrb[20].mxu1 }
 0x75d   : > { %v1839_v19 = vpop.f32.mrb[21].mxu1 }
 0x75e   : > { %v6439_v20 = vpop.f32.mrb[22].mxu1 }
 0x75f   : > { %v1842_v21 = vpop.f32.mrb[23].mxu1 }
 0x764   : > { %v6442_v22 = vpop.f32.mrb[24].mxu1 }
 0x765   : > { %v1855_v26 = vpop.f32.mrb[25].mxu1 }
 0x766   : > { %v8637_v28 = vpop.f32.mrb[20].mxu0  ;;  %v6443_v29 = vpop.f32.mrb[26].mxu1 }
 0x767   : > { %v8639_v30 = vpop.f32.mrb[21].mxu0  ;;  %v1858_v31 = vpop.f32.mrb[27].mxu1 }
 0x768   : > { %v8641_v32 = vpop.f32.mrb[22].mxu0 }
 0x769   : > { %v8643_v33 = vpop.f32.mrb[23].mxu0 }
 0x76e   : > { %v8645_v34 = vpop.f32.mrb[24].mxu0 }
 0x76f   : > { %v8647_v35 = vpop.f32.mrb[25].mxu0 }
 0x770   : > { %v8649_v36 = vpop.f32.mrb[26].mxu0 }
 0x771   : > { %v8651_v37 = vpop.f32.mrb[27].mxu0 }
 0x776   : > { %v6426_v38 = vpop.f32.mrb[28].mxu0 }
 0x777   : > { %v1848_v40 = vadd.f32 %v6438_v18, %v6426_v38  ;;  %v1774_v42 = vpop.f32.mrb[29].mxu0 }
 0x778   : > { %v1840_v45 = vadd.f32 %v1839_v19, %v1774_v42  ;;  %v6427_v46 = vpop.f32.mrb[30].mxu0 }
 0x779   : > { %v1872_v61 = vadd.f32 1e-09, %v1848_v40  ;;  %v1851_v2 = vadd.f32 %v6439_v20, %v6427_v46  ;;  %v1777_v47 = vpop.f32.mrb[31].mxu0 }
 0x77a   : > { %v1870_v49 = vadd.f32 1e-09, %v1840_v45  ;;  %v1843_v51 = vadd.f32 %v1842_v21, %v1777_v47 }
 0x77b   : > { %7330 = vrcp.f32 %v1872_v61  ;;  %v1873_v56 = vadd.f32 1e-09, %v1851_v2 }
 0x77c   : > { %7332 = vrcp.f32 %v1870_v49  ;;  %v1871_v53 = vadd.f32 1e-09, %v1843_v51  ;;  %v7229_v49 = vld [vmem:[#allocation16 + $0x48] sm:$0xff]  }
 0x77e   : > { %7334 = vrcp.f32 %v1871_v53  ;;  %v6430_v54 = vpop.f32.mrb[32].mxu0 }
 0x77f   : > { %v1864_v57 = vadd.f32 %v6442_v22, %v6430_v54  ;;  %v1790_v59 = vpop.f32.mrb[33].mxu0  ;;  %7336 = vrcp.f32 %v1873_v56 }
 0x780   : > { %v1856_v58 = vadd.f32 %v1855_v26, %v1790_v59  ;;  %v6431_v63 = vpop.f32.mrb[34].mxu0 }
 0x781   : > { %v1867_v60 = vadd.f32 %v6443_v29, %v6431_v63  ;;  %v1793_v62 = vpop.f32.mrb[35].mxu0  ;;  %v1876_v3 = vadd.f32 1e-09, %v1864_v57  ;;  %v7233_v63 = vld [vmem:[#allocation16 + $0x58] sm:$0xff]  }
 0x782   : > { %v1874_v0 = vadd.f32 1e-09, %v1856_v58  ;;  %v1859_v1 = vadd.f32 %v1858_v31, %v1793_v62  ;;  %v7237_v62 = vld [vmem:[#allocation16 + $0x68] sm:$0xff]  }
 0x783   : > { %v1877_v5 = vadd.f32 1e-09, %v1867_v60  ;;  %v7235_v60 = vld [vmem:[#allocation16 + $0x60] sm:$0xff]  }
 0x784   : > { %7338 = vrcp.f32 %v1874_v0  ;;  %v1875_v4 = vadd.f32 1e-09, %v1859_v1  ;;  %v7238_v0 = vld [vmem:[#allocation14 + $0x70] sm:$0xff]  }
 0x785   : > { %v7331_v50 = vpop.eup %7330  ;;  %v7239_v1 = vld [vmem:[#allocation16 + $0x70] sm:$0xff]  }
 0x786   : > { %v7333_v55 = vpop.eup %7332  ;;  %7340 = vrcp.f32 %v1875_v4  ;;  %1898 = vperm.xlu1 %7193, %v7331_v50   ;;  %v7241_v4 = vld [vmem:[#allocation16 + $0x78] sm:$0xff]   ;;  %v5815_v50 = vld [vmem:[#allocation20] ss:$0 sm:$0xff] }
 0x787   : > { %1888 = vperm.xlu0 %7192, %v7333_v55   ;;  %7342 = vrcp.f32 %v1876_v3  ;;  %v7240_v3 = vld [vmem:[#allocation14 + $0x78] sm:$0xff]  }
 0x788   : > { %v7335_v8 = vpop.eup %7334  ;;  %7344 = vrcp.f32 %v1877_v5  ;;  %v5824_v5 = vld [vmem:[#allocation22] ss:$0 sm:$0xff] }
 0x789   : > { %v7337_v48 = vpop.eup %7336 }
 0x78a   : > { %1893 = vperm.xlu1 %7193, %v7335_v8  }
 0x78e   : > { %v7339_v52 = vpop.eup %7338  ;;  %1903 = vperm.xlu1 %7193, %v7337_v48  }
 0x78f   : > { %1908 = vperm.xlu0 %7192, %v7339_v52  }
 0x790   : > { %v7341_v10 = vpop.eup %7340 }
 0x791   : > { %v7343_v11 = vpop.eup %7342 }
 0x792   : > { %1913 = vperm.xlu1 %7193, %v7341_v10   ;;  %v7345_v12 = vpop.eup %7344 }
 0x793   : > { %1918 = vperm.xlu0 %7192, %v7343_v11  }
 0x796   : > { %1923 = vperm.xlu1 %7193, %v7345_v12  }
 0x805   : > { %v1899_v18 = vpop.permute.xlu1 %1898 }
 0x806   : > { %v1889_v19 = vpop.permute.xlu0 %1888  ;;  %v1928_v26 = vmul.f32 %v8637_v28, %v1899_v18 }
 0x807   : > { %v1926_v20 = vmul.f32 %v1889_v19, %v8639_v30 }
 0x808   : > { %v1936_v46 = vsub.f32 %v8547_v27, %v1928_v26 }
 0x809   : > { %v1894_v21 = vpop.permute.xlu1 %1893  ;;  %v1934_v29 = vsub.f32 %v8543_v24, %v1926_v20 }
 0x80a   : > { %v1927_v22 = vmul.f32 %v1894_v21, %v8643_v33 }
 0x80c   : > { %v1935_v31 = vsub.f32 %v8545_v25, %v1927_v22 }
 0x80d   : > { %v1904_v38 = vpop.permute.xlu1 %1903 }
 0x80e   : > { %v1929_v40 = vmul.f32 %v8641_v32, %v1904_v38  ;;  %v1909_v42 = vpop.permute.xlu0 %1908  ;;  %v1942_v45 = vpack.c.bf16 %v1935_v31, %v1934_v29 }
 0x80f   : > { %v1930_v30 = vmul.f32 %v1909_v42, %v8647_v35  ;;  %v7231_v35 = vld [vmem:[#allocation16 + $0x50] sm:$0xff]  }
 0x810   : > { %v1937_v61 = vsub.f32 %v8541_v23, %v1929_v40  ;;  %6460 = vmatprep.mubr.bf16.mxu0 %v1942_v45 }
 0x811   : > { %v1914_v2 = vpop.permute.xlu1 %1913  ;;  %v1938_v51 = vsub.f32 %v8555_v41, %v1930_v30 }
 0x812   : > { %v1943_v33 = vpack.c.bf16 %v1937_v61, %v1936_v46  ;;  %v1931_v28 = vmul.f32 %v1914_v2, %v8651_v37  ;;  %v1919_v47 = vpop.permute.xlu0 %1918 }
 0x813   : > { %v1932_v32 = vmul.f32 %v8645_v34, %v1919_v47  ;;  %v7234_v34 = vld [vmem:[#allocation14 + $0x60] sm:$0xff]  }
 0x814   : > { %v1939_v53 = vsub.f32 %v8559_v44, %v1931_v28  ;;  %6461 = vmatmul.mubr.bf16.vlgmr.msra.gmra.mrb[36].mxu0 %v1943_v33  ;;  %6476 = vmatprep.subr.bf16.mxu1 %v7234_v34 }
 0x815   : > { %v1924_v54 = vpop.permute.xlu1 %1923  ;;  %6493 = vmatpush3.bf16.msra.mxu0 %v7227_v14  ;;  %v1940_v59 = vsub.f32 %v8553_v39, %v1932_v32  ;;  %6477 = vmatpush3.bf16.msra.mxu1 %v7234_v34 }
 0x816   : > { %v1933_v56 = vmul.f32 %v8649_v36, %v1924_v54  ;;  %v1944_v57 = vpack.c.bf16 %v1939_v53, %v1938_v51  ;;  %6494 = vmatprep.subr.bf16.mxu0 %v7229_v49  ;;  %v7236_v36 = vld [vmem:[#allocation14 + $0x68] sm:$0xff]  }
 0x817   : > { %6478 = vmatprep.subr.bf16.mxu1 %v7236_v36 }
 0x818   : > { %v1941_v37 = vsub.f32 %v8557_v43, %v1933_v56  ;;  %6464 = vmatprep.mubr.bf16.mxu0 %v1944_v57 }
 0x819   : > { %6495 = vmatpush3.bf16.msra.mxu0 %v7229_v49  ;;  %6479 = vmatpush3.bf16.msra.mxu1 %v7236_v36 }
 0x81a   : > { %v1945_v58 = vpack.c.bf16 %v1941_v37, %v1940_v59  ;;  %6496 = vmatprep.subr.bf16.mxu0 %v7231_v35  ;;  %6480 = vmatprep.subr.bf16.mxu1 %v7238_v0 }
 0x81c   : > { %6465 = vmatmul.mubr.bf16.gmra.mrb[40].mxu0 %v1945_v58 }
 0x81d   : > { %6497 = vmatpush3.bf16.msra.mxu0 %v7231_v35  ;;  %6481 = vmatpush3.bf16.msra.mxu1 %v7238_v0 }
 0x81e   : > { %6498 = vmatprep.subr.bf16.mxu0 %v7233_v63  ;;  %6482 = vmatprep.subr.bf16.mxu1 %v7240_v3 }
 0x821   : > { %6499 = vmatpush3.bf16.msra.mxu0 %v7233_v63  ;;  %6483 = vmatpush3.bf16.msra.mxu1 %v7240_v3 }
 0x822   : > { %6500 = vmatprep.subr.bf16.mxu0 %v7235_v60 }
 0x825   : > { %6501 = vmatpush3.bf16.msra.mxu0 %v7235_v60 }
 0x826   : > { %6502 = vmatprep.subr.bf16.mxu0 %v7237_v62 }
 0x829   : > { %6503 = vmatpush3.bf16.msra.mxu0 %v7237_v62 }
 0x82a   : > { %6504 = vmatprep.subr.bf16.mxu0 %v7239_v1 }
 0x82d   : > { %6505 = vmatpush3.bf16.msra.mxu0 %v7239_v1 }
 0x82e   : > { %6506 = vmatprep.subr.bf16.mxu0 %v7241_v4 }
 0x831   : > { %6507 = vmatpush3.bf16.msra.mxu0 %v7241_v4 }
 0x8e7   : > { %v6462_v55 = vpop.f32.mrb[36].mxu0 }
 0x8e8   : > { %v2060_v6 = vadd.f32 %v6462_v55, %v5815_v50  ;;  %v2051_v8 = vpop.f32.mrb[37].mxu0 }
 0x8e9   : > { %v2052_v48 = vadd.f32 %v5815_v50, %v2051_v8  ;;  %v6463_v52 = vpop.f32.mrb[38].mxu0 }
 0x8ea   : > { %v2091_v9 = vmul.f32 %v5824_v5, %v2060_v6  ;;  %v2063_v10 = vadd.f32 %v6463_v52, %v5815_v50  ;;  %v2054_v11 = vpop.f32.mrb[39].mxu0 }
 0x8eb   : > { %v2089_v12 = vmul.f32 %v5824_v5, %v2052_v48  ;;  %v2055_v13 = vadd.f32 %v5815_v50, %v2054_v11 }
 0x8ec   : > { %v2106_v14 = vadd.f32 %v5825_v7, %v2091_v9  ;;  %v2092_v15 = vmul.f32 %v5824_v5, %v2063_v10 }
 0x8ed   : > { %v2104_v16 = vadd.f32 %v5825_v7, %v2089_v12  ;;  %v2090_v17 = vmul.f32 %v5824_v5, %v2055_v13 }
 0x8ee   : > { %v2107_v18 = vadd.f32 %v5825_v7, %v2092_v15  ;;  %v2114_v22 = vmax.f32 %v2106_v14, 0.0 }
 0x8ef   : > { %v2112_v19 = vmax.f32 %v2104_v16, 0.0  ;;  %v2105_v20 = vadd.f32 %v5825_v7, %v2090_v17  ;;  %v6466_v21 = vpop.f32.mrb[40].mxu0 }
 0x8f0   : > { %v2115_v26 = vmax.f32 %v2107_v18, 0.0  ;;  %v2076_v29 = vadd.f32 %v6466_v21, %v5815_v50  ;;  %v2067_v31 = vpop.f32.mrb[41].mxu0  ;;  %v8679_v49 = vadd.f32 %v2114_v22, %v8547_v27 }
 0x8f1   : > { %v2113_v38 = vmax.f32 %v2105_v20, 0.0  ;;  %v2068_v40 = vadd.f32 %v5815_v50, %v2067_v31  ;;  %v6467_v42 = vpop.f32.mrb[42].mxu0  ;;  %v8673_v2 = vadd.f32 %v2112_v19, %v8543_v24 }
 0x8f2   : > { %v8670_v45 = vadd.f32 %v2115_v26, %v8541_v23  ;;  %v2095_v46 = vmul.f32 %v5824_v5, %v2076_v29  ;;  %v2079_v61 = vadd.f32 %v6467_v42, %v5815_v50  ;;  %v2070_v30 = vpop.f32.mrb[43].mxu0 }
 0x8f3   : > { %v8676_v33 = vadd.f32 %v2113_v38, %v8545_v25  ;;  %v2093_v28 = vmul.f32 %v5824_v5, %v2068_v40  ;;  %v2071_v47 = vadd.f32 %v5815_v50, %v2070_v30 }
 0x8f4   : > { %v2110_v51 = vadd.f32 %v5825_v7, %v2095_v46  ;;  %v2096_v53 = vmul.f32 %v5824_v5, %v2079_v61  ;;  %v2177_v35 = vpack.c.bf16 %v8670_v45, %v8679_v49 }
 0x8f5   : > { %v2108_v32 = vadd.f32 %v5825_v7, %v2093_v28  ;;  %v2094_v54 = vmul.f32 %v5824_v5, %v2071_v47  ;;  %v2176_v56 = vpack.c.bf16 %v8676_v33, %v8673_v2 }
 0x8f6   : > { %v2111_v57 = vadd.f32 %v5825_v7, %v2096_v53  ;;  %v2118_v58 = vmax.f32 %v2110_v51, 0.0 }
 0x8f7   : > { %v2116_v59 = vmax.f32 %v2108_v32, 0.0  ;;  %v2109_v37 = vadd.f32 %v5825_v7, %v2094_v54  ;;  %6484 = vmatprep.mubr.bf16.mxu1 %v2176_v56  ;;  %6508 = vmatprep.mubr.bf16.mxu0 %v2176_v56 }
 0x8f8   : > { %v2119_v63 = vmax.f32 %v2111_v57, 0.0  ;;  %6485 = vmatmul.mubr.bf16.vlgmr.msra.gmra.mrb[28].mxu1 %v2177_v35  ;;  %6509 = vmatmul.mubr.bf16.vlgmr.msra.gmra.mrb[44].mxu0 %v2177_v35  ;;  %v8695_v0 = vadd.f32 %v2118_v58, %v8553_v39 }
 0x8f9   : > { %v2117_v34 = vmax.f32 %v2109_v37, 0.0  ;;  %v8689_v36 = vadd.f32 %v2116_v59, %v8555_v41 }
 0x8fa   : > { %v8686_v60 = vadd.f32 %v2119_v63, %v8557_v43 }
 0x8fb   : > { %v8692_v62 = vadd.f32 %v2117_v34, %v8559_v44 }
 0x8fc   : > { %v2179_v3 = vpack.c.bf16 %v8686_v60, %v8695_v0 }
 0x8fd   : > { %v2178_v1 = vpack.c.bf16 %v8692_v62, %v8689_v36 }
 0x8ff   : > { %6488 = vmatprep.mubr.bf16.mxu1 %v2178_v1  ;;  %6512 = vmatprep.mubr.bf16.mxu0 %v2178_v1 }
 0x900   : > { %6489 = vmatmul.mubr.bf16.gmra.mrb[32].mxu1 %v2179_v3  ;;  %6513 = vmatmul.mubr.bf16.gmra.mrb[48].mxu0 %v2179_v3 }
 0x9cb   : > { %v6486_v4 = vpop.f32.mrb[28].mxu1  ;;  %v8701_v50 = vpop.f32.mrb[44].mxu0 }
 0x9cc   : > { %v2279_v55 = vpop.f32.mrb[29].mxu1  ;;  %v8703_v5 = vpop.f32.mrb[45].mxu0 }
 0x9cd   : > { %v6487_v6 = vpop.f32.mrb[30].mxu1  ;;  %v8705_v8 = vpop.f32.mrb[46].mxu0 }
 0x9ce   : > { %v2449_v7 = vpack.c.bf16 %v6487_v6, %v6486_v4  ;;  %v2282_v48 = vpop.f32.mrb[31].mxu1  ;;  %v8707_v52 = vpop.f32.mrb[47].mxu0 }
 0x9cf   : > { %v2448_v9 = vpack.c.bf16 %v2282_v48, %v2279_v55 }
 0x9d0   : > { %v2456_v21 = vsel %vm1343_vm4, %v2449_v7, 0 }
 0x9d1   : > { %6978 = vmatprep.subr.msk.bf16.mxu1 %vm1343_vm4, %v2448_v9  ;;  %6524 = vmatprep.mubr.msk.bf16.mxu1 %vm1343_vm4, %v2448_v9  ;;  %v2453_v10 = vsel %vm1343_vm4, %v2448_v9, 0 }
 0x9d2   : > { %6982 = vmatprep.subr.msk.bf16.mxu0 %vm1343_vm4, %v2448_v9  ;;  %6517 = vmatpush3.bf16.xpose.msra.mxu1 %v2453_v10 }
 0x9d3   : > { %6529 = vmatpush3.bf16.xpose.msra.mxu0 %v2453_v10  ;;  %v6490_v11 = vpop.f32.mrb[32].mxu1  ;;  %v8713_v12 = vpop.f32.mrb[48].mxu0  ;;  %6979 = vmatprep.subr.msk.bf16.mxu1 %vm1343_vm4, %v2449_v7 }
 0x9d4   : > { %6983 = vmatprep.subr.msk.bf16.mxu0 %vm1343_vm4, %v2449_v7  ;;  %v2295_v13 = vpop.f32.mrb[33].mxu1  ;;  %v8717_v14 = vpop.f32.mrb[49].mxu0 }
 0x9d5   : > { %v6491_v15 = vpop.f32.mrb[34].mxu1  ;;  %v8719_v16 = vpop.f32.mrb[50].mxu0 }
 0x9d6   : > { %v2451_v17 = vpack.c.bf16 %v6491_v15, %v6490_v11  ;;  %v2298_v18 = vpop.f32.mrb[35].mxu1  ;;  %v8721_v19 = vpop.f32.mrb[51].mxu0 }
 0x9d7   : > { %v2450_v20 = vpack.c.bf16 %v2298_v18, %v2295_v13 }
 0x9d8   : > { %v2462_v26 = vsel %vm1343_vm4, %v2451_v17, 0 }
 0x9d9   : > { %6536 = vmatprep.mubr.msk.bf16.mxu0 %vm1343_vm4, %v2450_v20  ;;  %v2459_v22 = vsel %vm1343_vm4, %v2450_v20, 0 }
 0x9da   : > { %6519 = vmatpush3.bf16.xpose.msra.mxu1 %v2456_v21 }
 0x9db   : > { %6531 = vmatpush3.bf16.xpose.msra.mxu0 %v2456_v21  ;;  %6980 = vmatprep.subr.msk.bf16.mxu1 %vm1343_vm4, %v2450_v20 }
 0x9dc   : > { %6984 = vmatprep.subr.msk.bf16.mxu0 %vm1343_vm4, %v2450_v20 }
 0x9e2   : > { %6521 = vmatpush3.bf16.xpose.msra.mxu1 %v2459_v22 }
 0x9e3   : > { %6533 = vmatpush3.bf16.xpose.msra.mxu0 %v2459_v22  ;;  %6981 = vmatprep.subr.msk.bf16.mxu1 %vm1343_vm4, %v2451_v17 }
 0x9e4   : > { %6985 = vmatprep.subr.msk.bf16.mxu0 %vm1343_vm4, %v2451_v17 }
 0x9ea   : > { %6523 = vmatpush3.bf16.xpose.msra.mxu1 %v2462_v26 }
 0x9eb   : > { %6535 = vmatpush3.bf16.xpose.msra.mxu0 %v2462_v26 }
 0x9f1   : > { %6525 = vmatmul.mubr.msk.bf16.vlgmr.msra.gmra.mrb[36].mxu1 %vm1343_vm4, %v2449_v7 }
 0x9f2   : > { %6537 = vmatmul.mubr.msk.bf16.vlgmr.msra.gmra.mrb[52].mxu0 %vm1343_vm4, %v2451_v17 }
 0xac4   : > { %v6526_v29 = vpop.f32.mrb[36].mxu1 }
 0xac5   : > { %v6538_v31 = vpop.f32.mrb[52].mxu0  ;;  %v2498_v38 = vpop.f32.mrb[37].mxu1  ;;  %v2519_v57 = vsel %vm1053_vm5, %v6526_v29, -inf }
 0xac6   : > { %v2597_v40 = vpop.f32.mrb[53].mxu0  ;;  %v6527_v42 = vpop.f32.mrb[38].mxu1  ;;  %v2618_v51 = vsel %vm1053_vm5, %v6538_v31, -inf  ;;  %v2513_v56 = vsel %vm1053_vm5, %v2498_v38, -inf }
 0xac7   : > { %v6539_v46 = vpop.f32.mrb[54].mxu0  ;;  %v2612_v61 = vsel %vm1053_vm5, %v2597_v40, -inf  ;;  %v2501_v30 = vpop.f32.mrb[39].mxu1  ;;  %v2522_v54 = vsel %vm1053_vm5, %v6527_v42, -inf }
 0xac8   : > { %2613 = vmax.xlane.f32.xlu0 %v2612_v61  ;;  %v2600_v28 = vpop.f32.mrb[55].mxu0  ;;  %v2516_v53 = vsel %vm1053_vm5, %v2501_v30, -inf  ;;  %v2621_v32 = vsel %vm1053_vm5, %v6539_v46, -inf }
 0xac9   : > { %v2615_v47 = vsel %vm1053_vm5, %v2600_v28, -inf }
 0xaca   : > { %2616 = vmax.xlane.f32.xlu1 %v2615_v47 }
 0xacc   : > { %2619 = vmax.xlane.f32.xlu0 %v2618_v51 }
 0xace   : > { %2517 = vmax.xlane.f32.xlu1 %v2516_v53 }
 0xad0   : > { %2622 = vmax.xlane.f32.xlu0 %v2621_v32 }
 0xad2   : > { %2523 = vmax.xlane.f32.xlu1 %v2522_v54 }
 0xad4   : > { %2514 = vmax.xlane.f32.xlu0 %v2513_v56 }
 0xad8   : > { %2520 = vmax.xlane.f32.xlu0 %v2519_v57 }
 0xb55   : > { %v2614_v35 = vpop.xlane.xlu0 %2613 }
 0xb56   : > { %v2624_v59 = vsub.f32 %v2597_v40, %v2614_v35 }
 0xb57   : > { %v2617_v37 = vpop.xlane.xlu1 %2616 }
 0xb58   : > { %v2628_v58 = vmul.f32 1.442695, %v2624_v59  ;;  %v2625_v63 = vsub.f32 %v2600_v28, %v2617_v37 }
 0xb59   : > { %v2620_v34 = vpop.xlane.xlu0 %2619 }
 0xb5a   : > { %v2630_v1 = vmul.f32 1.442695, %v2625_v63  ;;  %v2626_v3 = vsub.f32 %v6538_v31, %v2620_v34  ;;  %7346 = vpow2.f32 %v2628_v58 }
 0xb5b   : > { %v2518_v4 = vpop.xlane.xlu1 %2517 }
 0xb5c   : > { %7348 = vpow2.f32 %v2630_v1  ;;  %v2632_v55 = vmul.f32 1.442695, %v2626_v3  ;;  %v2526_v6 = vsub.f32 %v2501_v30, %v2518_v4 }
 0xb5d   : > { %v2623_v7 = vpop.xlane.xlu0 %2622 }
 0xb5e   : > { %7350 = vpow2.f32 %v2632_v55  ;;  %v2627_v48 = vsub.f32 %v6539_v46, %v2623_v7  ;;  %v2531_v10 = vmul.f32 1.442695, %v2526_v6 }
 0xb5f   : > { %v2524_v9 = vpop.xlane.xlu1 %2523 }
 0xb60   : > { %v2634_v11 = vmul.f32 1.442695, %v2627_v48  ;;  %v2528_v13 = vsub.f32 %v6527_v42, %v2524_v9  ;;  %v5834_v9 = vld [vmem:[#allocation17 + $0x1] ss:$0 sm:$0xff] }
 0xb61   : > { %v2515_v15 = vpop.xlane.xlu0 %2514 }
 0xb62   : > { %7352 = vpow2.f32 %v2634_v11  ;;  %v2525_v17 = vsub.f32 %v2498_v38, %v2515_v15  ;;  %v2535_v18 = vmul.f32 1.442695, %v2528_v13  ;;  %v2434_v11 = vadd.f32 %v5834_v9, %v8717_v14 }
 0xb63   : > { %7354 = vpow2.f32 %v2531_v10  ;;  %v2437_v13 = vadd.f32 %v5834_v9, %v8721_v19  ;;  %v2421_v19 = vadd.f32 %v5834_v9, %v8707_v52  ;;  %v2429_v52 = vadd.f32 %v8705_v8, %v5834_v9 }
 0xb64   : > { %v2529_v20 = vmul.f32 1.442695, %v2525_v17  ;;  %v7347_v21 = vpop.eup %7346  ;;  %v2442_v17 = vadd.f32 %v8713_v12, %v5834_v9 }
 0xb65   : > { %v2521_v22 = vpop.xlane.xlu0 %2520  ;;  %v2636_v28 = vsel %vm1053_vm5, %v7347_v21, 0.0 }
 0xb66   : > { %v7349_v26 = vpop.eup %7348  ;;  %7356 = vpow2.f32 %v2529_v20  ;;  %v2527_v31 = vsub.f32 %v6526_v29, %v2521_v22 }
 0xb67   : > { %v2639_v40 = vsel %vm1053_vm5, %v7349_v26, 0.0  ;;  %v2652_v61 = vpack.c.bf16 %v7349_v26, %v7347_v21  ;;  %7358 = vpow2.f32 %v2535_v18  ;;  %v2445_v18 = vadd.f32 %v8719_v16, %v5834_v9 }
 0xb68   : > { %v7351_v30 = vpop.eup %7350  ;;  %v2533_v46 = vmul.f32 1.442695, %v2527_v31  ;;  %2640 = vadd.xlane.f32.xlu1 %v2639_v40 }
 0xb69   : > { %v2642_v42 = vsel %vm1053_vm5, %v7351_v30, 0.0 }
 0xb6a   : > { %7360 = vpow2.f32 %v2533_v46  ;;  %2643 = vadd.xlane.f32.xlu0 %v2642_v42 }
 0xb6c   : > { %v7353_v38 = vpop.eup %7352 }
 0xb6d   : > { %v2645_v47 = vsel %vm1053_vm5, %v7353_v38, 0.0  ;;  %v2653_v51 = vpack.c.bf16 %v7353_v38, %v7351_v30  ;;  %v7355_v53 = vpop.eup %7354 }
 0xb6e   : > { %2637 = vadd.xlane.f32.xlu0 %v2636_v28  ;;  %2646 = vadd.xlane.f32.xlu1 %v2645_v47  ;;  %v2540_v54 = vsel %vm1053_vm5, %v7355_v53, 0.0 }
 0xb70   : > { %v7357_v29 = vpop.eup %7356 }
 0xb71   : > { %v2537_v32 = vsel %vm1053_vm5, %v7357_v29, 0.0  ;;  %v2553_v56 = vpack.c.bf16 %v7355_v53, %v7357_v29  ;;  %v7359_v57 = vpop.eup %7358 }
 0xb72   : > { %2538 = vadd.xlane.f32.xlu0 %v2537_v32  ;;  %2541 = vadd.xlane.f32.xlu1 %v2540_v54  ;;  %v2546_v37 = vsel %vm1053_vm5, %v7359_v57, 0.0 }
 0xb74   : > { %v7361_v35 = vpop.eup %7360 }
 0xb75   : > { %v2543_v59 = vsel %vm1053_vm5, %v7361_v35, 0.0  ;;  %v2554_v58 = vpack.c.bf16 %v7359_v57, %v7361_v35 }
 0xb76   : > { %2544 = vadd.xlane.f32.xlu0 %v2543_v59  ;;  %2547 = vadd.xlane.f32.xlu1 %v2546_v37 }
 0xba3   : > { %2662 = vxpose.xlu0.c.b16.start [1/2] (short) (narrow) %v2652_v61, 64  ;;  %2755 = vxpose.xlu1.c.b16.start [1/2] (short) (narrow) %v2553_v56, 64  ;;  %v2418_v61 = vadd.f32 %v5834_v9, %v8703_v5  ;;  %v2426_v5 = vadd.f32 %v8701_v50, %v5834_v9 }
 0xba7   : > { %2663 = vxpose.xlu0.c.b16.end [2/2] (short) (narrow) %v2653_v51, 64  ;;  %2756 = vxpose.xlu1.c.b16.end [2/2] (short) (narrow) %v2554_v58, 64 }
 0xbf5   : > { %v2641_v63 = vpop.xlane.xlu1 %2640 }
 0xbf6   : > { %7362 = vrcp.f32 %v2641_v63 }
 0xbf7   : > { %v2644_v34 = vpop.xlane.xlu0 %2643 }
 0xbf8   : > { %7364 = vrcp.f32 %v2644_v34  ;;  %v7242_v34 = vld [vmem:[#allocation19 + $0x40] sm:$0xff]  }
 0xbfb   : > { %v2638_v1 = vpop.xlane.xlu0 %2637  ;;  %v2647_v3 = vpop.xlane.xlu1 %2646 }
 0xbfc   : > { %7366 = vrcp.f32 %v2638_v1  ;;  %v7243_v1 = vld [vmem:[#allocation19 + $0x48] sm:$0xff]  }
 0xbfd   : > { %7368 = vrcp.f32 %v2647_v3  ;;  %v7244_v3 = vld [vmem:[#allocation19 + $0x50] sm:$0xff]  }
 0xbff   : > { %v2539_v4 = vpop.xlane.xlu0 %2538  ;;  %v2542_v55 = vpop.xlane.xlu1 %2541 }
 0xc00   : > { %7370 = vrcp.f32 %v2539_v4  ;;  %v7363_v48 = vpop.eup %7362  ;;  %v7245_v4 = vld [vmem:[#allocation19 + $0x58] sm:$0xff]  }
 0xc01   : > { %7372 = vrcp.f32 %v2542_v55  ;;  %v2655_v26 = vmul.f32 %v7363_v48, %v2437_v13  ;;  %v7246_v55 = vld [vmem:[#allocation19 + $0x60] sm:$0xff]  }
 0xc02   : > { %v7365_v10 = vpop.eup %7364 }
 0xc03   : > { %v2545_v6 = vpop.xlane.xlu0 %2544  ;;  %v2548_v7 = vpop.xlane.xlu1 %2547  ;;  %v2656_v31 = vmul.f32 %v7365_v10, %v2442_v17 }
 0xc04   : > { %7374 = vrcp.f32 %v2545_v6 }
 0xc05   : > { %7376 = vrcp.f32 %v2548_v7 }
 0xc06   : > { %v7367_v15 = vpop.eup %7366 }
 0xc07   : > { %v7369_v20 = vpop.eup %7368  ;;  %v2660_v21 = vpack.c.bf16 %v7363_v48, %v7367_v15  ;;  %v2654_v22 = vmul.f32 %v7367_v15, %v2434_v11 }
 0xc08   : > { %v2657_v40 = vmul.f32 %v7369_v20, %v2445_v18  ;;  %v2661_v46 = vpack.c.bf16 %v7369_v20, %v7365_v10 }
 0xc09   : > { %6564 = vmatprep.subr.bf16.mxu0 %v2660_v21  ;;  %v2658_v30 = vpack.c.bf16 %v2655_v26, %v2654_v22  ;;  %v2670_v14 = vpop.trf.xlu0  ;;  %v2763_v8 = vpop.trf.xlu1 }
 0xc0a   : > { %v7371_v42 = vpop.eup %7370  ;;  %6565 = vmatpush3.bf16.msra.mxu0 %v2660_v21  ;;  %v2659_v38 = vpack.c.bf16 %v2657_v40, %v2656_v31  ;;  %6544 = vmatprep.mubr.msk.bf16.mxu1 %vm1343_vm4, %v2670_v14 }
 0xc0b   : > { %v7373_v12 = vpop.eup %7372  ;;  %6540 = vmatprep.subr.bf16.mxu1 %v2658_v30  ;;  %6566 = vmatprep.subr.bf16.mxu0 %v2661_v46  ;;  %v2555_v16 = vmul.f32 %v7371_v42, %v2418_v61 }
 0xc0c   : > { %6541 = vmatpush3.bf16.msra.mxu1 %v2658_v30  ;;  %6568 = vmatprep.mubr.msk.bf16.mxu0 %vm1343_vm4, %v2670_v14  ;;  %v2556_v28 = vmul.f32 %v7373_v12, %v2421_v19  ;;  %v2561_v47 = vpack.c.bf16 %v7373_v12, %v7371_v42 }
 0xc0d   : > { %6542 = vmatprep.subr.bf16.mxu1 %v2659_v38  ;;  %v2671_v51 = vpop.trf.xlu0  ;;  %v2764_v37 = vpop.trf.xlu1 }
 0xc0e   : > { %v7375_v53 = vpop.eup %7374  ;;  %6567 = vmatpush3.bf16.msra.mxu0 %v2661_v46  ;;  %v2559_v29 = vpack.c.bf16 %v2556_v28, %v2555_v16 }
 0xc0f   : > { %v7377_v32 = vpop.eup %7376  ;;  %6576 = vmatprep.subr.bf16.mxu0 %v2561_v47  ;;  %v2557_v54 = vmul.f32 %v7375_v53, %v2426_v5  ;;  %v7247_v5 = vld [vmem:[#allocation19 + $0x68] sm:$0xff]  }
 0xc10   : > { %6543 = vmatpush3.bf16.msra.mxu1 %v2659_v38  ;;  %v2558_v56 = vmul.f32 %v7377_v32, %v2429_v52  ;;  %v2562_v57 = vpack.c.bf16 %v7377_v32, %v7375_v53 }
 0xc11   : > { %6552 = vmatprep.subr.bf16.mxu1 %v2559_v29  ;;  %6569 = vmatmul.mubr.msk.bf16.vlgmr.msra.gmra.mrb[56].mxu0 %vm1343_vm4, %v2671_v51  ;;  %v2672_v35 = vpop.trf.xlu0  ;;  %v2765_v58 = vpop.trf.xlu1 }
 0xc12   : > { %6577 = vmatpush3.bf16.msra.mxu0 %v2561_v47  ;;  %v2560_v50 = vpack.c.bf16 %v2558_v56, %v2557_v54  ;;  %6572 = vmatprep.mubr.msk.bf16.mxu0 %vm1343_vm4, %v2672_v35 }
 0xc13   : > { %6545 = vmatmul.mubr.msk.bf16.vlgmr.msra.gmra.mrb[40].mxu1 %vm1343_vm4, %v2671_v51  ;;  %6578 = vmatprep.subr.bf16.mxu0 %v2562_v57  ;;  %v7248_v51 = vld [vmem:[#allocation19 + $0x70] sm:$0xff]  }
 0xc14   : > { %6553 = vmatpush3.bf16.msra.mxu1 %v2559_v29  ;;  %6548 = vmatprep.mubr.msk.bf16.mxu1 %vm1343_vm4, %v2672_v35  ;;  %v7249_v29 = vld [vmem:[#allocation19 + $0x78] sm:$0xff]  }
 0xc15   : > { %6554 = vmatprep.subr.bf16.mxu1 %v2560_v50  ;;  %v2673_v59 = vpop.trf.xlu0  ;;  %v2766_v63 = vpop.trf.xlu1  ;;  %v7251_v35 = vld [vmem:[#allocation16 + $0x80] sm:$0xff]  }
 0xc16   : > { %6579 = vmatpush3.bf16.msra.mxu0 %v2562_v57  ;;  %v7250_v57 = vld [vmem:[#allocation14 + $0x80] sm:$0xff]  }
 0xc17   : > { %6612 = vmatprep.subr.bf16.mxu0 %v7250_v57 }
 0xc18   : > { %6555 = vmatpush3.bf16.msra.mxu1 %v2560_v50  ;;  %v7252_v50 = vld [vmem:[#allocation14 + $0x88] sm:$0xff]  }
 0xc19   : > { %6573 = vmatmul.mubr.msk.bf16.gmra.mrb[60].mxu0 %vm1343_vm4, %v2673_v59  ;;  %6588 = vmatprep.subr.bf16.mxu1 %v7242_v34 }
 0xc1a   : > { %6580 = vmatprep.mubr.msk.bf16.mxu0 %vm1343_vm4, %v2763_v8 }
 0xc1b   : > { %6549 = vmatmul.mubr.msk.bf16.gmra.mrb[44].mxu1 %vm1343_vm4, %v2673_v59  ;;  %v7256_v59 = vld [vmem:[#allocation14 + $0x98] sm:$0xff]  }
 0xc1c   : > { %6556 = vmatprep.mubr.msk.bf16.mxu1 %vm1343_vm4, %v2763_v8  ;;  %v7254_v8 = vld [vmem:[#allocation14 + $0x90] sm:$0xff]  }
 0xc21   : > { %6581 = vmatmul.mubr.msk.bf16.vlgmr.msra.gmra.mrb[56].mxu0 %vm1343_vm4, %v2764_v37 }
 0xc22   : > { %6584 = vmatprep.mubr.msk.bf16.mxu0 %vm1343_vm4, %v2765_v58  ;;  %6613 = vmatpush3.bf16.msra.mxu0 %v7250_v57 }
 0xc23   : > { %6557 = vmatmul.mubr.msk.bf16.vlgmr.msra.gmra.mrb[40].mxu1 %vm1343_vm4, %v2764_v37  ;;  %6614 = vmatprep.subr.bf16.mxu0 %v7252_v50 }
 0xc24   : > { %6560 = vmatprep.mubr.msk.bf16.mxu1 %vm1343_vm4, %v2765_v58  ;;  %6589 = vmatpush3.bf16.msra.mxu1 %v7242_v34 }
 0xc25   : > { %6590 = vmatprep.subr.bf16.mxu1 %v7243_v1 }
 0xc26   : > { %6615 = vmatpush3.bf16.msra.mxu0 %v7252_v50 }
 0xc27   : > { %6616 = vmatprep.subr.bf16.mxu0 %v7254_v8 }
 0xc28   : > { %6591 = vmatpush3.bf16.msra.mxu1 %v7243_v1 }
 0xc29   : > { %6585 = vmatmul.mubr.msk.bf16.gmra.mrb[60].mxu0 %vm1343_vm4, %v2766_v63  ;;  %6592 = vmatprep.subr.bf16.mxu1 %v7244_v3 }
 0xc2a   : > { %6617 = vmatpush3.bf16.msra.mxu0 %v7254_v8 }
 0xc2b   : > { %6561 = vmatmul.mubr.msk.bf16.gmra.mrb[44].mxu1 %vm1343_vm4, %v2766_v63  ;;  %6618 = vmatprep.subr.bf16.mxu0 %v7256_v59 }
 0xc2c   : > { %6593 = vmatpush3.bf16.msra.mxu1 %v7244_v3 }
 0xc2d   : > { %6594 = vmatprep.subr.bf16.mxu1 %v7245_v4 }
 0xc2e   : > { %6619 = vmatpush3.bf16.msra.mxu0 %v7256_v59 }
 0xc30   : > { %6595 = vmatpush3.bf16.msra.mxu1 %v7245_v4 }
 0xc31   : > { %6596 = vmatprep.subr.bf16.mxu1 %v7246_v55 }
 0xc34   : > { %6597 = vmatpush3.bf16.msra.mxu1 %v7246_v55 }
 0xc35   : > { %6598 = vmatprep.subr.bf16.mxu1 %v7247_v5 }
 0xc38   : > { %6599 = vmatpush3.bf16.msra.mxu1 %v7247_v5  ;;  %v7261_v5 = vld [vmem:[#allocation16 + $0xa8] sm:$0xff]  }
 0xc39   : > { %6600 = vmatprep.subr.bf16.mxu1 %v7248_v51 }
 0xc3c   : > { %6601 = vmatpush3.bf16.msra.mxu1 %v7248_v51  ;;  %v7263_v51 = vld [vmem:[#allocation16 + $0xb0] sm:$0xff]  }
 0xc3d   : > { %6602 = vmatprep.subr.bf16.mxu1 %v7249_v29 }
 0xc40   : > { %6603 = vmatpush3.bf16.msra.mxu1 %v7249_v29  ;;  %v5863_v29 = vld [vmem:[#allocation20 + $0x1] ss:$0 sm:$0xff] }
 0xc41   : > { %6636 = vmatprep.subr.bf16.mxu1 %v7251_v35 }
 0xcf4   : > { %v6582_v6 = vpop.f32.mrb[56].mxu0 }
 0xcf5   : > { %v2980_v7 = vadd.f32 1e-09, %v6582_v6  ;;  %v2947_v48 = vpop.f32.mrb[57].mxu0 }
 0xcf6   : > { %v2978_v9 = vadd.f32 1e-09, %v2947_v48  ;;  %v8773_v10 = vpop.f32.mrb[40].mxu1  ;;  %v6583_v11 = vpop.f32.mrb[58].mxu0 }
 0xcf7   : > { %7378 = vrcp.f32 %v2980_v7  ;;  %v8775_v13 = vpop.f32.mrb[41].mxu1  ;;  %v2950_v15 = vpop.f32.mrb[59].mxu0  ;;  %v2981_v21 = vadd.f32 1e-09, %v6583_v11 }
 0xcf8   : > { %7380 = vrcp.f32 %v2978_v9  ;;  %v2979_v17 = vadd.f32 1e-09, %v2950_v15  ;;  %v8777_v18 = vpop.f32.mrb[42].mxu1 }
 0xcf9   : > { %v8779_v20 = vpop.f32.mrb[43].mxu1 }
 0xcfa   : > { %7382 = vrcp.f32 %v2979_v17 }
 0xcfb   : > { %7384 = vrcp.f32 %v2981_v21 }
 0xcfc   : > { %v6586_v22 = vpop.f32.mrb[60].mxu0 }
 0xcfd   : > { %v2963_v26 = vpop.f32.mrb[61].mxu0  ;;  %v2984_v14 = vadd.f32 1e-09, %v6586_v22  ;;  %v7253_v22 = vld [vmem:[#allocation16 + $0x88] sm:$0xff]  }
 0xcfe   : > { %v2982_v31 = vadd.f32 1e-09, %v2963_v26  ;;  %v8781_v40 = vpop.f32.mrb[44].mxu1  ;;  %v6587_v61 = vpop.f32.mrb[62].mxu0 }
 0xcff   : > { %v8783_v30 = vpop.f32.mrb[45].mxu1  ;;  %v2966_v46 = vpop.f32.mrb[63].mxu0  ;;  %v2985_v28 = vadd.f32 1e-09, %v6587_v61 }
 0xd00   : > { %7386 = vrcp.f32 %v2982_v31  ;;  %v2983_v42 = vadd.f32 1e-09, %v2966_v46  ;;  %v8785_v19 = vpop.f32.mrb[46].mxu1 }
 0xd01   : > { %v7379_v38 = vpop.eup %7378  ;;  %v2836_v12 = vpop.f32.mrb[47].mxu1 }
 0xd02   : > { %v7381_v16 = vpop.eup %7380  ;;  %7388 = vrcp.f32 %v2983_v42  ;;  %3006 = vperm.xlu1 %7193, %v7379_v38  }
 0xd03   : > { %2996 = vperm.xlu0 %7192, %v7381_v16   ;;  %7390 = vrcp.f32 %v2984_v14  ;;  %v7257_v16 = vld [vmem:[#allocation16 + $0x98] sm:$0xff]  }
 0xd04   : > { %v7383_v47 = vpop.eup %7382  ;;  %7392 = vrcp.f32 %v2985_v28  ;;  %v7259_v28 = vld [vmem:[#allocation16 + $0xa0] sm:$0xff]  }
 0xd05   : > { %v7385_v53 = vpop.eup %7384 }
 0xd06   : > { %3001 = vperm.xlu1 %7193, %v7383_v47   ;;  %v7262_v47 = vld [vmem:[#allocation14 + $0xb0] sm:$0xff]  }
 0xd0a   : > { %v7387_v52 = vpop.eup %7386  ;;  %3011 = vperm.xlu1 %7193, %v7385_v53   ;;  %v7264_v53 = vld [vmem:[#allocation14 + $0xb8] sm:$0xff]  }
 0xd0b   : > { %3016 = vperm.xlu0 %7192, %v7387_v52   ;;  %v7265_v52 = vld [vmem:[#allocation16 + $0xb8] sm:$0xff]  }
 0xd0c   : > { %v7389_v32 = vpop.eup %7388 }
 0xd0d   : > { %v7391_v54 = vpop.eup %7390 }
 0xd0e   : > { %3021 = vperm.xlu1 %7193, %v7389_v32   ;;  %v7393_v56 = vpop.eup %7392 }
 0xd0f   : > { %3026 = vperm.xlu0 %7192, %v7391_v54   ;;  %v5872_v54 = vld [vmem:[#allocation22 + $0x1] ss:$0 sm:$0xff] }
 0xd12   : > { %3031 = vperm.xlu1 %7193, %v7393_v56  }
 0xd81   : > { %v3007_v37 = vpop.permute.xlu1 %3006 }
 0xd82   : > { %v2997_v58 = vpop.permute.xlu0 %2996  ;;  %v3036_v3 = vmul.f32 %v8773_v10, %v3007_v37 }
 0xd83   : > { %v3034_v63 = vmul.f32 %v2997_v58, %v8775_v13 }
 0xd84   : > { %v3044_v11 = vsub.f32 %v8679_v49, %v3036_v3 }
 0xd85   : > { %v3002_v34 = vpop.permute.xlu1 %3001  ;;  %v3042_v4 = vsub.f32 %v8673_v2, %v3034_v63 }
 0xd86   : > { %v3035_v1 = vmul.f32 %v3002_v34, %v8779_v20 }
 0xd88   : > { %v3043_v55 = vsub.f32 %v8676_v33, %v3035_v1 }
 0xd89   : > { %v3012_v6 = vpop.permute.xlu1 %3011 }
 0xd8a   : > { %v3037_v7 = vmul.f32 %v8777_v18, %v3012_v6  ;;  %v3017_v48 = vpop.permute.xlu0 %3016  ;;  %v3050_v9 = vpack.c.bf16 %v3043_v55, %v3042_v4 }
 0xd8b   : > { %v3038_v13 = vmul.f32 %v3017_v48, %v8783_v30  ;;  %v7255_v30 = vld [vmem:[#allocation16 + $0x90] sm:$0xff]  }
 0xd8c   : > { %v3045_v15 = vsub.f32 %v8670_v45, %v3037_v7  ;;  %6604 = vmatprep.mubr.bf16.mxu1 %v3050_v9 }
 0xd8d   : > { %v3022_v17 = vpop.permute.xlu1 %3021  ;;  %v3046_v26 = vsub.f32 %v8689_v36, %v3038_v13 }
 0xd8e   : > { %v3051_v20 = vpack.c.bf16 %v3045_v15, %v3044_v11  ;;  %v3039_v21 = vmul.f32 %v3022_v17, %v2836_v12  ;;  %v3027_v10 = vpop.permute.xlu0 %3026 }
 0xd8f   : > { %v3040_v18 = vmul.f32 %v8781_v40, %v3027_v10  ;;  %v7258_v40 = vld [vmem:[#allocation14 + $0xa0] sm:$0xff]  }
 0xd90   : > { %v3047_v31 = vsub.f32 %v8692_v62, %v3039_v21  ;;  %6605 = vmatmul.mubr.bf16.vlgmr.msra.gmra.mrb[48].mxu1 %v3051_v20  ;;  %6620 = vmatprep.subr.bf16.mxu0 %v7258_v40 }
 0xd91   : > { %v3032_v61 = vpop.permute.xlu1 %3031  ;;  %6637 = vmatpush3.bf16.msra.mxu1 %v7251_v35  ;;  %v3048_v42 = vsub.f32 %v8695_v0, %v3040_v18  ;;  %6621 = vmatpush3.bf16.msra.mxu0 %v7258_v40  ;;  %v5873_v35 = vld [vmem:[#allocation23 + $0x1] ss:$0 sm:$0xff] }
 0xd92   : > { %v3041_v46 = vmul.f32 %v8785_v19, %v3032_v61  ;;  %v3052_v14 = vpack.c.bf16 %v3047_v31, %v3046_v26  ;;  %6638 = vmatprep.subr.bf16.mxu1 %v7253_v22  ;;  %v7260_v19 = vld [vmem:[#allocation14 + $0xa8] sm:$0xff]  }
 0xd93   : > { %6622 = vmatprep.subr.bf16.mxu0 %v7260_v19 }
 0xd94   : > { %v3049_v38 = vsub.f32 %v8686_v60, %v3041_v46  ;;  %6608 = vmatprep.mubr.bf16.mxu1 %v3052_v14 }
 0xd95   : > { %6639 = vmatpush3.bf16.msra.mxu1 %v7253_v22  ;;  %6623 = vmatpush3.bf16.msra.mxu0 %v7260_v19 }
 0xd96   : > { %v3053_v12 = vpack.c.bf16 %v3049_v38, %v3048_v42  ;;  %6640 = vmatprep.subr.bf16.mxu1 %v7255_v30  ;;  %6624 = vmatprep.subr.bf16.mxu0 %v7262_v47 }
 0xd98   : > { %6609 = vmatmul.mubr.bf16.gmra.mrb[52].mxu1 %v3053_v12 }
 0xd99   : > { %6641 = vmatpush3.bf16.msra.mxu1 %v7255_v30  ;;  %6625 = vmatpush3.bf16.msra.mxu0 %v7262_v47 }
 0xd9a   : > { %6642 = vmatprep.subr.bf16.mxu1 %v7257_v16  ;;  %6626 = vmatprep.subr.bf16.mxu0 %v7264_v53 }
 0xd9d   : > { %6643 = vmatpush3.bf16.msra.mxu1 %v7257_v16  ;;  %6627 = vmatpush3.bf16.msra.mxu0 %v7264_v53 }
 0xd9e   : > { %6644 = vmatprep.subr.bf16.mxu1 %v7259_v28 }
 0xda1   : > { %6645 = vmatpush3.bf16.msra.mxu1 %v7259_v28 }
 0xda2   : > { %6646 = vmatprep.subr.bf16.mxu1 %v7261_v5 }
 0xda5   : > { %6647 = vmatpush3.bf16.msra.mxu1 %v7261_v5 }
 0xda6   : > { %6648 = vmatprep.subr.bf16.mxu1 %v7263_v51 }
 0xda9   : > { %6649 = vmatpush3.bf16.msra.mxu1 %v7263_v51 }
 0xdaa   : > { %6650 = vmatprep.subr.bf16.mxu1 %v7265_v52 }
 0xdad   : > { %6651 = vmatpush3.bf16.msra.mxu1 %v7265_v52 }
 0xe63   : > { %v6606_v32 = vpop.f32.mrb[48].mxu1 }
 0xe64   : > { %v3170_v56 = vadd.f32 %v6606_v32, %v5863_v29  ;;  %v3161_v57 = vpop.f32.mrb[49].mxu1 }
 0xe65   : > { %v3162_v50 = vadd.f32 %v5863_v29, %v3161_v57  ;;  %v6607_v8 = vpop.f32.mrb[50].mxu1 }
 0xe66   : > { %v3202_v59 = vmul.f32 %v5872_v54, %v3170_v56  ;;  %v3173_v37 = vadd.f32 %v6607_v8, %v5863_v29  ;;  %v3164_v58 = vpop.f32.mrb[51].mxu1 }
 0xe67   : > { %v3200_v63 = vmul.f32 %v5872_v54, %v3162_v50  ;;  %v3165_v34 = vadd.f32 %v5863_v29, %v3164_v58 }
 0xe68   : > { %v3218_v1 = vadd.f32 %v5873_v35, %v3202_v59  ;;  %v3203_v3 = vmul.f32 %v5872_v54, %v3173_v37 }
 0xe69   : > { %v3216_v4 = vadd.f32 %v5873_v35, %v3200_v63  ;;  %v3201_v55 = vmul.f32 %v5872_v54, %v3165_v34 }
 0xe6a   : > { %v3219_v6 = vadd.f32 %v5873_v35, %v3203_v3  ;;  %v3226_v11 = vmax.f32 %v3218_v1, 0.0 }
 0xe6b   : > { %v3224_v7 = vmax.f32 %v3216_v4, 0.0  ;;  %v3217_v48 = vadd.f32 %v5873_v35, %v3201_v55  ;;  %v6610_v9 = vpop.f32.mrb[52].mxu1 }
 0xe6c   : > { %v3227_v15 = vmax.f32 %v3219_v6, 0.0  ;;  %v3186_v13 = vadd.f32 %v6610_v9, %v5863_v29  ;;  %v3177_v17 = vpop.f32.mrb[53].mxu1  ;;  %v8812_v42 = vadd.f32 %v3226_v11, %v8679_v49 }
 0xe6d   : > { %v3225_v20 = vmax.f32 %v3217_v48, 0.0  ;;  %v3178_v21 = vadd.f32 %v5863_v29, %v3177_v17  ;;  %v6611_v10 = vpop.f32.mrb[54].mxu1  ;;  %v8806_v61 = vadd.f32 %v3224_v7, %v8673_v2 }
 0xe6e   : > { %v8803_v22 = vadd.f32 %v3227_v15, %v8670_v45  ;;  %v3206_v26 = vmul.f32 %v5872_v54, %v3186_v13  ;;  %v3189_v31 = vadd.f32 %v6611_v10, %v5863_v29  ;;  %v3180_v18 = vpop.f32.mrb[55].mxu1 }
 0xe6f   : > { %v8809_v46 = vadd.f32 %v3225_v20, %v8676_v33  ;;  %v3204_v14 = vmul.f32 %v5872_v54, %v3178_v21  ;;  %v3181_v30 = vadd.f32 %v5863_v29, %v3180_v18 }
 0xe70   : > { %v3222_v38 = vadd.f32 %v5873_v35, %v3206_v26  ;;  %v3207_v12 = vmul.f32 %v5872_v54, %v3189_v31  ;;  %v3289_v5 = vpack.c.bf16 %v8803_v22, %v8812_v42 }
 0xe71   : > { %v3220_v16 = vadd.f32 %v5873_v35, %v3204_v14  ;;  %v3205_v40 = vmul.f32 %v5872_v54, %v3181_v30  ;;  %v3288_v28 = vpack.c.bf16 %v8809_v46, %v8806_v61 }
 0xe72   : > { %v3223_v19 = vadd.f32 %v5873_v35, %v3207_v12  ;;  %v3230_v53 = vmax.f32 %v3222_v38, 0.0 }
 0xe73   : > { %v3228_v47 = vmax.f32 %v3220_v16, 0.0  ;;  %v3221_v51 = vadd.f32 %v5873_v35, %v3205_v40  ;;  %6628 = vmatprep.mubr.bf16.mxu0 %v3288_v28  ;;  %6652 = vmatprep.mubr.bf16.mxu1 %v3288_v28 }
 0xe74   : > { %v3231_v52 = vmax.f32 %v3223_v19, 0.0  ;;  %6629 = vmatmul.mubr.bf16.vlgmr.msra.gmra.mrb[64].mxu0 %v3289_v5  ;;  %6653 = vmatmul.mubr.bf16.vlgmr.msra.gmra.mrb[56].mxu1 %v3289_v5  ;;  %v8828_v57 = vadd.f32 %v3230_v53, %v8695_v0 }
 0xe75   : > { %v3229_v29 = vmax.f32 %v3221_v51, 0.0  ;;  %v8822_v54 = vadd.f32 %v3228_v47, %v8689_v36 }
 0xe76   : > { %v8819_v32 = vadd.f32 %v3231_v52, %v8686_v60 }
 0xe77   : > { %v8825_v56 = vadd.f32 %v3229_v29, %v8692_v62 }
 0xe78   : > { %v3291_v50 = vpack.c.bf16 %v8819_v32, %v8828_v57 }
 0xe79   : > { %v3290_v35 = vpack.c.bf16 %v8825_v56, %v8822_v54 }
 0xe7b   : > { %6632 = vmatprep.mubr.bf16.mxu0 %v3290_v35  ;;  %6656 = vmatprep.mubr.bf16.mxu1 %v3290_v35 }
 0xe7c   : > { %6633 = vmatmul.mubr.bf16.gmra.mrb[68].mxu0 %v3291_v50  ;;  %6657 = vmatmul.mubr.bf16.gmra.mrb[60].mxu1 %v3291_v50 }
 0xf47   : > { %v6630_v8 = vpop.f32.mrb[64].mxu0  ;;  %v8834_v59 = vpop.f32.mrb[56].mxu1 }
 0xf48   : > { %v3391_v37 = vpop.f32.mrb[65].mxu0  ;;  %v8836_v58 = vpop.f32.mrb[57].mxu1 }
 0xf49   : > { %v6631_v63 = vpop.f32.mrb[66].mxu0  ;;  %v8838_v34 = vpop.f32.mrb[58].mxu1 }
 0xf4a   : > { %v3561_v1 = vpack.c.bf16 %v6631_v63, %v6630_v8  ;;  %v3394_v3 = vpop.f32.mrb[67].mxu0  ;;  %v8840_v4 = vpop.f32.mrb[59].mxu1 }
 0xf4b   : > { %v3560_v55 = vpack.c.bf16 %v3394_v3, %v3391_v37 }
 0xf4c   : > { %v3568_v26 = vsel %vm1343_vm4, %v3561_v1, 0 }
 0xf4d   : > { %6986 = vmatprep.subr.msk.bf16.mxu0 %vm1343_vm4, %v3560_v55  ;;  %6668 = vmatprep.mubr.msk.bf16.mxu0 %vm1343_vm4, %v3560_v55  ;;  %v3565_v6 = vsel %vm1343_vm4, %v3560_v55, 0 }
 0xf4e   : > { %6990 = vmatprep.subr.msk.bf16.mxu1 %vm1343_vm4, %v3560_v55  ;;  %6661 = vmatpush3.bf16.xpose.msra.mxu0 %v3565_v6 }
 0xf4f   : > { %6673 = vmatpush3.bf16.xpose.msra.mxu1 %v3565_v6  ;;  %v6634_v7 = vpop.f32.mrb[68].mxu0  ;;  %v8846_v48 = vpop.f32.mrb[60].mxu1  ;;  %6987 = vmatprep.subr.msk.bf16.mxu0 %vm1343_vm4, %v3561_v1 }
 0xf50   : > { %6991 = vmatprep.subr.msk.bf16.mxu1 %vm1343_vm4, %v3561_v1  ;;  %v3407_v9 = vpop.f32.mrb[69].mxu0  ;;  %v8850_v11 = vpop.f32.mrb[61].mxu1 }
 0xf51   : > { %v6635_v15 = vpop.f32.mrb[70].mxu0  ;;  %v8852_v13 = vpop.f32.mrb[62].mxu1 }
 0xf52   : > { %v3563_v17 = vpack.c.bf16 %v6635_v15, %v6634_v7  ;;  %v3410_v20 = vpop.f32.mrb[71].mxu0  ;;  %v8854_v21 = vpop.f32.mrb[63].mxu1 }
 0xf53   : > { %v3562_v10 = vpack.c.bf16 %v3410_v20, %v3407_v9 }
 0xf54   : > { %v3574_v18 = vsel %vm1343_vm4, %v3563_v17, 0 }
 0xf55   : > { %6680 = vmatprep.mubr.msk.bf16.mxu1 %vm1343_vm4, %v3562_v10  ;;  %v3571_v31 = vsel %vm1343_vm4, %v3562_v10, 0 }
 0xf56   : > { %6663 = vmatpush3.bf16.xpose.msra.mxu0 %v3568_v26 }
 0xf57   : > { %6675 = vmatpush3.bf16.xpose.msra.mxu1 %v3568_v26  ;;  %6988 = vmatprep.subr.msk.bf16.mxu0 %vm1343_vm4, %v3562_v10 }
 0xf58   : > { %6992 = vmatprep.subr.msk.bf16.mxu1 %vm1343_vm4, %v3562_v10 }
 0xf5e   : > { %6665 = vmatpush3.bf16.xpose.msra.mxu0 %v3571_v31 }
 0xf5f   : > { %6677 = vmatpush3.bf16.xpose.msra.mxu1 %v3571_v31  ;;  %6989 = vmatprep.subr.msk.bf16.mxu0 %vm1343_vm4, %v3563_v17 }
 0xf60   : > { %6993 = vmatprep.subr.msk.bf16.mxu1 %vm1343_vm4, %v3563_v17 }
 0xf66   : > { %6667 = vmatpush3.bf16.xpose.msra.mxu0 %v3574_v18 }
 0xf67   : > { %6679 = vmatpush3.bf16.xpose.msra.mxu1 %v3574_v18 }
 0xf6d   : > { %6669 = vmatmul.mubr.msk.bf16.vlgmr.msra.gmra.mrb[72].mxu0 %vm1343_vm4, %v3561_v1 }
 0xf6e   : > { %6681 = vmatmul.mubr.msk.bf16.vlgmr.msra.gmra.mrb[64].mxu1 %vm1343_vm4, %v3563_v17 }
0x1040   : > { %v6670_v14 = vpop.f32.mrb[72].mxu0 }
0x1041   : > { %v6682_v30 = vpop.f32.mrb[64].mxu1  ;;  %v3610_v38 = vpop.f32.mrb[73].mxu0  ;;  %v3631_v50 = vsel %vm1053_vm5, %v6670_v14, -inf }
0x1042   : > { %v3709_v12 = vpop.f32.mrb[65].mxu1  ;;  %v6671_v16 = vpop.f32.mrb[74].mxu0  ;;  %v3730_v51 = vsel %vm1053_vm5, %v6682_v30, -inf  ;;  %v3625_v35 = vsel %vm1053_vm5, %v3610_v38, -inf }
0x1043   : > { %v6683_v40 = vpop.f32.mrb[66].mxu1  ;;  %v3724_v28 = vsel %vm1053_vm5, %v3709_v12, -inf  ;;  %v3613_v19 = vpop.f32.mrb[75].mxu0  ;;  %v3634_v29 = vsel %vm1053_vm5, %v6671_v16, -inf }
0x1044   : > { %3725 = vmax.xlane.f32.xlu0 %v3724_v28  ;;  %v3712_v5 = vpop.f32.mrb[67].mxu1  ;;  %v3628_v53 = vsel %vm1053_vm5, %v3613_v19, -inf  ;;  %v3733_v52 = vsel %vm1053_vm5, %v6683_v40, -inf }
0x1045   : > { %v3727_v47 = vsel %vm1053_vm5, %v3712_v5, -inf }
0x1046   : > { %3728 = vmax.xlane.f32.xlu1 %v3727_v47 }
0x1048   : > { %3731 = vmax.xlane.f32.xlu0 %v3730_v51 }
0x104a   : > { %3629 = vmax.xlane.f32.xlu1 %v3628_v53 }
0x104c   : > { %3734 = vmax.xlane.f32.xlu0 %v3733_v52 }
0x104e   : > { %3635 = vmax.xlane.f32.xlu1 %v3634_v29 }
0x1050   : > { %3626 = vmax.xlane.f32.xlu0 %v3625_v35 }
0x1054   : > { %3632 = vmax.xlane.f32.xlu0 %v3631_v50 }
0x10d1   : > { %v3726_v8 = vpop.xlane.xlu0 %3725 }
0x10d2   : > { %v3736_v37 = vsub.f32 %v3709_v12, %v3726_v8 }
0x10d3   : > { %v3729_v63 = vpop.xlane.xlu1 %3728 }
0x10d4   : > { %v3740_v1 = vmul.f32 1.442695, %v3736_v37  ;;  %v3737_v3 = vsub.f32 %v3712_v5, %v3729_v63 }
0x10d5   : > { %v3732_v55 = vpop.xlane.xlu0 %3731 }
0x10d6   : > { %v3742_v6 = vmul.f32 1.442695, %v3737_v3  ;;  %v3738_v7 = vsub.f32 %v6682_v30, %v3732_v55  ;;  %7394 = vpow2.f32 %v3740_v1 }
0x10d7   : > { %v3630_v9 = vpop.xlane.xlu1 %3629 }
0x10d8   : > { %7396 = vpow2.f32 %v3742_v6  ;;  %v3744_v15 = vmul.f32 1.442695, %v3738_v7  ;;  %v3638_v17 = vsub.f32 %v3613_v19, %v3630_v9 }
0x10d9   : > { %v3735_v20 = vpop.xlane.xlu0 %3734 }
0x10da   : > { %7398 = vpow2.f32 %v3744_v15  ;;  %v3739_v10 = vsub.f32 %v6683_v40, %v3735_v20  ;;  %v3643_v31 = vmul.f32 1.442695, %v3638_v17 }
0x10db   : > { %v3636_v26 = vpop.xlane.xlu1 %3635 }
0x10dc   : > { %v3746_v18 = vmul.f32 1.442695, %v3739_v10  ;;  %v3640_v28 = vsub.f32 %v6671_v16, %v3636_v26 }
0x10dd   : > { %v3627_v47 = vpop.xlane.xlu0 %3626 }
0x10de   : > { %7400 = vpow2.f32 %v3746_v18  ;;  %v3637_v12 = vsub.f32 %v3610_v38, %v3627_v47  ;;  %v3647_v5 = vmul.f32 1.442695, %v3640_v28 }
0x10df   : > { %7402 = vpow2.f32 %v3643_v31 }
0x10e0   : > { %v3641_v51 = vmul.f32 1.442695, %v3637_v12  ;;  %v7395_v53 = vpop.eup %7394 }
0x10e1   : > { %v3633_v30 = vpop.xlane.xlu0 %3632  ;;  %v3748_v8 = vsel %vm1053_vm5, %v7395_v53, 0.0 }
0x10e2   : > { %v7397_v52 = vpop.eup %7396  ;;  %7404 = vpow2.f32 %v3641_v51  ;;  %v3639_v29 = vsub.f32 %v6670_v14, %v3633_v30 }
0x10e3   : > { %v3751_v19 = vsel %vm1053_vm5, %v7397_v52, 0.0  ;;  %v3764_v35 = vpack.c.bf16 %v7397_v52, %v7395_v53  ;;  %7406 = vpow2.f32 %v3647_v5  ;;  %v5882_v53 = vld [vmem:[#allocation17 + $0x2] ss:$0 sm:$0xff] }
0x10e4   : > { %v7399_v50 = vpop.eup %7398  ;;  %v3645_v40 = vmul.f32 1.442695, %v3639_v29  ;;  %3752 = vadd.xlane.f32.xlu1 %v3751_v19  ;;  %v3546_v52 = vadd.f32 %v5882_v53, %v8850_v11  ;;  %v3549_v29 = vadd.f32 %v5882_v53, %v8854_v21  ;;  %v3533_v21 = vadd.f32 %v5882_v53, %v8840_v4 }
0x10e5   : > { %v3754_v16 = vsel %vm1053_vm5, %v7399_v50, 0.0  ;;  %v3541_v4 = vadd.f32 %v8838_v34, %v5882_v53 }
0x10e6   : > { %7408 = vpow2.f32 %v3645_v40  ;;  %3755 = vadd.xlane.f32.xlu0 %v3754_v16 }
0x10e8   : > { %v7401_v38 = vpop.eup %7400 }
0x10e9   : > { %v3757_v37 = vsel %vm1053_vm5, %v7401_v38, 0.0  ;;  %v3765_v63 = vpack.c.bf16 %v7401_v38, %v7399_v50  ;;  %v7403_v1 = vpop.eup %7402  ;;  %v3557_v50 = vadd.f32 %v8852_v13, %v5882_v53 }
0x10ea   : > { %3749 = vadd.xlane.f32.xlu0 %v3748_v8  ;;  %3758 = vadd.xlane.f32.xlu1 %v3757_v37  ;;  %v3652_v55 = vsel %vm1053_vm5, %v7403_v1, 0.0 }
0x10ec   : > { %v7405_v14 = vpop.eup %7404 }
0x10ed   : > { %v3649_v3 = vsel %vm1053_vm5, %v7405_v14, 0.0  ;;  %v3665_v6 = vpack.c.bf16 %v7403_v1, %v7405_v14  ;;  %v7407_v7 = vpop.eup %7406  ;;  %v3530_v1 = vadd.f32 %v5882_v53, %v8836_v58  ;;  %v3538_v58 = vadd.f32 %v8834_v59, %v5882_v53 }
0x10ee   : > { %3650 = vadd.xlane.f32.xlu0 %v3649_v3  ;;  %3653 = vadd.xlane.f32.xlu1 %v3652_v55  ;;  %v3658_v17 = vsel %vm1053_vm5, %v7407_v7, 0.0 }
0x10f0   : > { %v7409_v9 = vpop.eup %7408 }
0x10f1   : > { %v3655_v15 = vsel %vm1053_vm5, %v7409_v9, 0.0  ;;  %v3666_v20 = vpack.c.bf16 %v7407_v7, %v7409_v9 }
0x10f2   : > { %3656 = vadd.xlane.f32.xlu0 %v3655_v15  ;;  %3659 = vadd.xlane.f32.xlu1 %v3658_v17 }
0x111f   : > { %3774 = vxpose.xlu0.c.b16.start [1/2] (short) (narrow) %v3764_v35, 64  ;;  %3867 = vxpose.xlu1.c.b16.start [1/2] (short) (narrow) %v3665_v6, 64  ;;  %v3554_v35 = vadd.f32 %v8846_v48, %v5882_v53  ;;  %v7266_v53 = vld [vmem:[#allocation19 + $0x80] sm:$0xff]  }
0x1123   : > { %3775 = vxpose.xlu0.c.b16.end [2/2] (short) (narrow) %v3765_v63, 64  ;;  %3868 = vxpose.xlu1.c.b16.end [2/2] (short) (narrow) %v3666_v20, 64 }
0x1171   : > { %v3753_v10 = vpop.xlane.xlu1 %3752 }
0x1172   : > { %7410 = vrcp.f32 %v3753_v10 }
0x1173   : > { %v3756_v26 = vpop.xlane.xlu0 %3755 }
0x1174   : > { %7412 = vrcp.f32 %v3756_v26 }
0x1177   : > { %v3750_v31 = vpop.xlane.xlu0 %3749  ;;  %v3759_v18 = vpop.xlane.xlu1 %3758 }
0x1178   : > { %7414 = vrcp.f32 %v3750_v31 }
0x1179   : > { %7416 = vrcp.f32 %v3759_v18 }
0x117b   : > { %v3651_v28 = vpop.xlane.xlu0 %3650  ;;  %v3654_v47 = vpop.xlane.xlu1 %3653 }
0x117c   : > { %7418 = vrcp.f32 %v3651_v28  ;;  %v7411_v51 = vpop.eup %7410 }
0x117d   : > { %7420 = vrcp.f32 %v3654_v47  ;;  %v3767_v8 = vmul.f32 %v7411_v51, %v3549_v29  ;;  %v7269_v29 = vld [vmem:[#allocation19 + $0x98] sm:$0xff]  }
0x117e   : > { %v7413_v30 = vpop.eup %7412 }
0x117f   : > { %v3657_v12 = vpop.xlane.xlu0 %3656  ;;  %v3660_v5 = vpop.xlane.xlu1 %3659  ;;  %v3768_v37 = vmul.f32 %v7413_v30, %v3554_v35 }
0x1180   : > { %7422 = vrcp.f32 %v3657_v12 }
0x1181   : > { %7424 = vrcp.f32 %v3660_v5 }
0x1182   : > { %v7415_v19 = vpop.eup %7414 }
0x1183   : > { %v7417_v40 = vpop.eup %7416  ;;  %v3772_v16 = vpack.c.bf16 %v7411_v51, %v7415_v19  ;;  %v3766_v38 = vmul.f32 %v7415_v19, %v3546_v52  ;;  %v7268_v52 = vld [vmem:[#allocation19 + $0x90] sm:$0xff]   ;;  %v7270_v19 = vld [vmem:[#allocation19 + $0xa0] sm:$0xff]  }
0x1184   : > { %v3769_v63 = vmul.f32 %v7417_v40, %v3557_v50  ;;  %v3773_v3 = vpack.c.bf16 %v7417_v40, %v7413_v30  ;;  %v7267_v30 = vld [vmem:[#allocation19 + $0x88] sm:$0xff]  }
0x1185   : > { %6708 = vmatprep.subr.bf16.mxu1 %v3772_v16  ;;  %v3770_v14 = vpack.c.bf16 %v3767_v8, %v3766_v38  ;;  %v3782_v11 = vpop.trf.xlu0  ;;  %v3875_v34 = vpop.trf.xlu1 }
0x1186   : > { %v7419_v55 = vpop.eup %7418  ;;  %6709 = vmatpush3.bf16.msra.mxu1 %v3772_v16  ;;  %v3771_v6 = vpack.c.bf16 %v3769_v63, %v3768_v37  ;;  %6688 = vmatprep.mubr.msk.bf16.mxu0 %vm1343_vm4, %v3782_v11 }
0x1187   : > { %v7421_v48 = vpop.eup %7420  ;;  %6684 = vmatprep.subr.bf16.mxu0 %v3770_v14  ;;  %6710 = vmatprep.subr.bf16.mxu1 %v3773_v3  ;;  %v3667_v13 = vmul.f32 %v7419_v55, %v3530_v1 }
0x1188   : > { %6685 = vmatpush3.bf16.msra.mxu0 %v3770_v14  ;;  %6712 = vmatprep.mubr.msk.bf16.mxu1 %vm1343_vm4, %v3782_v11  ;;  %v3668_v7 = vmul.f32 %v7421_v48, %v3533_v21  ;;  %v3673_v9 = vpack.c.bf16 %v7421_v48, %v7419_v55 }
0x1189   : > { %6686 = vmatprep.subr.bf16.mxu0 %v3771_v6  ;;  %v3783_v15 = vpop.trf.xlu0  ;;  %v3876_v12 = vpop.trf.xlu1 }
0x118a   : > { %v7423_v17 = vpop.eup %7422  ;;  %6711 = vmatpush3.bf16.msra.mxu1 %v3773_v3  ;;  %v3671_v20 = vpack.c.bf16 %v3668_v7, %v3667_v13 }
0x118b   : > { %v7425_v10 = vpop.eup %7424  ;;  %6720 = vmatprep.subr.bf16.mxu1 %v3673_v9  ;;  %v3669_v26 = vmul.f32 %v7423_v17, %v3538_v58 }
0x118c   : > { %6687 = vmatpush3.bf16.msra.mxu0 %v3771_v6  ;;  %v3670_v31 = vmul.f32 %v7425_v10, %v3541_v4  ;;  %v3674_v18 = vpack.c.bf16 %v7425_v10, %v7423_v17 }
0x118d   : > { %6696 = vmatprep.subr.bf16.mxu0 %v3671_v20  ;;  %6713 = vmatmul.mubr.msk.bf16.vlgmr.msra.gmra.mrb[68].mxu1 %vm1343_vm4, %v3783_v15  ;;  %v3784_v28 = vpop.trf.xlu0  ;;  %v3877_v5 = vpop.trf.xlu1 }
0x118e   : > { %6721 = vmatpush3.bf16.msra.mxu1 %v3673_v9  ;;  %v3672_v59 = vpack.c.bf16 %v3670_v31, %v3669_v26  ;;  %6716 = vmatprep.mubr.msk.bf16.mxu1 %vm1343_vm4, %v3784_v28  ;;  %v7271_v31 = vld [vmem:[#allocation19 + $0xa8] sm:$0xff]  }
0x118f   : > { %6689 = vmatmul.mubr.msk.bf16.vlgmr.msra.gmra.mrb[76].mxu0 %vm1343_vm4, %v3783_v15  ;;  %6722 = vmatprep.subr.bf16.mxu1 %v3674_v18 }
0x1190   : > { %6697 = vmatpush3.bf16.msra.mxu0 %v3671_v20  ;;  %6692 = vmatprep.mubr.msk.bf16.mxu0 %vm1343_vm4, %v3784_v28  ;;  %v7272_v28 = vld [vmem:[#allocation19 + $0xb0] sm:$0xff]  }
0x1191   : > { %6698 = vmatprep.subr.bf16.mxu0 %v3672_v59  ;;  %v3785_v47 = vpop.trf.xlu0  ;;  %v3878_v51 = vpop.trf.xlu1 }
0x1192   : > { %6723 = vmatpush3.bf16.msra.mxu1 %v3674_v18 }
0x1194   : > { %6699 = vmatpush3.bf16.msra.mxu0 %v3672_v59 }
0x1195   : > { %6717 = vmatmul.mubr.msk.bf16.gmra.mrb[72].mxu1 %vm1343_vm4, %v3785_v47  ;;  %6732 = vmatprep.subr.bf16.mxu0 %v7266_v53 }
0x1196   : > { %6724 = vmatprep.mubr.msk.bf16.mxu1 %vm1343_vm4, %v3875_v34 }
0x1197   : > { %6693 = vmatmul.mubr.msk.bf16.gmra.mrb[80].mxu0 %vm1343_vm4, %v3785_v47  ;;  %v7273_v47 = vld [vmem:[#allocation19 + $0xb8] sm:$0xff]  }
0x1198   : > { %6700 = vmatprep.mubr.msk.bf16.mxu0 %vm1343_vm4, %v3875_v34 }
0x119d   : > { %6725 = vmatmul.mubr.msk.bf16.vlgmr.msra.gmra.mrb[68].mxu1 %vm1343_vm4, %v3876_v12 }
0x119e   : > { %6728 = vmatprep.mubr.msk.bf16.mxu1 %vm1343_vm4, %v3877_v5 }
0x119f   : > { %6701 = vmatmul.mubr.msk.bf16.vlgmr.msra.gmra.mrb[76].mxu0 %vm1343_vm4, %v3876_v12 }
0x11a0   : > { %6704 = vmatprep.mubr.msk.bf16.mxu0 %vm1343_vm4, %v3877_v5  ;;  %6733 = vmatpush3.bf16.msra.mxu0 %v7266_v53  ;;  %v7274_v53 = vld [vmem:[#allocation14 + $0xc0] sm:$0xff]  }
0x11a1   : > { %6734 = vmatprep.subr.bf16.mxu0 %v7267_v30  ;;  %6756 = vmatprep.subr.bf16.mxu1 %v7274_v53 }
0x11a2   : > { %6757 = vmatpush3.bf16.msra.mxu1 %v7274_v53  ;;  %v7286_v53 = vld [vmem:[#allocation14 + $0xf0] sm:$0xff]  }
0x11a4   : > { %6735 = vmatpush3.bf16.msra.mxu0 %v7267_v30  ;;  %v7275_v30 = vld [vmem:[#allocation16 + $0xc0] sm:$0xff]  }
0x11a5   : > { %6729 = vmatmul.mubr.msk.bf16.gmra.mrb[72].mxu1 %vm1343_vm4, %v3878_v51  ;;  %6736 = vmatprep.subr.bf16.mxu0 %v7268_v52 }
0x11a7   : > { %6705 = vmatmul.mubr.msk.bf16.gmra.mrb[80].mxu0 %vm1343_vm4, %v3878_v51 }
0x11a8   : > { %6737 = vmatpush3.bf16.msra.mxu0 %v7268_v52  ;;  %v7276_v52 = vld [vmem:[#allocation14 + $0xc8] sm:$0xff]  }
0x11a9   : > { %6738 = vmatprep.subr.bf16.mxu0 %v7269_v29  ;;  %6758 = vmatprep.subr.bf16.mxu1 %v7276_v52 }
0x11aa   : > { %6759 = vmatpush3.bf16.msra.mxu1 %v7276_v52  ;;  %v7288_v52 = vld [vmem:[#allocation14 + $0xf8] sm:$0xff]  }
0x11ac   : > { %6739 = vmatpush3.bf16.msra.mxu0 %v7269_v29  ;;  %v7278_v29 = vld [vmem:[#allocation14 + $0xd0] sm:$0xff]  }
0x11ad   : > { %6740 = vmatprep.subr.bf16.mxu0 %v7270_v19  ;;  %6760 = vmatprep.subr.bf16.mxu1 %v7278_v29 }
0x11ae   : > { %6761 = vmatpush3.bf16.msra.mxu1 %v7278_v29  ;;  %v7289_v29 = vld [vmem:[#allocation16 + $0xf8] sm:$0xff]  }
0x11b0   : > { %6741 = vmatpush3.bf16.msra.mxu0 %v7270_v19  ;;  %v7280_v19 = vld [vmem:[#allocation14 + $0xd8] sm:$0xff]  }
0x11b1   : > { %6742 = vmatprep.subr.bf16.mxu0 %v7271_v31  ;;  %6762 = vmatprep.subr.bf16.mxu1 %v7280_v19 }
0x11b2   : > { %6763 = vmatpush3.bf16.msra.mxu1 %v7280_v19  ;;  %v5911_v19 = vld [vmem:[#allocation20 + $0x2] ss:$0 sm:$0xff] }
0x11b4   : > { %6743 = vmatpush3.bf16.msra.mxu0 %v7271_v31 }
0x11b5   : > { %6744 = vmatprep.subr.bf16.mxu0 %v7272_v28 }
0x11b8   : > { %6745 = vmatpush3.bf16.msra.mxu0 %v7272_v28 }
0x11b9   : > { %6746 = vmatprep.subr.bf16.mxu0 %v7273_v47 }
0x11bc   : > { %6747 = vmatpush3.bf16.msra.mxu0 %v7273_v47 }
0x11bd   : > { %6780 = vmatprep.subr.bf16.mxu0 %v7275_v30 }
0x1270   : > { %v6726_v35 = vpop.f32.mrb[68].mxu1 }
0x1271   : > { %v4092_v50 = vadd.f32 1e-09, %v6726_v35  ;;  %v4059_v40 = vpop.f32.mrb[69].mxu1 }
0x1272   : > { %v4090_v16 = vadd.f32 1e-09, %v4059_v40  ;;  %v8906_v38 = vpop.f32.mrb[76].mxu0  ;;  %v6727_v8 = vpop.f32.mrb[70].mxu1 }
0x1273   : > { %7426 = vrcp.f32 %v4092_v50  ;;  %v8908_v37 = vpop.f32.mrb[77].mxu0  ;;  %v4062_v63 = vpop.f32.mrb[71].mxu1  ;;  %v4093_v11 = vadd.f32 1e-09, %v6727_v8 }
0x1274   : > { %7428 = vrcp.f32 %v4090_v16  ;;  %v4091_v1 = vadd.f32 1e-09, %v4062_v63  ;;  %v8910_v14 = vpop.f32.mrb[78].mxu0 }
0x1275   : > { %v8912_v3 = vpop.f32.mrb[79].mxu0 }
0x1276   : > { %7430 = vrcp.f32 %v4091_v1 }
0x1277   : > { %7432 = vrcp.f32 %v4093_v11 }
0x1278   : > { %v6730_v55 = vpop.f32.mrb[72].mxu1 }
0x1279   : > { %v4075_v21 = vpop.f32.mrb[73].mxu1  ;;  %v4096_v9 = vadd.f32 1e-09, %v6730_v55 }
0x127a   : > { %v4094_v6 = vadd.f32 1e-09, %v4075_v21  ;;  %v8914_v48 = vpop.f32.mrb[80].mxu0  ;;  %v6731_v13 = vpop.f32.mrb[74].mxu1 }
0x127b   : > { %v8916_v7 = vpop.f32.mrb[81].mxu0  ;;  %v4078_v58 = vpop.f32.mrb[75].mxu1  ;;  %v4097_v26 = vadd.f32 1e-09, %v6731_v13 }
0x127c   : > { %7434 = vrcp.f32 %v4094_v6  ;;  %v4095_v15 = vadd.f32 1e-09, %v4078_v58  ;;  %v8918_v17 = vpop.f32.mrb[82].mxu0 }
0x127d   : > { %v7427_v4 = vpop.eup %7426  ;;  %v3948_v20 = vpop.f32.mrb[83].mxu0 }
0x127e   : > { %v7429_v10 = vpop.eup %7428  ;;  %7436 = vrcp.f32 %v4095_v15  ;;  %4118 = vperm.xlu1 %7193, %v7427_v4  }
0x127f   : > { %4108 = vperm.xlu0 %7192, %v7429_v10   ;;  %7438 = vrcp.f32 %v4096_v9  ;;  %v7277_v10 = vld [vmem:[#allocation16 + $0xc8] sm:$0xff]  }
0x1280   : > { %v7431_v18 = vpop.eup %7430  ;;  %7440 = vrcp.f32 %v4097_v26 }
0x1281   : > { %v7433_v59 = vpop.eup %7432 }
0x1282   : > { %4113 = vperm.xlu1 %7193, %v7431_v18  }
0x1286   : > { %v7435_v34 = vpop.eup %7434  ;;  %4123 = vperm.xlu1 %7193, %v7433_v59  }
0x1287   : > { %4128 = vperm.xlu0 %7192, %v7435_v34  }
0x1288   : > { %v7437_v12 = vpop.eup %7436 }
0x1289   : > { %v7439_v5 = vpop.eup %7438 }
0x128a   : > { %4133 = vperm.xlu1 %7193, %v7437_v12   ;;  %v7441_v51 = vpop.eup %7440  ;;  %v7281_v12 = vld [vmem:[#allocation16 + $0xd8] sm:$0xff]  }
0x128b   : > { %4138 = vperm.xlu0 %7192, %v7439_v5   ;;  %v7283_v5 = vld [vmem:[#allocation16 + $0xe0] sm:$0xff]  }
0x128e   : > { %4143 = vperm.xlu1 %7193, %v7441_v51   ;;  %v7285_v51 = vld [vmem:[#allocation16 + $0xe8] sm:$0xff]  }
0x12fd   : > { %v4119_v35 = vpop.permute.xlu1 %4118 }
0x12fe   : > { %v4109_v50 = vpop.permute.xlu0 %4108  ;;  %v4148_v63 = vmul.f32 %v8906_v38, %v4119_v35 }
0x12ff   : > { %v4146_v40 = vmul.f32 %v4109_v50, %v8908_v37  ;;  %v5920_v50 = vld [vmem:[#allocation22 + $0x2] ss:$0 sm:$0xff] }
0x1300   : > { %v4156_v58 = vsub.f32 %v8812_v42, %v4148_v63 }
0x1301   : > { %v4114_v16 = vpop.permute.xlu1 %4113  ;;  %v4154_v1 = vsub.f32 %v8806_v61, %v4146_v40 }
0x1302   : > { %v4147_v8 = vmul.f32 %v4114_v16, %v8912_v3 }
0x1304   : > { %v4155_v11 = vsub.f32 %v8809_v46, %v4147_v8  ;;  %v5921_v8 = vld [vmem:[#allocation23 + $0x2] ss:$0 sm:$0xff] }
0x1305   : > { %v4124_v55 = vpop.permute.xlu1 %4123 }
0x1306   : > { %v4149_v21 = vmul.f32 %v8910_v14, %v4124_v55  ;;  %v4129_v6 = vpop.permute.xlu0 %4128  ;;  %v4162_v13 = vpack.c.bf16 %v4155_v11, %v4154_v1 }
0x1307   : > { %v4150_v37 = vmul.f32 %v4129_v6, %v8916_v7  ;;  %v7279_v7 = vld [vmem:[#allocation16 + $0xd0] sm:$0xff]  }
0x1308   : > { %v4157_v9 = vsub.f32 %v8803_v22, %v4149_v21  ;;  %6748 = vmatprep.mubr.bf16.mxu0 %v4162_v13 }
0x1309   : > { %v4134_v15 = vpop.permute.xlu1 %4133  ;;  %v4158_v26 = vsub.f32 %v8822_v54, %v4150_v37 }
0x130a   : > { %v4163_v3 = vpack.c.bf16 %v4157_v9, %v4156_v58  ;;  %v4151_v4 = vmul.f32 %v4134_v15, %v3948_v20  ;;  %v4139_v38 = vpop.permute.xlu0 %4138 }
0x130b   : > { %v4152_v14 = vmul.f32 %v8914_v48, %v4139_v38  ;;  %v7282_v48 = vld [vmem:[#allocation14 + $0xe0] sm:$0xff]  }
0x130c   : > { %v4159_v31 = vsub.f32 %v8825_v56, %v4151_v4  ;;  %6749 = vmatmul.mubr.bf16.vlgmr.msra.gmra.mrb[84].mxu0 %v4163_v3  ;;  %6764 = vmatprep.subr.bf16.mxu1 %v7282_v48 }
0x130d   : > { %v4144_v18 = vpop.permute.xlu1 %4143  ;;  %6781 = vmatpush3.bf16.msra.mxu0 %v7275_v30  ;;  %v4160_v34 = vsub.f32 %v8828_v57, %v4152_v14  ;;  %6765 = vmatpush3.bf16.msra.mxu1 %v7282_v48  ;;  %v7287_v30 = vld [vmem:[#allocation16 + $0xf0] sm:$0xff]  }
0x130e   : > { %v4153_v28 = vmul.f32 %v8918_v17, %v4144_v18  ;;  %v4164_v59 = vpack.c.bf16 %v4159_v31, %v4158_v26  ;;  %6782 = vmatprep.subr.bf16.mxu0 %v7277_v10  ;;  %v7284_v17 = vld [vmem:[#allocation14 + $0xe8] sm:$0xff]  }
0x130f   : > { %6766 = vmatprep.subr.bf16.mxu1 %v7284_v17 }
0x1310   : > { %v4161_v20 = vsub.f32 %v8819_v32, %v4153_v28  ;;  %6752 = vmatprep.mubr.bf16.mxu0 %v4164_v59 }
0x1311   : > { %6783 = vmatpush3.bf16.msra.mxu0 %v7277_v10  ;;  %6767 = vmatpush3.bf16.msra.mxu1 %v7284_v17 }
0x1312   : > { %v4165_v47 = vpack.c.bf16 %v4161_v20, %v4160_v34  ;;  %6784 = vmatprep.subr.bf16.mxu0 %v7279_v7  ;;  %6768 = vmatprep.subr.bf16.mxu1 %v7286_v53 }
0x1314   : > { %6753 = vmatmul.mubr.bf16.gmra.mrb[88].mxu0 %v4165_v47 }
0x1315   : > { %6785 = vmatpush3.bf16.msra.mxu0 %v7279_v7  ;;  %6769 = vmatpush3.bf16.msra.mxu1 %v7286_v53 }
0x1316   : > { %6786 = vmatprep.subr.bf16.mxu0 %v7281_v12  ;;  %6770 = vmatprep.subr.bf16.mxu1 %v7288_v52 }
0x1319   : > { %6787 = vmatpush3.bf16.msra.mxu0 %v7281_v12  ;;  %6771 = vmatpush3.bf16.msra.mxu1 %v7288_v52 }
0x131a   : > { %6788 = vmatprep.subr.bf16.mxu0 %v7283_v5 }
0x131d   : > { %6789 = vmatpush3.bf16.msra.mxu0 %v7283_v5 }
0x131e   : > { %6790 = vmatprep.subr.bf16.mxu0 %v7285_v51 }
0x1321   : > { %6791 = vmatpush3.bf16.msra.mxu0 %v7285_v51 }
0x1322   : > { %6792 = vmatprep.subr.bf16.mxu0 %v7287_v30 }
0x1325   : > { %6793 = vmatpush3.bf16.msra.mxu0 %v7287_v30 }
0x1326   : > { %6794 = vmatprep.subr.bf16.mxu0 %v7289_v29 }
0x1329   : > { %6795 = vmatpush3.bf16.msra.mxu0 %v7289_v29 }
0x13df   : > { %v6750_v35 = vpop.f32.mrb[84].mxu0 }
0x13e0   : > { %v4282_v40 = vadd.f32 %v6750_v35, %v5911_v19  ;;  %v4273_v16 = vpop.f32.mrb[85].mxu0 }
0x13e1   : > { %v4274_v63 = vadd.f32 %v5911_v19, %v4273_v16  ;;  %v6751_v1 = vpop.f32.mrb[86].mxu0 }
0x13e2   : > { %v4314_v11 = vmul.f32 %v5920_v50, %v4282_v40  ;;  %v4285_v55 = vadd.f32 %v6751_v1, %v5911_v19  ;;  %v4276_v21 = vpop.f32.mrb[87].mxu0 }
0x13e3   : > { %v4312_v6 = vmul.f32 %v5920_v50, %v4274_v63  ;;  %v4277_v13 = vadd.f32 %v5911_v19, %v4276_v21 }
0x13e4   : > { %v4330_v58 = vadd.f32 %v5921_v8, %v4314_v11  ;;  %v4315_v9 = vmul.f32 %v5920_v50, %v4285_v55 }
0x13e5   : > { %v4328_v37 = vadd.f32 %v5921_v8, %v4312_v6  ;;  %v4313_v15 = vmul.f32 %v5920_v50, %v4277_v13 }
0x13e6   : > { %v4331_v3 = vadd.f32 %v5921_v8, %v4315_v9  ;;  %v4338_v26 = vmax.f32 %v4330_v58, 0.0 }
0x13e7   : > { %v4336_v4 = vmax.f32 %v4328_v37, 0.0  ;;  %v4329_v38 = vadd.f32 %v5921_v8, %v4313_v15  ;;  %v6754_v10 = vpop.f32.mrb[88].mxu0 }
0x13e8   : > { %v4339_v31 = vmax.f32 %v4331_v3, 0.0  ;;  %v4298_v14 = vadd.f32 %v6754_v10, %v5911_v19  ;;  %v4289_v18 = vpop.f32.mrb[89].mxu0  ;;  %v8945_v53 = vadd.f32 %v4338_v26, %v8812_v42 }
0x13e9   : > { %v4337_v28 = vmax.f32 %v4329_v38, 0.0  ;;  %v4290_v59 = vadd.f32 %v5911_v19, %v4289_v18  ;;  %v6755_v7 = vpop.f32.mrb[90].mxu0  ;;  %v8939_v48 = vadd.f32 %v4336_v4, %v8806_v61 }
0x13ea   : > { %v8936_v34 = vadd.f32 %v4339_v31, %v8803_v22  ;;  %v4318_v20 = vmul.f32 %v5920_v50, %v4298_v14  ;;  %v4301_v47 = vadd.f32 %v6755_v7, %v5911_v19  ;;  %v4292_v12 = vpop.f32.mrb[91].mxu0 }
0x13eb   : > { %v8942_v5 = vadd.f32 %v4337_v28, %v8809_v46  ;;  %v4316_v17 = vmul.f32 %v5920_v50, %v4290_v59  ;;  %v4293_v51 = vadd.f32 %v5911_v19, %v4292_v12 }
0x13ec   : > { %v4334_v30 = vadd.f32 %v5921_v8, %v4318_v20  ;;  %v4319_v52 = vmul.f32 %v5920_v50, %v4301_v47  ;;  %v4401_v63 = vpack.c.bf16 %v8936_v34, %v8945_v53 }
0x13ed   : > { %v4332_v29 = vadd.f32 %v5921_v8, %v4316_v17  ;;  %v4317_v35 = vmul.f32 %v5920_v50, %v4293_v51  ;;  %v4400_v40 = vpack.c.bf16 %v8942_v5, %v8939_v48 }
0x13ee   : > { %v4335_v16 = vadd.f32 %v5921_v8, %v4319_v52  ;;  %v4342_v55 = vmax.f32 %v4334_v30, 0.0 }
0x13ef   : > { %v4340_v1 = vmax.f32 %v4332_v29, 0.0  ;;  %v4333_v11 = vadd.f32 %v5921_v8, %v4317_v35  ;;  %6772 = vmatprep.mubr.bf16.mxu1 %v4400_v40  ;;  %6796 = vmatprep.mubr.bf16.mxu0 %v4400_v40 }
0x13f0   : > { %v4343_v19 = vmax.f32 %v4335_v16, 0.0  ;;  %6773 = vmatmul.mubr.bf16.vlgmr.msra.gmra.mrb[76].mxu1 %v4401_v63  ;;  %6797 = vmatmul.mubr.bf16.vlgmr.msra.gmra.mrb[92].mxu0 %v4401_v63  ;;  %v8961_v58 = vadd.f32 %v4342_v55, %v8828_v57 }
0x13f1   : > { %v4341_v21 = vmax.f32 %v4333_v11, 0.0  ;;  %v8955_v50 = vadd.f32 %v4340_v1, %v8822_v54 }
0x13f2   : > { %v8952_v6 = vadd.f32 %v4343_v19, %v8819_v32  ;;  %9408 = vst [vmem:[#allocation40_spill] sm:$0xff] %v8961_v58 }
0x13f3   : > { %v8958_v13 = vadd.f32 %v4341_v21, %v8825_v56 }
0x13f4   : > { %9407 = vst [vmem:[#allocation39_spill] sm:$0xff] %v8952_v6  ;;  %v4403_v9 = vpack.c.bf16 %v8952_v6, %v8961_v58 }
0x13f5   : > { %v4402_v8 = vpack.c.bf16 %v8958_v13, %v8955_v50 }
0x13f7   : > { %6776 = vmatprep.mubr.bf16.mxu1 %v4402_v8  ;;  %6800 = vmatprep.mubr.bf16.mxu0 %v4402_v8 }
0x13f8   : > { %6777 = vmatmul.mubr.bf16.gmra.mrb[80].mxu1 %v4403_v9  ;;  %6801 = vmatmul.mubr.bf16.gmra.mrb[96].mxu0 %v4403_v9 }
0x14c3   : > { %v6774_v37 = vpop.f32.mrb[76].mxu1  ;;  %v8967_v15 = vpop.f32.mrb[92].mxu0 }
0x14c4   : > { %v4503_v3 = vpop.f32.mrb[77].mxu1  ;;  %v8969_v4 = vpop.f32.mrb[93].mxu0 }
0x14c5   : > { %v6775_v38 = vpop.f32.mrb[78].mxu1  ;;  %v8971_v10 = vpop.f32.mrb[94].mxu0 }
0x14c6   : > { %v4673_v26 = vpack.c.bf16 %v6775_v38, %v6774_v37  ;;  %v4506_v31 = vpop.f32.mrb[79].mxu1  ;;  %v8973_v14 = vpop.f32.mrb[95].mxu0 }
0x14c7   : > { %v4672_v18 = vpack.c.bf16 %v4506_v31, %v4503_v3 }
0x14c8   : > { %v4680_v35 = vsel %vm1343_vm4, %v4673_v26, 0 }
0x14c9   : > { %6994 = vmatprep.subr.msk.bf16.mxu1 %vm1343_vm4, %v4672_v18  ;;  %6812 = vmatprep.mubr.msk.bf16.mxu1 %vm1343_vm4, %v4672_v18  ;;  %v4677_v28 = vsel %vm1343_vm4, %v4672_v18, 0 }
0x14ca   : > { %6998 = vmatprep.subr.msk.bf16.mxu0 %vm1343_vm4, %v4672_v18  ;;  %6805 = vmatpush3.bf16.xpose.msra.mxu1 %v4677_v28 }
0x14cb   : > { %6817 = vmatpush3.bf16.xpose.msra.mxu0 %v4677_v28  ;;  %v6778_v59 = vpop.f32.mrb[80].mxu1  ;;  %v8979_v7 = vpop.f32.mrb[96].mxu0  ;;  %6995 = vmatprep.subr.msk.bf16.mxu1 %vm1343_vm4, %v4673_v26 }
0x14cc   : > { %6999 = vmatprep.subr.msk.bf16.mxu0 %vm1343_vm4, %v4673_v26  ;;  %v4519_v20 = vpop.f32.mrb[81].mxu1  ;;  %v8983_v47 = vpop.f32.mrb[97].mxu0 }
0x14cd   : > { %v6779_v12 = vpop.f32.mrb[82].mxu1  ;;  %v8985_v17 = vpop.f32.mrb[98].mxu0 }
0x14ce   : > { %v4675_v51 = vpack.c.bf16 %v6779_v12, %v6778_v59  ;;  %v4522_v30 = vpop.f32.mrb[83].mxu1  ;;  %v8987_v52 = vpop.f32.mrb[99].mxu0 }
0x14cf   : > { %v4674_v29 = vpack.c.bf16 %v4522_v30, %v4519_v20 }
0x14d0   : > { %v4686_v16 = vsel %vm1343_vm4, %v4675_v51, 0 }
0x14d1   : > { %6824 = vmatprep.mubr.msk.bf16.mxu0 %vm1343_vm4, %v4674_v29  ;;  %v4683_v40 = vsel %vm1343_vm4, %v4674_v29, 0 }
0x14d2   : > { %6807 = vmatpush3.bf16.xpose.msra.mxu1 %v4680_v35 }
0x14d3   : > { %6819 = vmatpush3.bf16.xpose.msra.mxu0 %v4680_v35  ;;  %6996 = vmatprep.subr.msk.bf16.mxu1 %vm1343_vm4, %v4674_v29 }
0x14d4   : > { %7000 = vmatprep.subr.msk.bf16.mxu0 %vm1343_vm4, %v4674_v29 }
0x14da   : > { %6809 = vmatpush3.bf16.xpose.msra.mxu1 %v4683_v40 }
0x14db   : > { %6821 = vmatpush3.bf16.xpose.msra.mxu0 %v4683_v40  ;;  %6997 = vmatprep.subr.msk.bf16.mxu1 %vm1343_vm4, %v4675_v51 }
0x14dc   : > { %7001 = vmatprep.subr.msk.bf16.mxu0 %vm1343_vm4, %v4675_v51 }
0x14e2   : > { %6811 = vmatpush3.bf16.xpose.msra.mxu1 %v4686_v16 }
0x14e3   : > { %6823 = vmatpush3.bf16.xpose.msra.mxu0 %v4686_v16 }
0x14e9   : > { %6813 = vmatmul.mubr.msk.bf16.vlgmr.msra.gmra.mrb[84].mxu1 %vm1343_vm4, %v4673_v26 }
0x14ea   : > { %6825 = vmatmul.mubr.msk.bf16.vlgmr.msra.gmra.mrb[100].mxu0 %vm1343_vm4, %v4675_v51 }
0x15bc   : > { %v6814_v63 = vpop.f32.mrb[84].mxu1 }
0x15bd   : > { %v6826_v1 = vpop.f32.mrb[100].mxu0  ;;  %v4722_v11 = vpop.f32.mrb[85].mxu1  ;;  %v4743_v59 = vsel %vm1053_vm5, %v6814_v63, -inf }
0x15be   : > { %v4821_v55 = vpop.f32.mrb[101].mxu0  ;;  %v6815_v19 = vpop.f32.mrb[86].mxu1  ;;  %v4842_v38 = vsel %vm1053_vm5, %v6826_v1, -inf  ;;  %v4737_v28 = vsel %vm1053_vm5, %v4722_v11, -inf }
0x15bf   : > { %v6827_v21 = vpop.f32.mrb[102].mxu0  ;;  %v4836_v8 = vsel %vm1053_vm5, %v4821_v55, -inf  ;;  %v4725_v9 = vpop.f32.mrb[87].mxu1  ;;  %v4746_v18 = vsel %vm1053_vm5, %v6815_v19, -inf }
0x15c0   : > { %4837 = vmax.xlane.f32.xlu0 %v4836_v8  ;;  %v4824_v37 = vpop.f32.mrb[103].mxu0  ;;  %v4740_v26 = vsel %vm1053_vm5, %v4725_v9, -inf  ;;  %v4845_v31 = vsel %vm1053_vm5, %v6827_v21, -inf }
0x15c1   : > { %v4839_v3 = vsel %vm1053_vm5, %v4824_v37, -inf }
0x15c2   : > { %4840 = vmax.xlane.f32.xlu1 %v4839_v3 }
0x15c4   : > { %4843 = vmax.xlane.f32.xlu0 %v4842_v38 }
0x15c6   : > { %4741 = vmax.xlane.f32.xlu1 %v4740_v26 }
0x15c8   : > { %4846 = vmax.xlane.f32.xlu0 %v4845_v31 }
0x15ca   : > { %4747 = vmax.xlane.f32.xlu1 %v4746_v18 }
0x15cc   : > { %4738 = vmax.xlane.f32.xlu0 %v4737_v28 }
0x15d0   : > { %4744 = vmax.xlane.f32.xlu0 %v4743_v59 }
0x164d   : > { %v4838_v20 = vpop.xlane.xlu0 %4837 }
0x164e   : > { %v4848_v12 = vsub.f32 %v4821_v55, %v4838_v20 }
0x164f   : > { %v4841_v51 = vpop.xlane.xlu1 %4840 }
0x1650   : > { %v4852_v30 = vmul.f32 1.442695, %v4848_v12  ;;  %v4849_v29 = vsub.f32 %v4824_v37, %v4841_v51 }
0x1651   : > { %v4844_v35 = vpop.xlane.xlu0 %4843 }
0x1652   : > { %v4854_v40 = vmul.f32 1.442695, %v4849_v29  ;;  %v4850_v16 = vsub.f32 %v6826_v1, %v4844_v35  ;;  %7442 = vpow2.f32 %v4852_v30 }
0x1653   : > { %v4742_v8 = vpop.xlane.xlu1 %4741 }
0x1654   : > { %7444 = vpow2.f32 %v4854_v40  ;;  %v4856_v3 = vmul.f32 1.442695, %v4850_v16  ;;  %v4750_v38 = vsub.f32 %v4725_v9, %v4742_v8 }
0x1655   : > { %v4847_v26 = vpop.xlane.xlu0 %4846 }
0x1656   : > { %7446 = vpow2.f32 %v4856_v3  ;;  %v4851_v31 = vsub.f32 %v6827_v21, %v4847_v26  ;;  %v4755_v28 = vmul.f32 1.442695, %v4750_v38 }
0x1657   : > { %v4748_v18 = vpop.xlane.xlu1 %4747 }
0x1658   : > { %v4858_v6 = vmul.f32 1.442695, %v4851_v31  ;;  %v4752_v59 = vsub.f32 %v6815_v19, %v4748_v18 }
0x1659   : > { %v4739_v58 = vpop.xlane.xlu0 %4738 }
0x165a   : > { %7448 = vpow2.f32 %v4858_v6  ;;  %v4749_v55 = vsub.f32 %v4722_v11, %v4739_v58  ;;  %v4759_v37 = vmul.f32 1.442695, %v4752_v59 }
0x165b   : > { %7450 = vpow2.f32 %v4755_v28 }
0x165c   : > { %v4753_v20 = vmul.f32 1.442695, %v4749_v55  ;;  %v7443_v12 = vpop.eup %7442 }
0x165d   : > { %v4745_v1 = vpop.xlane.xlu0 %4744  ;;  %v4860_v58 = vsel %vm1053_vm5, %v7443_v12, 0.0 }
0x165e   : > { %v7445_v51 = vpop.eup %7444  ;;  %7452 = vpow2.f32 %v4753_v20  ;;  %v4751_v30 = vsub.f32 %v6814_v63, %v4745_v1 }
0x165f   : > { %v4863_v9 = vsel %vm1053_vm5, %v7445_v51, 0.0  ;;  %v4876_v29 = vpack.c.bf16 %v7445_v51, %v7443_v12  ;;  %7454 = vpow2.f32 %v4759_v37 }
0x1660   : > { %v7447_v35 = vpop.eup %7446  ;;  %v4757_v21 = vmul.f32 1.442695, %v4751_v30  ;;  %4864 = vadd.xlane.f32.xlu1 %v4863_v9 }
0x1661   : > { %v4866_v19 = vsel %vm1053_vm5, %v7447_v35, 0.0 }
0x1662   : > { %7456 = vpow2.f32 %v4757_v21  ;;  %4867 = vadd.xlane.f32.xlu0 %v4866_v19  ;;  %v5930_v21 = vld [vmem:[#allocation17 + $0x3] ss:$0 sm:$0xff] }
0x1663   : > { %v4658_v19 = vadd.f32 %v5930_v21, %v8983_v47 }
0x1664   : > { %v7449_v6 = vpop.eup %7448 }
0x1665   : > { %v4869_v11 = vsel %vm1053_vm5, %v7449_v6, 0.0  ;;  %v4877_v40 = vpack.c.bf16 %v7449_v6, %v7447_v35  ;;  %v7451_v16 = vpop.eup %7450  ;;  %v4661_v6 = vadd.f32 %v5930_v21, %v8987_v52  ;;  %v4645_v52 = vadd.f32 %v5930_v21, %v8973_v14 }
0x1666   : > { %4861 = vadd.xlane.f32.xlu0 %v4860_v58  ;;  %4870 = vadd.xlane.f32.xlu1 %v4869_v11  ;;  %v4764_v3 = vsel %vm1053_vm5, %v7451_v16, 0.0  ;;  %v4666_v11 = vadd.f32 %v8979_v7, %v5930_v21  ;;  %v4653_v14 = vadd.f32 %v8971_v10, %v5930_v21 }
0x1668   : > { %v7453_v63 = vpop.eup %7452 }
0x1669   : > { %v4761_v8 = vsel %vm1053_vm5, %v7453_v63, 0.0  ;;  %v4777_v38 = vpack.c.bf16 %v7451_v16, %v7453_v63  ;;  %v7455_v26 = vpop.eup %7454 }
0x166a   : > { %4762 = vadd.xlane.f32.xlu0 %v4761_v8  ;;  %4765 = vadd.xlane.f32.xlu1 %v4764_v3  ;;  %v4770_v28 = vsel %vm1053_vm5, %v7455_v26, 0.0 }
0x166c   : > { %v7457_v31 = vpop.eup %7456 }
0x166d   : > { %v4767_v18 = vsel %vm1053_vm5, %v7457_v31, 0.0  ;;  %v4778_v59 = vpack.c.bf16 %v7455_v26, %v7457_v31  ;;  %v4642_v31 = vadd.f32 %v5930_v21, %v8969_v4  ;;  %v4650_v4 = vadd.f32 %v8967_v15, %v5930_v21 }
0x166e   : > { %4768 = vadd.xlane.f32.xlu0 %v4767_v18  ;;  %4771 = vadd.xlane.f32.xlu1 %v4770_v28 }
0x169b   : > { %4886 = vxpose.xlu0.c.b16.start [1/2] (short) (narrow) %v4876_v29, 64  ;;  %4979 = vxpose.xlu1.c.b16.start [1/2] (short) (narrow) %v4777_v38, 64 }
0x169f   : > { %4887 = vxpose.xlu0.c.b16.end [2/2] (short) (narrow) %v4877_v40, 64  ;;  %4980 = vxpose.xlu1.c.b16.end [2/2] (short) (narrow) %v4778_v59, 64  ;;  %v4669_v40 = vadd.f32 %v8985_v17, %v5930_v21 }
0x16ed   : > { %v4865_v55 = vpop.xlane.xlu1 %4864 }
0x16ee   : > { %7458 = vrcp.f32 %v4865_v55 }
0x16ef   : > { %v4868_v37 = vpop.xlane.xlu0 %4867 }
0x16f0   : > { %7460 = vrcp.f32 %v4868_v37 }
0x16f3   : > { %v4862_v20 = vpop.xlane.xlu0 %4861  ;;  %v4871_v12 = vpop.xlane.xlu1 %4870 }
0x16f4   : > { %7462 = vrcp.f32 %v4862_v20 }
0x16f5   : > { %7464 = vrcp.f32 %v4871_v12 }
0x16f7   : > { %v4763_v1 = vpop.xlane.xlu0 %4762  ;;  %v4766_v51 = vpop.xlane.xlu1 %4765 }
0x16f8   : > { %7466 = vrcp.f32 %v4763_v1  ;;  %v7459_v35 = vpop.eup %7458 }
0x16f9   : > { %7468 = vrcp.f32 %v4766_v51  ;;  %v4879_v3 = vmul.f32 %v7459_v35, %v4661_v6 }
0x16fa   : > { %v7461_v29 = vpop.eup %7460 }
0x16fb   : > { %v4769_v30 = vpop.xlane.xlu0 %4768  ;;  %v4772_v9 = vpop.xlane.xlu1 %4771  ;;  %v4880_v38 = vmul.f32 %v7461_v29, %v4666_v11 }
0x16fc   : > { %7470 = vrcp.f32 %v4769_v30 }
0x16fd   : > { %7472 = vrcp.f32 %v4772_v9 }
0x16fe   : > { %v7463_v58 = vpop.eup %7462 }
0x16ff   : > { %v7465_v16 = vpop.eup %7464  ;;  %v4884_v63 = vpack.c.bf16 %v7459_v35, %v7463_v58  ;;  %v4878_v8 = vmul.f32 %v7463_v58, %v4658_v19 }
0x1700   : > { %v4881_v26 = vmul.f32 %v7465_v16, %v4669_v40  ;;  %v4885_v28 = vpack.c.bf16 %v7465_v16, %v7461_v29  ;;  %v7290_v40 = vld [vmem:[#allocation19 + $0xc0] sm:$0xff]   ;;  %v7291_v16 = vld [vmem:[#allocation19 + $0xc8] sm:$0xff]  }
0x1701   : > { %6852 = vmatprep.subr.bf16.mxu0 %v4884_v63  ;;  %v4882_v18 = vpack.c.bf16 %v4879_v3, %v4878_v8  ;;  %v4894_v47 = vpop.trf.xlu0  ;;  %v4987_v10 = vpop.trf.xlu1 }
0x1702   : > { %v7467_v59 = vpop.eup %7466  ;;  %6853 = vmatpush3.bf16.msra.mxu0 %v4884_v63  ;;  %v4883_v55 = vpack.c.bf16 %v4881_v26, %v4880_v38  ;;  %6832 = vmatprep.mubr.msk.bf16.mxu1 %vm1343_vm4, %v4894_v47 }
0x1703   : > { %v7469_v7 = vpop.eup %7468  ;;  %6828 = vmatprep.subr.bf16.mxu1 %v4882_v18  ;;  %6854 = vmatprep.subr.bf16.mxu0 %v4885_v28  ;;  %v4779_v17 = vmul.f32 %v7467_v59, %v4642_v31 }
0x1704   : > { %6829 = vmatpush3.bf16.msra.mxu1 %v4882_v18  ;;  %6856 = vmatprep.mubr.msk.bf16.mxu0 %vm1343_vm4, %v4894_v47  ;;  %v4780_v37 = vmul.f32 %v7469_v7, %v4645_v52  ;;  %v4785_v20 = vpack.c.bf16 %v7469_v7, %v7467_v59  ;;  %v7292_v18 = vld [vmem:[#allocation19 + $0xd0] sm:$0xff]   ;;  %v7293_v7 = vld [vmem:[#allocation19 + $0xd8] sm:$0xff]  }
0x1705   : > { %6830 = vmatprep.subr.bf16.mxu1 %v4883_v55  ;;  %v4895_v12 = vpop.trf.xlu0  ;;  %v4988_v6 = vpop.trf.xlu1 }
0x1706   : > { %v7471_v1 = vpop.eup %7470  ;;  %6855 = vmatpush3.bf16.msra.mxu0 %v4885_v28  ;;  %v4783_v51 = vpack.c.bf16 %v4780_v37, %v4779_v17 }
0x1707   : > { %v7473_v30 = vpop.eup %7472  ;;  %6864 = vmatprep.subr.bf16.mxu0 %v4785_v20  ;;  %v4781_v9 = vmul.f32 %v7471_v1, %v4650_v4 }
0x1708   : > { %6831 = vmatpush3.bf16.msra.mxu1 %v4883_v55  ;;  %v4782_v35 = vmul.f32 %v7473_v30, %v4653_v14  ;;  %v4786_v29 = vpack.c.bf16 %v7473_v30, %v7471_v1  ;;  %v7294_v14 = vld [vmem:[#allocation19 + $0xe0] sm:$0xff]  }
0x1709   : > { %6840 = vmatprep.subr.bf16.mxu1 %v4783_v51  ;;  %6857 = vmatmul.mubr.msk.bf16.vlgmr.msra.gmra.mrb[104].mxu0 %vm1343_vm4, %v4895_v12  ;;  %v4896_v19 = vpop.trf.xlu0  ;;  %v4989_v58 = vpop.trf.xlu1 }
0x170a   : > { %6865 = vmatpush3.bf16.msra.mxu0 %v4785_v20  ;;  %v4784_v15 = vpack.c.bf16 %v4782_v35, %v4781_v9  ;;  %6860 = vmatprep.mubr.msk.bf16.mxu0 %vm1343_vm4, %v4896_v19 }
0x170b   : > { %6833 = vmatmul.mubr.msk.bf16.vlgmr.msra.gmra.mrb[88].mxu1 %vm1343_vm4, %v4895_v12  ;;  %6866 = vmatprep.subr.bf16.mxu0 %v4786_v29 }
0x170c   : > { %6841 = vmatpush3.bf16.msra.mxu1 %v4783_v51  ;;  %6836 = vmatprep.mubr.msk.bf16.mxu1 %vm1343_vm4, %v4896_v19 }
0x170d   : > { %6842 = vmatprep.subr.bf16.mxu1 %v4784_v15  ;;  %v4897_v21 = vpop.trf.xlu0  ;;  %v4990_v11 = vpop.trf.xlu1 }
0x170e   : > { %6867 = vmatpush3.bf16.msra.mxu0 %v4786_v29 }
0x1710   : > { %6843 = vmatpush3.bf16.msra.mxu1 %v4784_v15 }
0x1711   : > { %6861 = vmatmul.mubr.msk.bf16.gmra.mrb[108].mxu0 %vm1343_vm4, %v4897_v21  ;;  %6876 = vmatprep.subr.bf16.mxu1 %v7290_v40 }
0x1712   : > { %6868 = vmatprep.mubr.msk.bf16.mxu0 %vm1343_vm4, %v4987_v10 }
0x1713   : > { %6837 = vmatmul.mubr.msk.bf16.gmra.mrb[92].mxu1 %vm1343_vm4, %v4897_v21 }
0x1714   : > { %6844 = vmatprep.mubr.msk.bf16.mxu1 %vm1343_vm4, %v4987_v10 }
0x1719   : > { %6869 = vmatmul.mubr.msk.bf16.vlgmr.msra.gmra.mrb[104].mxu0 %vm1343_vm4, %v4988_v6 }
0x171a   : > { %6872 = vmatprep.mubr.msk.bf16.mxu0 %vm1343_vm4, %v4989_v58 }
0x171b   : > { %6845 = vmatmul.mubr.msk.bf16.vlgmr.msra.gmra.mrb[88].mxu1 %vm1343_vm4, %v4988_v6  ;;  %v7295_v6 = vld [vmem:[#allocation19 + $0xe8] sm:$0xff]  }
0x171c   : > { %6848 = vmatprep.mubr.msk.bf16.mxu1 %vm1343_vm4, %v4989_v58  ;;  %6877 = vmatpush3.bf16.msra.mxu1 %v7290_v40 }
0x171d   : > { %6878 = vmatprep.subr.bf16.mxu1 %v7291_v16 }
0x1720   : > { %6879 = vmatpush3.bf16.msra.mxu1 %v7291_v16 }
0x1721   : > { %6873 = vmatmul.mubr.msk.bf16.gmra.mrb[108].mxu0 %vm1343_vm4, %v4990_v11  ;;  %6880 = vmatprep.subr.bf16.mxu1 %v7292_v18 }
0x1723   : > { %6849 = vmatmul.mubr.msk.bf16.gmra.mrb[92].mxu1 %vm1343_vm4, %v4990_v11  ;;  %v7296_v11 = vld [vmem:[#allocation19 + $0xf0] sm:$0xff]  }
0x1724   : > { %6881 = vmatpush3.bf16.msra.mxu1 %v7292_v18 }
0x1725   : > { %6882 = vmatprep.subr.bf16.mxu1 %v7293_v7 }
0x1728   : > { %6883 = vmatpush3.bf16.msra.mxu1 %v7293_v7 }
0x1729   : > { %6884 = vmatprep.subr.bf16.mxu1 %v7294_v14 }
0x172c   : > { %6885 = vmatpush3.bf16.msra.mxu1 %v7294_v14 }
0x172d   : > { %6886 = vmatprep.subr.bf16.mxu1 %v7295_v6 }
0x1730   : > { %6887 = vmatpush3.bf16.msra.mxu1 %v7295_v6 }
0x1731   : > { %6888 = vmatprep.subr.bf16.mxu1 %v7296_v11 }
0x1734   : > { %6889 = vmatpush3.bf16.msra.mxu1 %v7296_v11 }
0x17ec   : > { %v6870_v63 = vpop.f32.mrb[104].mxu0 }
0x17ed   : > { %v5204_v8 = vadd.f32 1e-09, %v6870_v63  ;;  %v5171_v3 = vpop.f32.mrb[105].mxu0  ;;  %v7297_v63 = vld [vmem:[#allocation19 + $0xf8] sm:$0xff]  }
0x17ee   : > { %v5202_v38 = vadd.f32 1e-09, %v5171_v3  ;;  %v9039_v26 = vpop.f32.mrb[88].mxu1  ;;  %v6871_v31 = vpop.f32.mrb[106].mxu0  ;;  %6890 = vmatprep.subr.bf16.mxu1 %v7297_v63 }
0x17ef   : > { %7474 = vrcp.f32 %v5204_v8  ;;  %v9041_v28 = vpop.f32.mrb[89].mxu1  ;;  %v5174_v47 = vpop.f32.mrb[107].mxu0  ;;  %v5205_v17 = vadd.f32 1e-09, %v6871_v31  ;;  %6891 = vmatpush3.bf16.msra.mxu1 %v7297_v63 }
0x17f0   : > { %7476 = vrcp.f32 %v5202_v38  ;;  %v5203_v59 = vadd.f32 1e-09, %v5174_v47  ;;  %v9043_v52 = vpop.f32.mrb[90].mxu1 }
0x17f1   : > { %v9045_v55 = vpop.f32.mrb[91].mxu1 }
0x17f2   : > { %7478 = vrcp.f32 %v5203_v59 }
0x17f3   : > { %7480 = vrcp.f32 %v5205_v17 }
0x17f4   : > { %v6874_v37 = vpop.f32.mrb[108].mxu0 }
0x17f5   : > { %v5187_v4 = vpop.f32.mrb[109].mxu0  ;;  %v5208_v9 = vadd.f32 1e-09, %v6874_v37 }
0x17f6   : > { %v5206_v20 = vadd.f32 1e-09, %v5187_v4  ;;  %v9047_v12 = vpop.f32.mrb[92].mxu1  ;;  %v6875_v1 = vpop.f32.mrb[110].mxu0 }
0x17f7   : > { %v9049_v51 = vpop.f32.mrb[93].mxu1  ;;  %v5190_v30 = vpop.f32.mrb[111].mxu0  ;;  %v5209_v21 = vadd.f32 1e-09, %v6875_v1 }
0x17f8   : > { %7482 = vrcp.f32 %v5206_v20  ;;  %v5207_v35 = vadd.f32 1e-09, %v5190_v30  ;;  %v9051_v29 = vpop.f32.mrb[94].mxu1 }
0x17f9   : > { %v7475_v19 = vpop.eup %7474  ;;  %v9053_v15 = vpop.f32.mrb[95].mxu1 }
0x17fa   : > { %v7477_v10 = vpop.eup %7476  ;;  %7484 = vrcp.f32 %v5207_v35  ;;  %5230 = vperm.xlu1 %7193, %v7475_v19  }
0x17fb   : > { %5220 = vperm.xlu0 %7192, %v7477_v10   ;;  %7486 = vrcp.f32 %v5208_v9 }
0x17fc   : > { %v7479_v58 = vpop.eup %7478  ;;  %7488 = vrcp.f32 %v5209_v21 }
0x17fd   : > { %v7481_v40 = vpop.eup %7480 }
0x17fe   : > { %5225 = vperm.xlu1 %7193, %v7479_v58  }
0x1802   : > { %v7483_v16 = vpop.eup %7482  ;;  %5235 = vperm.xlu1 %7193, %v7481_v40  }
0x1803   : > { %5240 = vperm.xlu0 %7192, %v7483_v16  }
0x1804   : > { %v7485_v8 = vpop.eup %7484 }
0x1805   : > { %v7487_v3 = vpop.eup %7486 }
0x1806   : > { %5245 = vperm.xlu1 %7193, %v7485_v8   ;;  %v7489_v38 = vpop.eup %7488 }
0x1807   : > { %5250 = vperm.xlu0 %7192, %v7487_v3  }
0x180a   : > { %5255 = vperm.xlu1 %7193, %v7489_v38  }
0x1825   : > { %1021 = vxpose.xlu0.b32.start [1/8] (short) %v8543_v24, 128 }
0x1829   : > { %1022 = vxpose.xlu0.b32.cont [2/8] (short) %v8545_v25, 128 }
0x182d   : > { %1023 = vxpose.xlu0.b32.cont [3/8] (short) %v8547_v27, 128 }
0x1831   : > { %1024 = vxpose.xlu0.b32.cont [4/8] (short) %v8541_v23, 128 }
0x1833   : > { %2128 = vxpose.xlu1.b32.start [1/8] (short) %v8673_v2, 128 }
0x1835   : > { %1025 = vxpose.xlu0.b32.cont [5/8] (short) %v8555_v41, 128 }
0x1837   : > { %2129 = vxpose.xlu1.b32.cont [2/8] (short) %v8676_v33, 128 }
0x1839   : > { %1026 = vxpose.xlu0.b32.cont [6/8] (short) %v8559_v44, 128 }
0x183b   : > { %2130 = vxpose.xlu1.b32.cont [3/8] (short) %v8679_v49, 128 }
0x183d   : > { %1027 = vxpose.xlu0.b32.cont [7/8] (short) %v8553_v39, 128 }
0x183f   : > { %2131 = vxpose.xlu1.b32.cont [4/8] (short) %v8670_v45, 128 }
0x1841   : > { %1028 = vxpose.xlu0.b32.end [8/8] (short) %v8557_v43, 128 }
0x1843   : > { %2132 = vxpose.xlu1.b32.cont [5/8] (short) %v8689_v36, 128 }
0x1847   : > { %2133 = vxpose.xlu1.b32.cont [6/8] (short) %v8692_v62, 128 }
0x184b   : > { %2134 = vxpose.xlu1.b32.cont [7/8] (short) %v8695_v0, 128 }
0x184f   : > { %2135 = vxpose.xlu1.b32.end [8/8] (short) %v8686_v60, 128 }
0x1862   : > { %3240 = vxpose.xlu0.b32.start [1/8] (short) %v8806_v61, 128 }
0x1866   : > { %3241 = vxpose.xlu0.b32.cont [2/8] (short) %v8809_v46, 128 }
0x186a   : > { %3242 = vxpose.xlu0.b32.cont [3/8] (short) %v8812_v42, 128 }
0x186e   : > { %3243 = vxpose.xlu0.b32.cont [4/8] (short) %v8803_v22, 128 }
0x1870   : > { %4352 = vxpose.xlu1.b32.start [1/8] (short) %v8939_v48, 128 }
0x1872   : > { %3244 = vxpose.xlu0.b32.cont [5/8] (short) %v8822_v54, 128 }
0x1874   : > { %4353 = vxpose.xlu1.b32.cont [2/8] (short) %v8942_v5, 128 }
0x1876   : > { %3245 = vxpose.xlu0.b32.cont [6/8] (short) %v8825_v56, 128  ;;  %v9409_v56 = vld [vmem:[#allocation40_spill] sm:$0xff] }
0x1878   : > { %4354 = vxpose.xlu1.b32.cont [3/8] (short) %v8945_v53, 128 }
0x1879   : > { %v5231_v23 = vpop.permute.xlu1 %5230 }
0x187a   : > { %v5221_v24 = vpop.permute.xlu0 %5220  ;;  %3246 = vxpose.xlu0.b32.cont [7/8] (short) %v8828_v57, 128  ;;  %v5260_v41 = vmul.f32 %v9039_v26, %v5231_v23 }
0x187b   : > { %v5258_v25 = vmul.f32 %v5221_v24, %v9041_v28  ;;  %v9410_v28 = vld [vmem:[#allocation39_spill] sm:$0xff] }
0x187c   : > { %4355 = vxpose.xlu1.b32.cont [4/8] (short) %v8936_v34, 128  ;;  %v5268_v60 = vsub.f32 %v8945_v53, %v5260_v41 }
0x187d   : > { %v5226_v27 = vpop.permute.xlu1 %5225  ;;  %v5266_v43 = vsub.f32 %v8939_v48, %v5258_v25 }
0x187e   : > { %v5259_v39 = vmul.f32 %v5226_v27, %v9045_v55  ;;  %3247 = vxpose.xlu0.b32.end [8/8] (short) %v8819_v32, 128 }
0x1880   : > { %v5267_v44 = vsub.f32 %v8942_v5, %v5259_v39  ;;  %4356 = vxpose.xlu1.b32.cont [5/8] (short) %v8955_v50, 128 }
0x1881   : > { %v5236_v45 = vpop.permute.xlu1 %5235 }
0x1882   : > { %v5261_v2 = vmul.f32 %v9043_v52, %v5236_v45  ;;  %v5241_v33 = vpop.permute.xlu0 %5240  ;;  %v5274_v49 = vpack.c.bf16 %v5267_v44, %v5266_v43 }
0x1883   : > { %v5262_v62 = vmul.f32 %v5241_v33, %v9049_v51 }
0x1884   : > { %v5269_v36 = vsub.f32 %v8936_v34, %v5261_v2  ;;  %4357 = vxpose.xlu1.b32.cont [6/8] (short) %v8958_v13, 128  ;;  %6892 = vmatprep.mubr.bf16.mxu1 %v5274_v49 }
0x1885   : > { %v5246_v0 = vpop.permute.xlu1 %5245  ;;  %v5270_v42 = vsub.f32 %v8955_v50, %v5262_v62 }
0x1886   : > { %v5275_v22 = vpack.c.bf16 %v5269_v36, %v5268_v60  ;;  %v5263_v61 = vmul.f32 %v5246_v0, %v9053_v15  ;;  %v5251_v46 = vpop.permute.xlu0 %5250 }
0x1887   : > { %v5264_v54 = vmul.f32 %v9047_v12, %v5251_v46 }
0x1888   : > { %v5271_v32 = vsub.f32 %v8958_v13, %v5263_v61  ;;  %4358 = vxpose.xlu1.b32.cont [7/8] (short) %v9409_v56, 128  ;;  %6893 = vmatmul.mubr.bf16.vlgmr.msra.gmra.mrb[96].mxu1 %v5275_v22  ;;  %v5959_v61 = vld [vmem:[#allocation20 + $0x3] ss:$0 sm:$0xff] }
0x1889   : > { %v5256_v57 = vpop.permute.xlu1 %5255  ;;  %v5272_v18 = vsub.f32 %v9409_v56, %v5264_v54 }
0x188a   : > { %v5265_v26 = vmul.f32 %v9051_v29, %v5256_v57  ;;  %v5276_v31 = vpack.c.bf16 %v5271_v32, %v5270_v42  ;;  %v5968_v42 = vld [vmem:[#allocation22 + $0x3] ss:$0 sm:$0xff] }
0x188c   : > { %v5273_v47 = vsub.f32 %v9410_v28, %v5265_v26  ;;  %4359 = vxpose.xlu1.b32.end [8/8] (short) %v9410_v28, 128  ;;  %6896 = vmatprep.mubr.bf16.mxu1 %v5276_v31 }
0x188e   : > { %v5277_v59 = vpack.c.bf16 %v5273_v47, %v5272_v18  ;;  %v5969_v18 = vld [vmem:[#allocation23 + $0x3] ss:$0 sm:$0xff] }
0x1890   : > { %6897 = vmatmul.mubr.bf16.gmra.mrb[100].mxu1 %v5277_v59 }
0x18a5   : > { %v1037_v52 = vpop.trf.xlu0 }
0x18a6   : > { %1054 = vst.msk [vmem:[%s9104_s24] sm:$0xff] %vm1053_vm5, %v1037_v52 }
0x18a9   : > { %v1038_v55 = vpop.trf.xlu0 }
0x18aa   : > { %1055 = vst.msk [vmem:[%s9104_s24 + $0x8] sm:$0xff] %vm1053_vm5, %v1038_v55 }
0x18ad   : > { %v1039_v7 = vpop.trf.xlu0 }
0x18ae   : > { %1056 = vst.msk [vmem:[%s9104_s24 + $0x10] sm:$0xff] %vm1053_vm5, %v1039_v7 }
0x18b1   : > { %v1040_v17 = vpop.trf.xlu0 }
0x18b2   : > { %1057 = vst.msk [vmem:[%s9104_s24 + $0x18] sm:$0xff] %vm1053_vm5, %v1040_v17 }
0x18b3   : > { %v2144_v12 = vpop.trf.xlu1 }
0x18b4   : > { %2160 = vst.msk [vmem:[%s9104_s24 + $0x80] sm:$0xff] %vm1053_vm5, %v2144_v12 }
0x18b5   : > { %v1041_v37 = vpop.trf.xlu0 }
0x18b6   : > { %1058 = vst.msk [vmem:[%s9104_s24 + $0x20] sm:$0xff] %vm1053_vm5, %v1041_v37 }
0x18b7   : > { %v2145_v14 = vpop.trf.xlu1 }
0x18b8   : > { %2161 = vst.msk [vmem:[%s9104_s24 + $0x88] sm:$0xff] %vm1053_vm5, %v2145_v14 }
0x18b9   : > { %v1042_v4 = vpop.trf.xlu0 }
0x18ba   : > { %1059 = vst.msk [vmem:[%s9104_s24 + $0x28] sm:$0xff] %vm1053_vm5, %v1042_v4 }
0x18bb   : > { %v2146_v30 = vpop.trf.xlu1 }
0x18bc   : > { %2162 = vst.msk [vmem:[%s9104_s24 + $0x90] sm:$0xff] %vm1053_vm5, %v2146_v30 }
0x18bd   : > { %v1043_v20 = vpop.trf.xlu0 }
0x18be   : > { %1060 = vst.msk [vmem:[%s9104_s24 + $0x30] sm:$0xff] %vm1053_vm5, %v1043_v20 }
0x18bf   : > { %v2147_v35 = vpop.trf.xlu1 }
0x18c0   : > { %2163 = vst.msk [vmem:[%s9104_s24 + $0x98] sm:$0xff] %vm1053_vm5, %v2147_v35 }
0x18c1   : > { %v1044_v1 = vpop.trf.xlu0 }
0x18c2   : > { %1061 = vst.msk [vmem:[%s9104_s24 + $0x38] sm:$0xff] %vm1053_vm5, %v1044_v1 }
0x18c3   : > { %v2148_v19 = vpop.trf.xlu1 }
0x18c4   : > { %2164 = vst.msk [vmem:[%s9104_s24 + $0xa0] sm:$0xff] %vm1053_vm5, %v2148_v19 }
0x18c5   : > { %v1045_v51 = vpop.trf.xlu0 }
0x18c6   : > { %1062 = vst.msk [vmem:[%s9104_s24 + $0x40] sm:$0xff] %vm1053_vm5, %v1045_v51 }
0x18c7   : > { %v2149_v10 = vpop.trf.xlu1 }
0x18c8   : > { %2165 = vst.msk [vmem:[%s9104_s24 + $0xa8] sm:$0xff] %vm1053_vm5, %v2149_v10 }
0x18c9   : > { %v1046_v9 = vpop.trf.xlu0 }
0x18ca   : > { %1063 = vst.msk [vmem:[%s9104_s24 + $0x48] sm:$0xff] %vm1053_vm5, %v1046_v9 }
0x18cb   : > { %v2150_v6 = vpop.trf.xlu1 }
0x18cc   : > { %2166 = vst.msk [vmem:[%s9104_s24 + $0xb0] sm:$0xff] %vm1053_vm5, %v2150_v6 }
0x18cd   : > { %v1047_v29 = vpop.trf.xlu0 }
0x18ce   : > { %1064 = vst.msk [vmem:[%s9104_s24 + $0x50] sm:$0xff] %vm1053_vm5, %v1047_v29 }
0x18cf   : > { %v2151_v11 = vpop.trf.xlu1 }
0x18d0   : > { %2167 = vst.msk [vmem:[%s9104_s24 + $0xb8] sm:$0xff] %vm1053_vm5, %v2151_v11 }
0x18d1   : > { %v1048_v15 = vpop.trf.xlu0 }
0x18d2   : > { %1065 = vst.msk [vmem:[%s9104_s24 + $0x58] sm:$0xff] %vm1053_vm5, %v1048_v15 }
0x18d3   : > { %v2152_v16 = vpop.trf.xlu1 }
0x18d4   : > { %2168 = vst.msk [vmem:[%s9104_s24 + $0xc0] sm:$0xff] %vm1053_vm5, %v2152_v16 }
0x18d5   : > { %v1049_v21 = vpop.trf.xlu0 }
0x18d6   : > { %1066 = vst.msk [vmem:[%s9104_s24 + $0x60] sm:$0xff] %vm1053_vm5, %v1049_v21 }
0x18d7   : > { %v2153_v8 = vpop.trf.xlu1 }
0x18d8   : > { %2169 = vst.msk [vmem:[%s9104_s24 + $0xc8] sm:$0xff] %vm1053_vm5, %v2153_v8 }
0x18d9   : > { %v1050_v58 = vpop.trf.xlu0 }
0x18da   : > { %1067 = vst.msk [vmem:[%s9104_s24 + $0x68] sm:$0xff] %vm1053_vm5, %v1050_v58 }
0x18db   : > { %v2154_v38 = vpop.trf.xlu1 }
0x18dc   : > { %2170 = vst.msk [vmem:[%s9104_s24 + $0xd0] sm:$0xff] %vm1053_vm5, %v2154_v38 }
0x18dd   : > { %v1051_v40 = vpop.trf.xlu0 }
0x18de   : > { %1068 = vst.msk [vmem:[%s9104_s24 + $0x70] sm:$0xff] %vm1053_vm5, %v1051_v40 }
0x18df   : > { %v2155_v24 = vpop.trf.xlu1 }
0x18e0   : > { %2171 = vst.msk [vmem:[%s9104_s24 + $0xd8] sm:$0xff] %vm1053_vm5, %v2155_v24 }
0x18e1   : > { %v1052_v63 = vpop.trf.xlu0 }
0x18e2   : > { %1069 = vst.msk [vmem:[%s9104_s24 + $0x78] sm:$0xff] %vm1053_vm5, %v1052_v63 }
0x18e3   : > { %v2156_v27 = vpop.trf.xlu1 }
0x18e4   : > { %2172 = vst.msk [vmem:[%s9104_s24 + $0xe0] sm:$0xff] %vm1053_vm5, %v2156_v27 }
0x18e5   : > { %v3256_v3 = vpop.trf.xlu0 }
0x18e6   : > { %3272 = vst.msk [vmem:[%s9104_s24 + $0x100] sm:$0xff] %vm1053_vm5, %v3256_v3 }
0x18e7   : > { %v2157_v41 = vpop.trf.xlu1 }
0x18e8   : > { %2173 = vst.msk [vmem:[%s9104_s24 + $0xe8] sm:$0xff] %vm1053_vm5, %v2157_v41 }
0x18e9   : > { %v3257_v23 = vpop.trf.xlu0 }
0x18ea   : > { %3273 = vst.msk [vmem:[%s9104_s24 + $0x108] sm:$0xff] %vm1053_vm5, %v3257_v23 }
0x18eb   : > { %v2158_v44 = vpop.trf.xlu1 }
0x18ec   : > { %2174 = vst.msk [vmem:[%s9104_s24 + $0xf0] sm:$0xff] %vm1053_vm5, %v2158_v44 }
0x18ed   : > { %v3258_v25 = vpop.trf.xlu0 }
0x18ee   : > { %3274 = vst.msk [vmem:[%s9104_s24 + $0x110] sm:$0xff] %vm1053_vm5, %v3258_v25 }
0x18ef   : > { %v2159_v2 = vpop.trf.xlu1 }
0x18f0   : > { %2175 = vst.msk [vmem:[%s9104_s24 + $0xf8] sm:$0xff] %vm1053_vm5, %v2159_v2 }
0x18f1   : > { %v3259_v39 = vpop.trf.xlu0 }
0x18f2   : > { %3275 = vst.msk [vmem:[%s9104_s24 + $0x118] sm:$0xff] %vm1053_vm5, %v3259_v39 }
0x18f3   : > { %v4368_v6 = vpop.trf.xlu1 }
0x18f4   : > { %4384 = vst.msk [vmem:[%s9104_s24 + $0x180] sm:$0xff] %vm1053_vm5, %v4368_v6 }
0x18f5   : > { %v3260_v43 = vpop.trf.xlu0 }
0x18f6   : > { %3276 = vst.msk [vmem:[%s9104_s24 + $0x120] sm:$0xff] %vm1053_vm5, %v3260_v43 }
0x18f7   : > { %v4369_v63 = vpop.trf.xlu1 }
0x18f8   : > { %4385 = vst.msk [vmem:[%s9104_s24 + $0x188] sm:$0xff] %vm1053_vm5, %v4369_v63 }
0x18f9   : > { %v3261_v45 = vpop.trf.xlu0 }
0x18fa   : > { %3277 = vst.msk [vmem:[%s9104_s24 + $0x128] sm:$0xff] %vm1053_vm5, %v3261_v45 }
0x18fd   : > { %v3262_v33 = vpop.trf.xlu0 }
0x18fe   : > { %3278 = vst.msk [vmem:[%s9104_s24 + $0x130] sm:$0xff] %vm1053_vm5, %v3262_v33 }
0x1901   : > { %v3263_v49 = vpop.trf.xlu0 }
0x1902   : > { %3279 = vst.msk [vmem:[%s9104_s24 + $0x138] sm:$0xff] %vm1053_vm5, %v3263_v49 }
0x1905   : > { %v3264_v60 = vpop.trf.xlu0 }
0x1906   : > { %3280 = vst.msk [vmem:[%s9104_s24 + $0x140] sm:$0xff] %vm1053_vm5, %v3264_v60 }
0x1909   : > { %v3265_v36 = vpop.trf.xlu0 }
0x190a   : > { %3281 = vst.msk [vmem:[%s9104_s24 + $0x148] sm:$0xff] %vm1053_vm5, %v3265_v36 }
0x190d   : > { %v3266_v62 = vpop.trf.xlu0 }
0x190e   : > { %3282 = vst.msk [vmem:[%s9104_s24 + $0x150] sm:$0xff] %vm1053_vm5, %v3266_v62 }
0x1911   : > { %v3267_v0 = vpop.trf.xlu0 }
0x1912   : > { %3283 = vst.msk [vmem:[%s9104_s24 + $0x158] sm:$0xff] %vm1053_vm5, %v3267_v0 }
0x1915   : > { %v3268_v22 = vpop.trf.xlu0 }
0x1916   : > { %3284 = vst.msk [vmem:[%s9104_s24 + $0x160] sm:$0xff] %vm1053_vm5, %v3268_v22 }
0x1919   : > { %v3269_v54 = vpop.trf.xlu0 }
0x191a   : > { %3285 = vst.msk [vmem:[%s9104_s24 + $0x168] sm:$0xff] %vm1053_vm5, %v3269_v54 }
0x191d   : > { %v3270_v7 = vpop.trf.xlu0 }
0x191e   : > { %3286 = vst.msk [vmem:[%s9104_s24 + $0x170] sm:$0xff] %vm1053_vm5, %v3270_v7 }
0x1921   : > { %v3271_v30 = vpop.trf.xlu0 }
0x1922   : > { %3287 = vst.msk [vmem:[%s9104_s24 + $0x178] sm:$0xff] %vm1053_vm5, %v3271_v30 }
0x195b   : > { %v6894_v46 = vpop.f32.mrb[96].mxu1 }
0x195c   : > { %v5385_v32 = vpop.f32.mrb[97].mxu1  ;;  %v5394_v57 = vadd.f32 %v6894_v46, %v5959_v61 }
0x195d   : > { %v5386_v26 = vadd.f32 %v5959_v61, %v5385_v32  ;;  %v6895_v31 = vpop.f32.mrb[98].mxu1 }
0x195e   : > { %v5388_v47 = vpop.f32.mrb[99].mxu1  ;;  %v5397_v55 = vadd.f32 %v6895_v31, %v5959_v61  ;;  %v5426_v17 = vmul.f32 %v5968_v42, %v5394_v57 }
0x195f   : > { %v5424_v59 = vmul.f32 %v5968_v42, %v5386_v26  ;;  %v5389_v52 = vadd.f32 %v5959_v61, %v5388_v47 }
0x1960   : > { %v5427_v14 = vmul.f32 %v5968_v42, %v5397_v55  ;;  %v5442_v9 = vadd.f32 %v5969_v18, %v5426_v17 }
0x1961   : > { %v5440_v37 = vadd.f32 %v5969_v18, %v5424_v59  ;;  %v5425_v4 = vmul.f32 %v5968_v42, %v5389_v52 }
0x1962   : > { %v5443_v21 = vadd.f32 %v5969_v18, %v5427_v14  ;;  %v5450_v58 = vmax.f32 %v5442_v9, 0.0 }
0x1963   : > { %v5448_v20 = vmax.f32 %v5440_v37, 0.0  ;;  %v5441_v12 = vadd.f32 %v5969_v18, %v5425_v4  ;;  %v6898_v1 = vpop.f32.mrb[100].mxu1 }
0x1964   : > { %v5401_v51 = vpop.f32.mrb[101].mxu1  ;;  %v5458_v8 = vadd.f32 %v5450_v58, %v8945_v53  ;;  %v5410_v3 = vadd.f32 %v6898_v1, %v5959_v61 }
0x1965   : > { %v5456_v35 = vadd.f32 %v5448_v20, %v8939_v48  ;;  %v5449_v29 = vmax.f32 %v5441_v12, 0.0  ;;  %v5402_v19 = vadd.f32 %v5959_v61, %v5401_v51  ;;  %v6899_v15 = vpop.f32.mrb[102].mxu1  ;;  %v5451_v48 = vmax.f32 %v5443_v21, 0.0 }
0x1966   : > { %v5404_v10 = vpop.f32.mrb[103].mxu1  ;;  %v5430_v25 = vmul.f32 %v5968_v42, %v5410_v3  ;;  %v5413_v39 = vadd.f32 %v6899_v15, %v5959_v61 }
0x1967   : > { %5464 = vxpose.xlu0.b32.start [1/8] (short) %v5456_v35, 128  ;;  %v5457_v11 = vadd.f32 %v5449_v29, %v8942_v5  ;;  %v5428_v40 = vmul.f32 %v5968_v42, %v5402_v19  ;;  %v5405_v16 = vadd.f32 %v5959_v61, %v5404_v10  ;;  %v5459_v24 = vadd.f32 %v5451_v48, %v8936_v34  ;;  %v4370_v5 = vpop.trf.xlu1 }
0x1968   : > { %4386 = vst.msk [vmem:[%s9104_s24 + $0x190] sm:$0xff] %vm1053_vm5, %v4370_v5  ;;  %v5446_v53 = vadd.f32 %v5969_v18, %v5430_v25  ;;  %v5431_v45 = vmul.f32 %v5968_v42, %v5413_v39 }
0x1969   : > { %v5444_v38 = vadd.f32 %v5969_v18, %v5428_v40  ;;  %v5429_v23 = vmul.f32 %v5968_v42, %v5405_v16 }
0x196a   : > { %v5454_v33 = vmax.f32 %v5446_v53, 0.0  ;;  %v5447_v49 = vadd.f32 %v5969_v18, %v5431_v45 }
0x196b   : > { %5465 = vxpose.xlu0.b32.cont [2/8] (short) %v5457_v11, 128  ;;  %v5452_v27 = vmax.f32 %v5444_v38, 0.0  ;;  %v5445_v41 = vadd.f32 %v5969_v18, %v5429_v23  ;;  %v4371_v43 = vpop.trf.xlu1 }
0x196c   : > { %4387 = vst.msk [vmem:[%s9104_s24 + $0x198] sm:$0xff] %vm1053_vm5, %v4371_v43  ;;  %v5455_v62 = vmax.f32 %v5447_v49, 0.0 }
0x196d   : > { %v5460_v44 = vadd.f32 %v5452_v27, %v8955_v50  ;;  %v5453_v2 = vmax.f32 %v5445_v41, 0.0  ;;  %v5462_v50 = vadd.f32 %v5454_v33, %v9409_v56 }
0x196e   : > { %v5463_v22 = vadd.f32 %v5455_v62, %v9410_v28 }
0x196f   : > { %5466 = vxpose.xlu0.b32.cont [3/8] (short) %v5458_v8, 128  ;;  %v4372_v34 = vpop.trf.xlu1  ;;  %v5461_v60 = vadd.f32 %v5453_v2, %v8958_v13 }
0x1970   : > { %4388 = vst.msk [vmem:[%s9104_s24 + $0x1a0] sm:$0xff] %vm1053_vm5, %v4372_v34 }
0x1973   : > { %5467 = vxpose.xlu0.b32.cont [4/8] (short) %v5459_v24, 128  ;;  %v4373_v36 = vpop.trf.xlu1 }
0x1974   : > { %4389 = vst.msk [vmem:[%s9104_s24 + $0x1a8] sm:$0xff] %vm1053_vm5, %v4373_v36 }
0x1977   : > { %5468 = vxpose.xlu0.b32.cont [5/8] (short) %v5460_v44, 128  ;;  %v4374_v0 = vpop.trf.xlu1 }
0x1978   : > { %4390 = vst.msk [vmem:[%s9104_s24 + $0x1b0] sm:$0xff] %vm1053_vm5, %v4374_v0 }
0x197b   : > { %5469 = vxpose.xlu0.b32.cont [6/8] (short) %v5461_v60, 128  ;;  %v4375_v13 = vpop.trf.xlu1 }
0x197c   : > { %4391 = vst.msk [vmem:[%s9104_s24 + $0x1b8] sm:$0xff] %vm1053_vm5, %v4375_v13 }
0x197f   : > { %5470 = vxpose.xlu0.b32.cont [7/8] (short) %v5462_v50, 128  ;;  %v4376_v61 = vpop.trf.xlu1 }
0x1980   : > { %4392 = vst.msk [vmem:[%s9104_s24 + $0x1c0] sm:$0xff] %vm1053_vm5, %v4376_v61 }
0x1983   : > { %5471 = vxpose.xlu0.b32.end [8/8] (short) %v5463_v22, 128  ;;  %v4377_v56 = vpop.trf.xlu1 }
0x1984   : > { %4393 = vst.msk [vmem:[%s9104_s24 + $0x1c8] sm:$0xff] %vm1053_vm5, %v4377_v56 }
0x1987   : > { %v4378_v46 = vpop.trf.xlu1 }
0x1988   : > { %4394 = vst.msk [vmem:[%s9104_s24 + $0x1d0] sm:$0xff] %vm1053_vm5, %v4378_v46 }
0x198b   : > { %v4379_v28 = vpop.trf.xlu1 }
0x198c   : > { %4395 = vst.msk [vmem:[%s9104_s24 + $0x1d8] sm:$0xff] %vm1053_vm5, %v4379_v28 }
0x198f   : > { %v4380_v42 = vpop.trf.xlu1 }
0x1990   : > { %4396 = vst.msk [vmem:[%s9104_s24 + $0x1e0] sm:$0xff] %vm1053_vm5, %v4380_v42 }
0x1993   : > { %v4381_v32 = vpop.trf.xlu1 }
0x1994   : > { %4397 = vst.msk [vmem:[%s9104_s24 + $0x1e8] sm:$0xff] %vm1053_vm5, %v4381_v32 }
0x1997   : > { %v4382_v54 = vpop.trf.xlu1 }
0x1998   : > { %4398 = vst.msk [vmem:[%s9104_s24 + $0x1f0] sm:$0xff] %vm1053_vm5, %v4382_v54 }
0x199b   : > { %v4383_v57 = vpop.trf.xlu1 }
0x199c   : > { %4399 = vst.msk [vmem:[%s9104_s24 + $0x1f8] sm:$0xff] %vm1053_vm5, %v4383_v57 }
0x19e7   : > { %v5480_v26 = vpop.trf.xlu0 }
0x19e8   : > { %5496 = vst.msk [vmem:[%s9104_s24 + $0x200] sm:$0xff] %vm1053_vm5, %v5480_v26 }
0x19eb   : > { %v5481_v31 = vpop.trf.xlu0 }
0x19ec   : > { %5497 = vst.msk [vmem:[%s9104_s24 + $0x208] sm:$0xff] %vm1053_vm5, %v5481_v31 }
0x19ef   : > { %v5482_v18 = vpop.trf.xlu0 }
0x19f0   : > { %5498 = vst.msk [vmem:[%s9104_s24 + $0x210] sm:$0xff] %vm1053_vm5, %v5482_v18 }
0x19f3   : > { %v5483_v47 = vpop.trf.xlu0 }
0x19f4   : > { %5499 = vst.msk [vmem:[%s9104_s24 + $0x218] sm:$0xff] %vm1053_vm5, %v5483_v47 }
0x19f7   : > { %v5484_v59 = vpop.trf.xlu0 }
0x19f8   : > { %5500 = vst.msk [vmem:[%s9104_s24 + $0x220] sm:$0xff] %vm1053_vm5, %v5484_v59 }
0x19fb   : > { %v5485_v52 = vpop.trf.xlu0 }
0x19fc   : > { %5501 = vst.msk [vmem:[%s9104_s24 + $0x228] sm:$0xff] %vm1053_vm5, %v5485_v52 }
0x19ff   : > { %v5486_v55 = vpop.trf.xlu0 }
0x1a00   : > { %5502 = vst.msk [vmem:[%s9104_s24 + $0x230] sm:$0xff] %vm1053_vm5, %v5486_v55 }
0x1a03   : > { %v5487_v7 = vpop.trf.xlu0 }
0x1a04   : > { %5503 = vst.msk [vmem:[%s9104_s24 + $0x238] sm:$0xff] %vm1053_vm5, %v5487_v7 }
0x1a07   : > { %v5488_v17 = vpop.trf.xlu0 }
0x1a08   : > { %5504 = vst.msk [vmem:[%s9104_s24 + $0x240] sm:$0xff] %vm1053_vm5, %v5488_v17 }
0x1a0b   : > { %v5489_v37 = vpop.trf.xlu0 }
0x1a0c   : > { %5505 = vst.msk [vmem:[%s9104_s24 + $0x248] sm:$0xff] %vm1053_vm5, %v5489_v37 }
0x1a0f   : > { %v5490_v4 = vpop.trf.xlu0 }
0x1a10   : > { %5506 = vst.msk [vmem:[%s9104_s24 + $0x250] sm:$0xff] %vm1053_vm5, %v5490_v4 }
0x1a13   : > { %v5491_v20 = vpop.trf.xlu0 }
0x1a14   : > { %5507 = vst.msk [vmem:[%s9104_s24 + $0x258] sm:$0xff] %vm1053_vm5, %v5491_v20 }
0x1a17   : > { %v5492_v12 = vpop.trf.xlu0 }
0x1a18   : > { %5508 = vst.msk [vmem:[%s9104_s24 + $0x260] sm:$0xff] %vm1053_vm5, %v5492_v12 }
0x1a1b   : > { %v5493_v1 = vpop.trf.xlu0 }
0x1a1c   : > { %5509 = vst.msk [vmem:[%s9104_s24 + $0x268] sm:$0xff] %vm1053_vm5, %v5493_v1 }
0x1a1f   : > { %v5494_v14 = vpop.trf.xlu0 }
0x1a20   : > { %5510 = vst.msk [vmem:[%s9104_s24 + $0x270] sm:$0xff] %vm1053_vm5, %v5494_v14 }
0x1a23   : > { %v5495_v51 = vpop.trf.xlu0 }
0x1a24   : > { %5511 = vst.msk [vmem:[%s9104_s24 + $0x278] sm:$0xff] %vm1053_vm5, %v5495_v51 }
0x1a25   : > { %7897 = shalt.err (!%p7894_p4)
}
0x1a26   : > { %s7898_s24 = scalar_lea.hbm %s9277_s1, 10240  ;;  %s7902_s29 = scalar_lea.hbm %s9411_s3, 20480 }
0x1a27   : > { %p7899_p12 = scmp.ne.s32.totalorder %s9277_s1, %s7898_s24  ;;  %p7903_p0 = scmp.lt.u32.totalorder %s9277_s1, %s9411_s3 }
0x1a28   : > { %p7904_p2 = scmp.lt.u32.totalorder %s7902_s29, %s7898_s24  ;;  %p7906_p6 = scmp.lt.u32.totalorder %s7898_s24, %s9277_s1 }
0x1a29   : > { %p7900_p1 = pnand %p7899_p12, %p9412_p10 }
0x1a2a   : > { %p7905_p8 = por %p7904_p2, %p7903_p0 }
0x1a2b   : > { %p7901_p13 = pneg %p7900_p1 }
0x1a2c   : > { %p7907_p11 = por %p7906_p6, %p7905_p8 }
0x1a2e   : > { %p7908_p3 = pnand %p7907_p11, %p7901_p13 }
0x1a30   : > { %7911 = shalt.err (!%p7908_p3)
}
0x1a31   : > { %s8003_s19 = smov 128   ;;  %s8004_s25 = smov 8  }
0x1a32   : > { %7058 = dma.vmem_to_hbm [thread:$0]  (%p9412_p10), %s9279_s23, 10240, %s9277_s1, %s5513_s14, %s8003_s19, %s8003_s19, %s8004_s25  }
0x1a33 PF: > { %s9413_s26 = sld [smem:[#allocation35_spill]]  ;;  %p9414_p5 = scmp.ne.s32.totalorder %s9384_s17, 0 }
0x1a34   : > { %p9415_p9 = scmp.ge.s32.totalorder %s7978_s16, 2 }
0x1a36   : > { %p7105_p7 = pnand %p9415_p9, %p9414_p5 }
0x1a39   : > { %s5541_s27 = sand.u32 1, %s9413_s26  }
0x1a3a   : > { %s5542_s24 = scalar_lea.sflag [#allocation4], %s5541_s27 }
0x1a3b   : > { %7961 = dma.done.wait (!%p7105_p7), %s5542_s24, 10240  }
0x1a3c   : > { %7963 = vsyncadd (!%p7105_p7), %s5542_s24, 4294957056  ;;  %s9416_s29 = sld [smem:[#allocation36_spill]]  ;;  %s9417_s22 = smov %s8411_s30 }
0x1a3d   : > { %p34_p4 = scmp.ge.s32.totalorder %s8411_s30, 4   ;;  %s9418_s30 = smov %s7974_s15 }
0x1a3e   : > { %s9419_s15 = smov %s8423_s0  ;;  %s9420_s16 = smov %s9417_s22 }
0x1a3f   :  { %36 = sbr.rel (!%p34_p4) target bundleno = 17 (0x11), region = 194 }
0x1a46   :  { %5547 = vsyncpa [#allocation3], 1 }
0x1a47   :  { %5549 = vsyncpa [#allocation3 + $0x1], 1 }
0x1a48   :  { %5550 = vsyncpa [#allocation6], 1 }
0x1a49   :  { %5551 = vsyncpa [#allocation9], 1 }
0x1a4a   :  { %5552 = vsyncpa [#allocation12], 1 }
0x1a4b   :  { %5553 = vsyncpa [#allocation15], 1 }
0x1a4c   :  { %5554 = vsyncpa [#allocation18], 1 }
0x1a4d   :  { %5555 = vsyncpa [#allocation21], 1 }
0x1a4e   :  { %5556 = vsyncpa [#allocation24], 1 }
0x1a4f   :  { %5557 = vsyncpa [#allocation4], 1 }
0x1a50   :  { %5559 = vsyncpa [#allocation4 + $0x1], 1 }

</bundles_post_ra>
